<compile_context>
chip_gen: v7x
topology: tpu7x:2x2x1
jax: 0.10.0
libtpu: 0.0.40
codegen_flags: <defaults>
</compile_context>

<pallas_src>
import math

import jax
import jax.numpy as jnp
from jax import lax
from jax.experimental import pallas as pl
from jax.experimental.pallas import tpu as pltpu

# ----------------------------- config (small) --------------------------------
B = 2            # batch
S = 8            # sequence length
E = 128          # embedding dim (tok_embeddings / upscaler output)
D = 64           # model dim (ModelArgs.dim)
H = 4            # heads
DH = D // H      # head dim = 16
DH2 = DH // 2    # 8
L = 2            # number of transformer layers
VOCAB = 32
MULTIPLE_OF = 64
NORM_EPS = 1e-5

_hid = int(2 * (4 * D) / 3)
HID = MULTIPLE_OF * ((_hid + MULTIPLE_OF - 1) // MULTIPLE_OF)  # 192
HIDP = 256                   # lane-aligned padded hidden width (>= HID, multiple of 128)
BS = B * S                   # 16 token rows
HBS = H * B * S              # 64 stacked (head, batch, seq) rows
QKV_COLS = 3 * H * DH        # 192


# --------------------------------- kernel -------------------------------------
def encoder_kernel(x_ref,      # (BS, D)        embeddings with downscaler pre-folded
                   cos_ref,    # (2*HBS, DH2)   RoPE cos, tiled over {q,k}xHxB, *DH**-0.25
                   sin_ref,    # (2*HBS, DH2)
                   mask_ref,   # (HBS, HBS)     block-diagonal causal -inf mask
                   wqkv_ref,   # (L, D, QKV_COLS)  head-major [q|k|v], attention_norm folded
                   wo_ref,     # (L, H*DH, D)
                   w13_ref,    # (L, D, 2*HIDP) fused [w1|pad|w3|pad], ffn_norm folded
                   w2_ref,     # (L, HIDP, D)   zero-padded rows 192:256
                   wup_ref,    # (D, E)         final norm folded
                   out_ref):   # (BS, E)        lane-dense (128-wide) output
    f32 = jnp.float32
    bf16 = jnp.bfloat16

    def mm(a, b):
        # bf16 MXU operands, f32 accumulation (works on v5e/v6e/v7x)
        return jnp.dot(a.astype(bf16), b.astype(bf16), preferred_element_type=f32)

    def rms(v):
        # norm gain vectors are folded into the following weight matrices
        ms = jnp.mean(v * v, axis=-1, keepdims=True)
        return v * lax.rsqrt(ms + NORM_EPS)

    h = x_ref[...]            # (BS, D), f32 residual stream
    cos = cos_ref[...]        # (128, 8)
    sin = sin_ref[...]
    mask = mask_ref[...]      # (64, 64)

    for l in range(L):        # static unrolled loop over layers
        # ------------------------------ attention ------------------------------
        nx = rms(h)                                     # (BS, D)
        qkv = mm(nx, wqkv_ref[l])                       # (BS, 192), one fused matmul

        # stack every (q/k/v, head) block along the sublane axis -> (3*H*BS, DH)
        stacked = jnp.concatenate(
            [qkv[:, j * DH:(j + 1) * DH] for j in range(3 * H)], axis=0)   # (192, 16)
        qk = stacked[0:2 * HBS, :]                      # (128, 16) = [q stacked ; k stacked]
        v_st = stacked[2 * HBS:3 * HBS, :]              # (64, 16)

        # RoPE on q and k at once; per-head lane layout is [real | imag]; scale folded in
        r, i = qk[:, :DH2], qk[:, DH2:]
        rot = jnp.concatenate([r * cos - i * sin, r * sin + i * cos], axis=1)  # (128, 16)
        q_st = rot[0:HBS, :]                            # (64, 16)
        k_st = rot[HBS:2 * HBS, :]                      # (64, 16)

        # ONE block-diagonal score dot for all batches & heads
        sc = lax.dot_general(q_st.astype(bf16), k_st.astype(bf16),
                             (((1,), (1,)), ((), ())),
                             preferred_element_type=f32) + mask               # (64, 64)
        m = jnp.max(sc, axis=-1, keepdims=True)         # diagonal always unmasked
        p = jnp.exp(sc - m)
        p = p * pl.reciprocal(jnp.sum(p, axis=-1, keepdims=True), approx=True)

        attn_st = mm(p, v_st)                           # (64, 16), ONE P@V dot
        # un-stack heads back onto the lane axis -> (BS, H*DH)
        attn = jnp.concatenate(
            [attn_st[hh * BS:(hh + 1) * BS, :] for hh in range(H)], axis=1)   # (16, 64)

        h = h + mm(attn, wo_ref[l])                     # (BS, D)

        # ------------------------------ feed forward ----------------------------
        hn = rms(h)
        gu = mm(hn, w13_ref[l])                         # (BS, 512), fused w1|w3
        g = gu[:, :HIDP]                                # lane-aligned slices
        u = gu[:, HIDP:]
        silu = g * pl.reciprocal(1.0 + jnp.exp(-g), approx=True)
        h = h + mm(silu * u, w2_ref[l])                 # padded cols are exactly zero

    # final norm (gain folded into wup) + upscaler (D -> E): lane-dense 128-wide store
    out_ref[...] = mm(rms(h), wup_ref[...]).astype(out_ref.dtype)


# ------------------------------ weight packing ---------------------------------
def pack_params(raw, emb_table):
    """PyTorch-layout weights -> kernel-ready packed arrays (norms/downscaler folded)."""
    f32 = jnp.float32
    bf16 = jnp.bfloat16

    # fold downscaler into the embedding table: one-time (VOCAB,E)x(E,D) host matmul
    emb_d = emb_table.astype(f32) @ jnp.transpose(raw["downscaler"]).astype(f32)  # (VOCAB, D)

    wqkv, wo, w13, w2 = [], [], [], []
    for lp in raw["layers"]:
        wq_t = jnp.transpose(lp["wq"]).reshape(D, H, DH)
        wk_t = jnp.transpose(lp["wk"]).reshape(D, H, DH)
        wv_t = jnp.transpose(lp["wv"]).reshape(D, H, DH)
        # per-head columns: q/k as [real(even) | imag(odd)], v in natural order
        q_cols = [jnp.concatenate([wq_t[:, hh, 0::2], wq_t[:, hh, 1::2]], axis=1)
                  for hh in range(H)]
        k_cols = [jnp.concatenate([wk_t[:, hh, 0::2], wk_t[:, hh, 1::2]], axis=1)
                  for hh in range(H)]
        v_cols = [wv_t[:, hh, :] for hh in range(H)]
        wqkv_l = jnp.concatenate(q_cols + k_cols + v_cols, axis=1)          # (D, 192)
        wqkv_l = lp["attention_norm"][:, None] * wqkv_l                     # fold attn norm
        wqkv.append(wqkv_l)

        wo.append(jnp.transpose(lp["wo"]))                                  # (H*DH, D)

        zpad = jnp.zeros((D, HIDP - HID), f32)
        w13_l = jnp.concatenate([jnp.transpose(lp["w1"]), zpad,
                                 jnp.transpose(lp["w3"]), zpad], axis=1)    # (D, 512)
        w13_l = lp["ffn_norm"][:, None] * w13_l                             # fold ffn norm
        w13.append(w13_l)

        w2.append(jnp.concatenate([jnp.transpose(lp["w2"]),
                                   jnp.zeros((HIDP - HID, D), f32)], axis=0))  # (256, 64)

    wup = raw["norm"][:, None] * jnp.transpose(raw["upscaler"])             # (D, E), fold final norm

    return dict(
        emb_d=emb_d,                                   # (VOCAB, D) f32
        wqkv=jnp.stack(wqkv).astype(bf16),             # (L, D, QKV_COLS)
        wo=jnp.stack(wo).astype(bf16),                 # (L, H*DH, D)
        w13=jnp.stack(w13).astype(bf16),               # (L, D, 2*HIDP)
        w2=jnp.stack(w2).astype(bf16),                 # (L, HIDP, D)
        wup=wup.astype(bf16),                          # (D, E)
    )


def _full_spec(shape):
    zeros = (0,) * len(shape)
    return pl.BlockSpec(shape, lambda i, z=zeros: z)


# --------------------------------- wrapper --------------------------------------
def encoder_forward(tokens, packed, freqs_cos, freqs_sin):
    # embedding lookup with downscaler pre-folded -> (B*S, D) kernel input
    x2d = packed["emb_d"][tokens].reshape(BS, D).astype(jnp.float32)

    # RoPE tables tiled over the stacked (q/k, head, batch) blocks; fold 1/sqrt(head_dim)
    scale = DH ** -0.25
    cos_t = jnp.tile(freqs_cos * scale, (2 * H * B, 1))     # (2*HBS, DH2) = (128, 8)
    sin_t = jnp.tile(freqs_sin * scale, (2 * H * B, 1))

    # block-diagonal causal mask over the stacked (head, batch, seq) rows
    causal = jnp.triu(jnp.full((S, S), float("-inf"), jnp.float32), k=1)
    same_block = jnp.kron(jnp.eye(H * B, dtype=jnp.float32),
                          jnp.ones((S, S), jnp.float32))
    big_mask = jnp.where(same_block > 0,
                         jnp.tile(causal, (H * B, H * B)),
                         float("-inf"))                     # (HBS, HBS)

    out2d = pl.pallas_call(
        encoder_kernel,
        out_shape=jax.ShapeDtypeStruct((BS, E), jnp.float32),
        grid=(1,),
        in_specs=[
            _full_spec((BS, D)),
            _full_spec((2 * HBS, DH2)),
            _full_spec((2 * HBS, DH2)),
            _full_spec((HBS, HBS)),
            _full_spec((L, D, QKV_COLS)),
            _full_spec((L, H * DH, D)),
            _full_spec((L, D, 2 * HIDP)),
            _full_spec((L, HIDP, D)),
            _full_spec((D, E)),
        ],
        out_specs=_full_spec((BS, E)),
        compiler_params=pltpu.CompilerParams(dimension_semantics=("arbitrary",)),
    )(x2d, cos_t, sin_t, big_mask,
      packed["wqkv"], packed["wo"], packed["w13"], packed["w2"], packed["wup"])

    return out2d.reshape(B, S, E)


# ---------------------------- pure-JAX reference --------------------------------
def _rmsnorm_ref(x, w, eps=NORM_EPS):
    return x * lax.rsqrt(jnp.mean(x * x, axis=-1, keepdims=True) + eps) * w


def _rotary_ref(x, cos, sin):
    b, s, h, dh = x.shape
    xr = x.reshape(b, s, h, dh // 2, 2)
    re, im = xr[..., 0], xr[..., 1]
    c, sn = cos[None, :, None, :], sin[None, :, None, :]
    return jnp.stack([re * c - im * sn, re * sn + im * c], axis=-1).reshape(b, s, h, dh)


def encoder_reference(tokens, emb_table, raw, cos, sin):
    h = emb_table[tokens]                                       # (B, S, E)
    h = h @ raw["downscaler"].T                                 # (B, S, D)
    mask = jnp.triu(jnp.full((S, S), float("-inf"), jnp.float32), k=1)
    for lp in raw["layers"]:
        nx = _rmsnorm_ref(h, lp["attention_norm"])
        xq = (nx @ lp["wq"].T).reshape(B, S, H, DH)
        xk = (nx @ lp["wk"].T).reshape(B, S, H, DH)
        xv = (nx @ lp["wv"].T).reshape(B, S, H, DH)
        xq, xk = _rotary_ref(xq, cos, sin), _rotary_ref(xk, cos, sin)
        q, k, v = (t.transpose(0, 2, 1, 3) for t in (xq, xk, xv))
        sc = jnp.einsum("bhqd,bhkd->bhqk", q, k) / math.sqrt(DH) + mask
        p = jax.nn.softmax(sc, axis=-1)
        o = jnp.einsum("bhqk,bhkd->bhqd", p, v).transpose(0, 2, 1, 3).reshape(B, S, D)
        h = h + o @ lp["wo"].T
        hn = _rmsnorm_ref(h, lp["ffn_norm"])
        h = h + (jax.nn.silu(hn @ lp["w1"].T) * (hn @ lp["w3"].T)) @ lp["w2"].T
    h = _rmsnorm_ref(h, raw["norm"])
    return h @ raw["upscaler"].T


# ----------------------------------- main ----------------------------------------
if __name__ == "__main__":
    key = jax.random.PRNGKey(0)
    keys = iter(jax.random.split(key, 64))

    def rnd(shape, scale):
        return scale * jax.random.normal(next(keys), shape, jnp.float32)

    emb_table = jax.random.normal(next(keys), (VOCAB, E), jnp.float32)
    tokens = jax.random.randint(next(keys), (B, S), 0, VOCAB)

    raw = dict(
        downscaler=rnd((D, E), 0.08),   # nn.Linear(E, D).weight
        upscaler=rnd((E, D), 0.10),     # nn.Linear(D, E).weight
        norm=jnp.ones((D,), jnp.float32) + rnd((D,), 0.05),
        layers=[],
    )
    for _ in range(L):
        raw["layers"].append(dict(
            attention_norm=jnp.ones((D,), jnp.float32) + rnd((D,), 0.05),
            ffn_norm=jnp.ones((D,), jnp.float32) + rnd((D,), 0.05),
            wq=rnd((H * DH, D), 0.05),
            wk=rnd((H * DH, D), 0.05),
            wv=rnd((H * DH, D), 0.05),
            wo=rnd((D, H * DH), 0.05),
            w1=rnd((HID, D), 0.05),
            w2=rnd((D, HID), 0.05),
            w3=rnd((HID, D), 0.05),
        ))

    # rotary tables (LLaMA precompute_freqs_cis, start_pos = 0)
    freqs = 1.0 / (10000.0 ** (jnp.arange(0, DH, 2, dtype=jnp.float32) / DH))
    ang = jnp.outer(jnp.arange(S, dtype=jnp.float32), freqs)    # (S, DH2)
    cos, sin = jnp.cos(ang), jnp.sin(ang)

    packed = pack_params(raw, emb_table)
    out = encoder_forward(tokens, packed, cos, sin)
    jax.block_until_ready(out)

    ref = encoder_reference(tokens, emb_table, raw, cos, sin)
    err = float(jnp.max(jnp.abs(out - ref)))
    tol = 5e-2   # bf16 MXU operands + approx reciprocals
    assert err < tol, f"max abs err {err} vs tol {tol}"
    print("KERNEL_OK")
</pallas_src>

<mosaic_0001>
module attributes {stable_mosaic.version = 11 : i64} {
  func.func @encoder_kernel(%arg0: i32, %arg1: memref<16x64xf32, #tpu.memory_space<vmem>>, %arg2: memref<128x8xf32, #tpu.memory_space<vmem>>, %arg3: memref<128x8xf32, #tpu.memory_space<vmem>>, %arg4: memref<64x64xf32, #tpu.memory_space<vmem>>, %arg5: memref<2x64x192xbf16, #tpu.memory_space<vmem>>, %arg6: memref<2x64x64xbf16, #tpu.memory_space<vmem>>, %arg7: memref<2x64x512xbf16, #tpu.memory_space<vmem>>, %arg8: memref<2x256x64xbf16, #tpu.memory_space<vmem>>, %arg9: memref<64x128xbf16, #tpu.memory_space<vmem>>, %arg10: memref<16x128xf32, #tpu.memory_space<vmem>>) attributes {dimension_semantics = [#tpu.dimension_semantics<arbitrary>], iteration_bounds = array<i64: 1>, scalar_prefetch = 0 : i64, scratch_operands = 0 : i64, tpu.core_type = #tpu.core_type<tc>, window_params = [{pipeline_mode = #tpu.pipeline_mode<synchronous>, transform_indices = @transform_0, window_bounds = array<i64: 16, 64>}, {pipeline_mode = #tpu.pipeline_mode<synchronous>, transform_indices = @transform_1, window_bounds = array<i64: 128, 8>}, {pipeline_mode = #tpu.pipeline_mode<synchronous>, transform_indices = @transform_2, window_bounds = array<i64: 128, 8>}, {pipeline_mode = #tpu.pipeline_mode<synchronous>, transform_indices = @transform_3, window_bounds = array<i64: 64, 64>}, {pipeline_mode = #tpu.pipeline_mode<synchronous>, transform_indices = @transform_4, window_bounds = array<i64: 2, 64, 192>}, {pipeline_mode = #tpu.pipeline_mode<synchronous>, transform_indices = @transform_5, window_bounds = array<i64: 2, 64, 64>}, {pipeline_mode = #tpu.pipeline_mode<synchronous>, transform_indices = @transform_6, window_bounds = array<i64: 2, 64, 512>}, {pipeline_mode = #tpu.pipeline_mode<synchronous>, transform_indices = @transform_7, window_bounds = array<i64: 2, 256, 64>}, {pipeline_mode = #tpu.pipeline_mode<synchronous>, transform_indices = @transform_8, window_bounds = array<i64: 64, 128>}, {pipeline_mode = #tpu.pipeline_mode<synchronous>, transform_indices = @transform_9, window_bounds = array<i64: 16, 128>}]} {
    %c0 = arith.constant 0 : index
    %c0_0 = arith.constant 0 : index
    %0 = vector.load %arg1[%c0, %c0_0] : memref<16x64xf32, #tpu.memory_space<vmem>>, vector<16x64xf32>
    %c0_1 = arith.constant 0 : index
    %c0_2 = arith.constant 0 : index
    %1 = vector.load %arg2[%c0_1, %c0_2] : memref<128x8xf32, #tpu.memory_space<vmem>>, vector<128x8xf32>
    %c0_3 = arith.constant 0 : index
    %c0_4 = arith.constant 0 : index
    %2 = vector.load %arg3[%c0_3, %c0_4] : memref<128x8xf32, #tpu.memory_space<vmem>>, vector<128x8xf32>
    %c0_5 = arith.constant 0 : index
    %c0_6 = arith.constant 0 : index
    %3 = vector.load %arg4[%c0_5, %c0_6] : memref<64x64xf32, #tpu.memory_space<vmem>>, vector<64x64xf32>
    %4 = arith.mulf %0, %0 : vector<16x64xf32>
    %cst = arith.constant dense<0.000000e+00> : vector<16xf32>
    %5 = vector.multi_reduction <add>, %4, %cst [1] : vector<16x64xf32> to vector<16xf32>
    %6 = vector.shape_cast %5 : vector<16xf32> to vector<16x1xf32>
    %cst_7 = arith.constant 6.400000e+01 : f32
    %7 = vector.broadcast %cst_7 : f32 to vector<16x1xf32>
    %8 = arith.divf %6, %7 : vector<16x1xf32>
    %cst_8 = arith.constant 9.99999974E-6 : f32
    %9 = vector.broadcast %cst_8 : f32 to vector<16x1xf32>
    %10 = arith.addf %8, %9 : vector<16x1xf32>
    %11 = math.rsqrt %10 : vector<16x1xf32>
    %12 = vector.broadcast %11 : vector<16x1xf32> to vector<16x64xf32>
    %13 = arith.mulf %0, %12 : vector<16x64xf32>
    %c0_9 = arith.constant 0 : index
    %c0_10 = arith.constant 0 : index
    %c0_11 = arith.constant 0 : index
    %14 = vector.load %arg5[%c0_9, %c0_10, %c0_11] : memref<2x64x192xbf16, #tpu.memory_space<vmem>>, vector<1x64x192xbf16>
    %15 = vector.shape_cast %14 : vector<1x64x192xbf16> to vector<64x192xbf16>
    %16 = arith.truncf %13 : vector<16x64xf32> to vector<16x64xbf16>
    %cst_12 = arith.constant dense<0.000000e+00> : vector<16x192xf32>
    %17 = tpu.matmul %16, %15, %cst_12 {dimension_numbers = #tpu.dot_dimension_numbers<[1], [0], [0], [1], [0, 0, 1, 1], [], []>} : vector<16x64xbf16>, vector<64x192xbf16>, vector<16x192xf32> -> vector<16x192xf32>
    %18 = vector.extract_strided_slice %17 {offsets = [0, 0], sizes = [16, 16], strides = [1, 1]} : vector<16x192xf32> to vector<16x16xf32>
    %19 = vector.extract_strided_slice %17 {offsets = [0, 16], sizes = [16, 16], strides = [1, 1]} : vector<16x192xf32> to vector<16x16xf32>
    %20 = vector.extract_strided_slice %17 {offsets = [0, 32], sizes = [16, 16], strides = [1, 1]} : vector<16x192xf32> to vector<16x16xf32>
    %21 = vector.extract_strided_slice %17 {offsets = [0, 48], sizes = [16, 16], strides = [1, 1]} : vector<16x192xf32> to vector<16x16xf32>
    %22 = vector.extract_strided_slice %17 {offsets = [0, 64], sizes = [16, 16], strides = [1, 1]} : vector<16x192xf32> to vector<16x16xf32>
    %23 = vector.extract_strided_slice %17 {offsets = [0, 80], sizes = [16, 16], strides = [1, 1]} : vector<16x192xf32> to vector<16x16xf32>
    %24 = vector.extract_strided_slice %17 {offsets = [0, 96], sizes = [16, 16], strides = [1, 1]} : vector<16x192xf32> to vector<16x16xf32>
    %25 = vector.extract_strided_slice %17 {offsets = [0, 112], sizes = [16, 16], strides = [1, 1]} : vector<16x192xf32> to vector<16x16xf32>
    %26 = vector.extract_strided_slice %17 {offsets = [0, 128], sizes = [16, 16], strides = [1, 1]} : vector<16x192xf32> to vector<16x16xf32>
    %27 = vector.extract_strided_slice %17 {offsets = [0, 144], sizes = [16, 16], strides = [1, 1]} : vector<16x192xf32> to vector<16x16xf32>
    %28 = vector.extract_strided_slice %17 {offsets = [0, 160], sizes = [16, 16], strides = [1, 1]} : vector<16x192xf32> to vector<16x16xf32>
    %29 = vector.extract_strided_slice %17 {offsets = [0, 176], sizes = [16, 16], strides = [1, 1]} : vector<16x192xf32> to vector<16x16xf32>
    %30 = tpu.concatenate %18, %19, %20, %21, %22, %23, %24, %25, %26, %27, %28, %29 in 0 : vector<16x16xf32>, vector<16x16xf32>, vector<16x16xf32>, vector<16x16xf32>, vector<16x16xf32>, vector<16x16xf32>, vector<16x16xf32>, vector<16x16xf32>, vector<16x16xf32>, vector<16x16xf32>, vector<16x16xf32>, vector<16x16xf32> -> vector<192x16xf32>
    %31 = vector.extract_strided_slice %30 {offsets = [0, 0], sizes = [128, 16], strides = [1, 1]} : vector<192x16xf32> to vector<128x16xf32>
    %32 = vector.extract_strided_slice %30 {offsets = [128, 0], sizes = [64, 16], strides = [1, 1]} : vector<192x16xf32> to vector<64x16xf32>
    %33 = vector.extract_strided_slice %31 {offsets = [0, 0], sizes = [128, 8], strides = [1, 1]} : vector<128x16xf32> to vector<128x8xf32>
    %34 = vector.extract_strided_slice %31 {offsets = [0, 8], sizes = [128, 8], strides = [1, 1]} : vector<128x16xf32> to vector<128x8xf32>
    %35 = arith.mulf %33, %1 : vector<128x8xf32>
    %36 = arith.mulf %34, %2 : vector<128x8xf32>
    %37 = arith.subf %35, %36 : vector<128x8xf32>
    %38 = arith.mulf %33, %2 : vector<128x8xf32>
    %39 = arith.mulf %34, %1 : vector<128x8xf32>
    %40 = arith.addf %38, %39 : vector<128x8xf32>
    %41 = tpu.concatenate %37, %40 in 1 : vector<128x8xf32>, vector<128x8xf32> -> vector<128x16xf32>
    %42 = vector.extract_strided_slice %41 {offsets = [0, 0], sizes = [64, 16], strides = [1, 1]} : vector<128x16xf32> to vector<64x16xf32>
    %43 = vector.extract_strided_slice %41 {offsets = [64, 0], sizes = [64, 16], strides = [1, 1]} : vector<128x16xf32> to vector<64x16xf32>
    %44 = arith.truncf %42 : vector<64x16xf32> to vector<64x16xbf16>
    %45 = arith.truncf %43 : vector<64x16xf32> to vector<64x16xbf16>
    %cst_13 = arith.constant dense<0.000000e+00> : vector<64x64xf32>
    %46 = tpu.matmul %44, %45, %cst_13 {dimension_numbers = #tpu.dot_dimension_numbers<[1], [1], [0], [0], [0, 0, 1, 0], [], []>} : vector<64x16xbf16>, vector<64x16xbf16>, vector<64x64xf32> -> vector<64x64xf32>
    %47 = arith.addf %46, %3 : vector<64x64xf32>
    %cst_14 = arith.constant dense<0xFF800000> : vector<64xf32>
    %48 = vector.multi_reduction <maximumf>, %47, %cst_14 [1] : vector<64x64xf32> to vector<64xf32>
    %49 = vector.shape_cast %48 : vector<64xf32> to vector<64x1xf32>
    %50 = vector.broadcast %49 : vector<64x1xf32> to vector<64x64xf32>
    %51 = arith.subf %47, %50 : vector<64x64xf32>
    %52 = math.exp %51 : vector<64x64xf32>
    %cst_15 = arith.constant dense<0.000000e+00> : vector<64xf32>
    %53 = vector.multi_reduction <add>, %52, %cst_15 [1] : vector<64x64xf32> to vector<64xf32>
    %54 = vector.shape_cast %53 : vector<64xf32> to vector<64x1xf32>
    %55 = tpu.reciprocal %54 {approx = true} : vector<64x1xf32> -> vector<64x1xf32>
    %56 = vector.broadcast %55 : vector<64x1xf32> to vector<64x64xf32>
    %57 = arith.mulf %52, %56 : vector<64x64xf32>
    %58 = arith.truncf %57 : vector<64x64xf32> to vector<64x64xbf16>
    %59 = arith.truncf %32 : vector<64x16xf32> to vector<64x16xbf16>
    %cst_16 = arith.constant dense<0.000000e+00> : vector<64x16xf32>
    %60 = tpu.matmul %58, %59, %cst_16 {dimension_numbers = #tpu.dot_dimension_numbers<[1], [0], [0], [1], [0, 0, 1, 1], [], []>} : vector<64x64xbf16>, vector<64x16xbf16>, vector<64x16xf32> -> vector<64x16xf32>
    %61 = vector.extract_strided_slice %60 {offsets = [0, 0], sizes = [16, 16], strides = [1, 1]} : vector<64x16xf32> to vector<16x16xf32>
    %62 = vector.extract_strided_slice %60 {offsets = [16, 0], sizes = [16, 16], strides = [1, 1]} : vector<64x16xf32> to vector<16x16xf32>
    %63 = vector.extract_strided_slice %60 {offsets = [32, 0], sizes = [16, 16], strides = [1, 1]} : vector<64x16xf32> to vector<16x16xf32>
    %64 = vector.extract_strided_slice %60 {offsets = [48, 0], sizes = [16, 16], strides = [1, 1]} : vector<64x16xf32> to vector<16x16xf32>
    %65 = tpu.concatenate %61, %62, %63, %64 in 1 : vector<16x16xf32>, vector<16x16xf32>, vector<16x16xf32>, vector<16x16xf32> -> vector<16x64xf32>
    %c0_17 = arith.constant 0 : index
    %c0_18 = arith.constant 0 : index
    %c0_19 = arith.constant 0 : index
    %66 = vector.load %arg6[%c0_17, %c0_18, %c0_19] : memref<2x64x64xbf16, #tpu.memory_space<vmem>>, vector<1x64x64xbf16>
    %67 = vector.shape_cast %66 : vector<1x64x64xbf16> to vector<64x64xbf16>
    %68 = arith.truncf %65 : vector<16x64xf32> to vector<16x64xbf16>
    %cst_20 = arith.constant dense<0.000000e+00> : vector<16x64xf32>
    %69 = tpu.matmul %68, %67, %cst_20 {dimension_numbers = #tpu.dot_dimension_numbers<[1], [0], [0], [1], [0, 0, 1, 1], [], []>} : vector<16x64xbf16>, vector<64x64xbf16>, vector<16x64xf32> -> vector<16x64xf32>
    %70 = arith.addf %0, %69 : vector<16x64xf32>
    %71 = arith.mulf %70, %70 : vector<16x64xf32>
    %cst_21 = arith.constant dense<0.000000e+00> : vector<16xf32>
    %72 = vector.multi_reduction <add>, %71, %cst_21 [1] : vector<16x64xf32> to vector<16xf32>
    %73 = vector.shape_cast %72 : vector<16xf32> to vector<16x1xf32>
    %cst_22 = arith.constant 6.400000e+01 : f32
    %74 = vector.broadcast %cst_22 : f32 to vector<16x1xf32>
    %75 = arith.divf %73, %74 : vector<16x1xf32>
    %cst_23 = arith.constant 9.99999974E-6 : f32
    %76 = vector.broadcast %cst_23 : f32 to vector<16x1xf32>
    %77 = arith.addf %75, %76 : vector<16x1xf32>
    %78 = math.rsqrt %77 : vector<16x1xf32>
    %79 = vector.broadcast %78 : vector<16x1xf32> to vector<16x64xf32>
    %80 = arith.mulf %70, %79 : vector<16x64xf32>
    %c0_24 = arith.constant 0 : index
    %c0_25 = arith.constant 0 : index
    %c0_26 = arith.constant 0 : index
    %81 = vector.load %arg7[%c0_24, %c0_25, %c0_26] : memref<2x64x512xbf16, #tpu.memory_space<vmem>>, vector<1x64x512xbf16>
    %82 = vector.shape_cast %81 : vector<1x64x512xbf16> to vector<64x512xbf16>
    %83 = arith.truncf %80 : vector<16x64xf32> to vector<16x64xbf16>
    %cst_27 = arith.constant dense<0.000000e+00> : vector<16x512xf32>
    %84 = tpu.matmul %83, %82, %cst_27 {dimension_numbers = #tpu.dot_dimension_numbers<[1], [0], [0], [1], [0, 0, 1, 1], [], []>} : vector<16x64xbf16>, vector<64x512xbf16>, vector<16x512xf32> -> vector<16x512xf32>
    %85 = vector.extract_strided_slice %84 {offsets = [0, 0], sizes = [16, 256], strides = [1, 1]} : vector<16x512xf32> to vector<16x256xf32>
    %86 = vector.extract_strided_slice %84 {offsets = [0, 256], sizes = [16, 256], strides = [1, 1]} : vector<16x512xf32> to vector<16x256xf32>
    %cst_28 = arith.constant 0.000000e+00 : f32
    %87 = vector.broadcast %cst_28 : f32 to vector<16x256xf32>
    %88 = arith.subf %87, %85 : vector<16x256xf32>
    %89 = math.exp %88 : vector<16x256xf32>
    %cst_29 = arith.constant 1.000000e+00 : f32
    %90 = vector.broadcast %cst_29 : f32 to vector<16x256xf32>
    %91 = arith.addf %90, %89 : vector<16x256xf32>
    %92 = tpu.reciprocal %91 {approx = true} : vector<16x256xf32> -> vector<16x256xf32>
    %93 = arith.mulf %85, %92 : vector<16x256xf32>
    %94 = arith.mulf %93, %86 : vector<16x256xf32>
    %c0_30 = arith.constant 0 : index
    %c0_31 = arith.constant 0 : index
    %c0_32 = arith.constant 0 : index
    %95 = vector.load %arg8[%c0_30, %c0_31, %c0_32] : memref<2x256x64xbf16, #tpu.memory_space<vmem>>, vector<1x256x64xbf16>
    %96 = vector.shape_cast %95 : vector<1x256x64xbf16> to vector<256x64xbf16>
    %97 = arith.truncf %94 : vector<16x256xf32> to vector<16x256xbf16>
    %cst_33 = arith.constant dense<0.000000e+00> : vector<16x64xf32>
    %98 = tpu.matmul %97, %96, %cst_33 {dimension_numbers = #tpu.dot_dimension_numbers<[1], [0], [0], [1], [0, 0, 1, 1], [], []>} : vector<16x256xbf16>, vector<256x64xbf16>, vector<16x64xf32> -> vector<16x64xf32>
    %99 = arith.addf %70, %98 : vector<16x64xf32>
    %100 = arith.mulf %99, %99 : vector<16x64xf32>
    %cst_34 = arith.constant dense<0.000000e+00> : vector<16xf32>
    %101 = vector.multi_reduction <add>, %100, %cst_34 [1] : vector<16x64xf32> to vector<16xf32>
    %102 = vector.shape_cast %101 : vector<16xf32> to vector<16x1xf32>
    %cst_35 = arith.constant 6.400000e+01 : f32
    %103 = vector.broadcast %cst_35 : f32 to vector<16x1xf32>
    %104 = arith.divf %102, %103 : vector<16x1xf32>
    %cst_36 = arith.constant 9.99999974E-6 : f32
    %105 = vector.broadcast %cst_36 : f32 to vector<16x1xf32>
    %106 = arith.addf %104, %105 : vector<16x1xf32>
    %107 = math.rsqrt %106 : vector<16x1xf32>
    %108 = vector.broadcast %107 : vector<16x1xf32> to vector<16x64xf32>
    %109 = arith.mulf %99, %108 : vector<16x64xf32>
    %c1 = arith.constant 1 : index
    %c0_37 = arith.constant 0 : index
    %c0_38 = arith.constant 0 : index
    %110 = vector.load %arg5[%c1, %c0_37, %c0_38] : memref<2x64x192xbf16, #tpu.memory_space<vmem>>, vector<1x64x192xbf16>
    %111 = vector.shape_cast %110 : vector<1x64x192xbf16> to vector<64x192xbf16>
    %112 = arith.truncf %109 : vector<16x64xf32> to vector<16x64xbf16>
    %cst_39 = arith.constant dense<0.000000e+00> : vector<16x192xf32>
    %113 = tpu.matmul %112, %111, %cst_39 {dimension_numbers = #tpu.dot_dimension_numbers<[1], [0], [0], [1], [0, 0, 1, 1], [], []>} : vector<16x64xbf16>, vector<64x192xbf16>, vector<16x192xf32> -> vector<16x192xf32>
    %114 = vector.extract_strided_slice %113 {offsets = [0, 0], sizes = [16, 16], strides = [1, 1]} : vector<16x192xf32> to vector<16x16xf32>
    %115 = vector.extract_strided_slice %113 {offsets = [0, 16], sizes = [16, 16], strides = [1, 1]} : vector<16x192xf32> to vector<16x16xf32>
    %116 = vector.extract_strided_slice %113 {offsets = [0, 32], sizes = [16, 16], strides = [1, 1]} : vector<16x192xf32> to vector<16x16xf32>
    %117 = vector.extract_strided_slice %113 {offsets = [0, 48], sizes = [16, 16], strides = [1, 1]} : vector<16x192xf32> to vector<16x16xf32>
    %118 = vector.extract_strided_slice %113 {offsets = [0, 64], sizes = [16, 16], strides = [1, 1]} : vector<16x192xf32> to vector<16x16xf32>
    %119 = vector.extract_strided_slice %113 {offsets = [0, 80], sizes = [16, 16], strides = [1, 1]} : vector<16x192xf32> to vector<16x16xf32>
    %120 = vector.extract_strided_slice %113 {offsets = [0, 96], sizes = [16, 16], strides = [1, 1]} : vector<16x192xf32> to vector<16x16xf32>
    %121 = vector.extract_strided_slice %113 {offsets = [0, 112], sizes = [16, 16], strides = [1, 1]} : vector<16x192xf32> to vector<16x16xf32>
    %122 = vector.extract_strided_slice %113 {offsets = [0, 128], sizes = [16, 16], strides = [1, 1]} : vector<16x192xf32> to vector<16x16xf32>
    %123 = vector.extract_strided_slice %113 {offsets = [0, 144], sizes = [16, 16], strides = [1, 1]} : vector<16x192xf32> to vector<16x16xf32>
    %124 = vector.extract_strided_slice %113 {offsets = [0, 160], sizes = [16, 16], strides = [1, 1]} : vector<16x192xf32> to vector<16x16xf32>
    %125 = vector.extract_strided_slice %113 {offsets = [0, 176], sizes = [16, 16], strides = [1, 1]} : vector<16x192xf32> to vector<16x16xf32>
    %126 = tpu.concatenate %114, %115, %116, %117, %118, %119, %120, %121, %122, %123, %124, %125 in 0 : vector<16x16xf32>, vector<16x16xf32>, vector<16x16xf32>, vector<16x16xf32>, vector<16x16xf32>, vector<16x16xf32>, vector<16x16xf32>, vector<16x16xf32>, vector<16x16xf32>, vector<16x16xf32>, vector<16x16xf32>, vector<16x16xf32> -> vector<192x16xf32>
    %127 = vector.extract_strided_slice %126 {offsets = [0, 0], sizes = [128, 16], strides = [1, 1]} : vector<192x16xf32> to vector<128x16xf32>
    %128 = vector.extract_strided_slice %126 {offsets = [128, 0], sizes = [64, 16], strides = [1, 1]} : vector<192x16xf32> to vector<64x16xf32>
    %129 = vector.extract_strided_slice %127 {offsets = [0, 0], sizes = [128, 8], strides = [1, 1]} : vector<128x16xf32> to vector<128x8xf32>
    %130 = vector.extract_strided_slice %127 {offsets = [0, 8], sizes = [128, 8], strides = [1, 1]} : vector<128x16xf32> to vector<128x8xf32>
    %131 = arith.mulf %129, %1 : vector<128x8xf32>
    %132 = arith.mulf %130, %2 : vector<128x8xf32>
    %133 = arith.subf %131, %132 : vector<128x8xf32>
    %134 = arith.mulf %129, %2 : vector<128x8xf32>
    %135 = arith.mulf %130, %1 : vector<128x8xf32>
    %136 = arith.addf %134, %135 : vector<128x8xf32>
    %137 = tpu.concatenate %133, %136 in 1 : vector<128x8xf32>, vector<128x8xf32> -> vector<128x16xf32>
    %138 = vector.extract_strided_slice %137 {offsets = [0, 0], sizes = [64, 16], strides = [1, 1]} : vector<128x16xf32> to vector<64x16xf32>
    %139 = vector.extract_strided_slice %137 {offsets = [64, 0], sizes = [64, 16], strides = [1, 1]} : vector<128x16xf32> to vector<64x16xf32>
    %140 = arith.truncf %138 : vector<64x16xf32> to vector<64x16xbf16>
    %141 = arith.truncf %139 : vector<64x16xf32> to vector<64x16xbf16>
    %cst_40 = arith.constant dense<0.000000e+00> : vector<64x64xf32>
    %142 = tpu.matmul %140, %141, %cst_40 {dimension_numbers = #tpu.dot_dimension_numbers<[1], [1], [0], [0], [0, 0, 1, 0], [], []>} : vector<64x16xbf16>, vector<64x16xbf16>, vector<64x64xf32> -> vector<64x64xf32>
    %143 = arith.addf %142, %3 : vector<64x64xf32>
    %cst_41 = arith.constant dense<0xFF800000> : vector<64xf32>
    %144 = vector.multi_reduction <maximumf>, %143, %cst_41 [1] : vector<64x64xf32> to vector<64xf32>
    %145 = vector.shape_cast %144 : vector<64xf32> to vector<64x1xf32>
    %146 = vector.broadcast %145 : vector<64x1xf32> to vector<64x64xf32>
    %147 = arith.subf %143, %146 : vector<64x64xf32>
    %148 = math.exp %147 : vector<64x64xf32>
    %cst_42 = arith.constant dense<0.000000e+00> : vector<64xf32>
    %149 = vector.multi_reduction <add>, %148, %cst_42 [1] : vector<64x64xf32> to vector<64xf32>
    %150 = vector.shape_cast %149 : vector<64xf32> to vector<64x1xf32>
    %151 = tpu.reciprocal %150 {approx = true} : vector<64x1xf32> -> vector<64x1xf32>
    %152 = vector.broadcast %151 : vector<64x1xf32> to vector<64x64xf32>
    %153 = arith.mulf %148, %152 : vector<64x64xf32>
    %154 = arith.truncf %153 : vector<64x64xf32> to vector<64x64xbf16>
    %155 = arith.truncf %128 : vector<64x16xf32> to vector<64x16xbf16>
    %cst_43 = arith.constant dense<0.000000e+00> : vector<64x16xf32>
    %156 = tpu.matmul %154, %155, %cst_43 {dimension_numbers = #tpu.dot_dimension_numbers<[1], [0], [0], [1], [0, 0, 1, 1], [], []>} : vector<64x64xbf16>, vector<64x16xbf16>, vector<64x16xf32> -> vector<64x16xf32>
    %157 = vector.extract_strided_slice %156 {offsets = [0, 0], sizes = [16, 16], strides = [1, 1]} : vector<64x16xf32> to vector<16x16xf32>
    %158 = vector.extract_strided_slice %156 {offsets = [16, 0], sizes = [16, 16], strides = [1, 1]} : vector<64x16xf32> to vector<16x16xf32>
    %159 = vector.extract_strided_slice %156 {offsets = [32, 0], sizes = [16, 16], strides = [1, 1]} : vector<64x16xf32> to vector<16x16xf32>
    %160 = vector.extract_strided_slice %156 {offsets = [48, 0], sizes = [16, 16], strides = [1, 1]} : vector<64x16xf32> to vector<16x16xf32>
    %161 = tpu.concatenate %157, %158, %159, %160 in 1 : vector<16x16xf32>, vector<16x16xf32>, vector<16x16xf32>, vector<16x16xf32> -> vector<16x64xf32>
    %c1_44 = arith.constant 1 : index
    %c0_45 = arith.constant 0 : index
    %c0_46 = arith.constant 0 : index
    %162 = vector.load %arg6[%c1_44, %c0_45, %c0_46] : memref<2x64x64xbf16, #tpu.memory_space<vmem>>, vector<1x64x64xbf16>
    %163 = vector.shape_cast %162 : vector<1x64x64xbf16> to vector<64x64xbf16>
    %164 = arith.truncf %161 : vector<16x64xf32> to vector<16x64xbf16>
    %cst_47 = arith.constant dense<0.000000e+00> : vector<16x64xf32>
    %165 = tpu.matmul %164, %163, %cst_47 {dimension_numbers = #tpu.dot_dimension_numbers<[1], [0], [0], [1], [0, 0, 1, 1], [], []>} : vector<16x64xbf16>, vector<64x64xbf16>, vector<16x64xf32> -> vector<16x64xf32>
    %166 = arith.addf %99, %165 : vector<16x64xf32>
    %167 = arith.mulf %166, %166 : vector<16x64xf32>
    %cst_48 = arith.constant dense<0.000000e+00> : vector<16xf32>
    %168 = vector.multi_reduction <add>, %167, %cst_48 [1] : vector<16x64xf32> to vector<16xf32>
    %169 = vector.shape_cast %168 : vector<16xf32> to vector<16x1xf32>
    %cst_49 = arith.constant 6.400000e+01 : f32
    %170 = vector.broadcast %cst_49 : f32 to vector<16x1xf32>
    %171 = arith.divf %169, %170 : vector<16x1xf32>
    %cst_50 = arith.constant 9.99999974E-6 : f32
    %172 = vector.broadcast %cst_50 : f32 to vector<16x1xf32>
    %173 = arith.addf %171, %172 : vector<16x1xf32>
    %174 = math.rsqrt %173 : vector<16x1xf32>
    %175 = vector.broadcast %174 : vector<16x1xf32> to vector<16x64xf32>
    %176 = arith.mulf %166, %175 : vector<16x64xf32>
    %c1_51 = arith.constant 1 : index
    %c0_52 = arith.constant 0 : index
    %c0_53 = arith.constant 0 : index
    %177 = vector.load %arg7[%c1_51, %c0_52, %c0_53] : memref<2x64x512xbf16, #tpu.memory_space<vmem>>, vector<1x64x512xbf16>
    %178 = vector.shape_cast %177 : vector<1x64x512xbf16> to vector<64x512xbf16>
    %179 = arith.truncf %176 : vector<16x64xf32> to vector<16x64xbf16>
    %cst_54 = arith.constant dense<0.000000e+00> : vector<16x512xf32>
    %180 = tpu.matmul %179, %178, %cst_54 {dimension_numbers = #tpu.dot_dimension_numbers<[1], [0], [0], [1], [0, 0, 1, 1], [], []>} : vector<16x64xbf16>, vector<64x512xbf16>, vector<16x512xf32> -> vector<16x512xf32>
    %181 = vector.extract_strided_slice %180 {offsets = [0, 0], sizes = [16, 256], strides = [1, 1]} : vector<16x512xf32> to vector<16x256xf32>
    %182 = vector.extract_strided_slice %180 {offsets = [0, 256], sizes = [16, 256], strides = [1, 1]} : vector<16x512xf32> to vector<16x256xf32>
    %cst_55 = arith.constant 0.000000e+00 : f32
    %183 = vector.broadcast %cst_55 : f32 to vector<16x256xf32>
    %184 = arith.subf %183, %181 : vector<16x256xf32>
    %185 = math.exp %184 : vector<16x256xf32>
    %cst_56 = arith.constant 1.000000e+00 : f32
    %186 = vector.broadcast %cst_56 : f32 to vector<16x256xf32>
    %187 = arith.addf %186, %185 : vector<16x256xf32>
    %188 = tpu.reciprocal %187 {approx = true} : vector<16x256xf32> -> vector<16x256xf32>
    %189 = arith.mulf %181, %188 : vector<16x256xf32>
    %190 = arith.mulf %189, %182 : vector<16x256xf32>
    %c1_57 = arith.constant 1 : index
    %c0_58 = arith.constant 0 : index
    %c0_59 = arith.constant 0 : index
    %191 = vector.load %arg8[%c1_57, %c0_58, %c0_59] : memref<2x256x64xbf16, #tpu.memory_space<vmem>>, vector<1x256x64xbf16>
    %192 = vector.shape_cast %191 : vector<1x256x64xbf16> to vector<256x64xbf16>
    %193 = arith.truncf %190 : vector<16x256xf32> to vector<16x256xbf16>
    %cst_60 = arith.constant dense<0.000000e+00> : vector<16x64xf32>
    %194 = tpu.matmul %193, %192, %cst_60 {dimension_numbers = #tpu.dot_dimension_numbers<[1], [0], [0], [1], [0, 0, 1, 1], [], []>} : vector<16x256xbf16>, vector<256x64xbf16>, vector<16x64xf32> -> vector<16x64xf32>
    %195 = arith.addf %166, %194 : vector<16x64xf32>
    %196 = arith.mulf %195, %195 : vector<16x64xf32>
    %cst_61 = arith.constant dense<0.000000e+00> : vector<16xf32>
    %197 = vector.multi_reduction <add>, %196, %cst_61 [1] : vector<16x64xf32> to vector<16xf32>
    %198 = vector.shape_cast %197 : vector<16xf32> to vector<16x1xf32>
    %cst_62 = arith.constant 6.400000e+01 : f32
    %199 = vector.broadcast %cst_62 : f32 to vector<16x1xf32>
    %200 = arith.divf %198, %199 : vector<16x1xf32>
    %cst_63 = arith.constant 9.99999974E-6 : f32
    %201 = vector.broadcast %cst_63 : f32 to vector<16x1xf32>
    %202 = arith.addf %200, %201 : vector<16x1xf32>
    %203 = math.rsqrt %202 : vector<16x1xf32>
    %204 = vector.broadcast %203 : vector<16x1xf32> to vector<16x64xf32>
    %205 = arith.mulf %195, %204 : vector<16x64xf32>
    %c0_64 = arith.constant 0 : index
    %c0_65 = arith.constant 0 : index
    %206 = vector.load %arg9[%c0_64, %c0_65] : memref<64x128xbf16, #tpu.memory_space<vmem>>, vector<64x128xbf16>
    %207 = arith.truncf %205 : vector<16x64xf32> to vector<16x64xbf16>
    %cst_66 = arith.constant dense<0.000000e+00> : vector<16x128xf32>
    %208 = tpu.matmul %207, %206, %cst_66 {dimension_numbers = #tpu.dot_dimension_numbers<[1], [0], [0], [1], [0, 0, 1, 1], [], []>} : vector<16x64xbf16>, vector<64x128xbf16>, vector<16x128xf32> -> vector<16x128xf32>
    %c0_67 = arith.constant 0 : index
    %c0_68 = arith.constant 0 : index
    %209 = vector.load %arg10[%c0_67, %c0_68] : memref<16x128xf32, #tpu.memory_space<vmem>>, vector<16x128xf32>
    tpu.vector_store %arg10[%c0_67, %c0_68], %208 {strides = array<i32>} : memref<16x128xf32, #tpu.memory_space<vmem>>, vector<16x128xf32>,
    return
  }
  func.func @transform_0(%arg0: i32) -> (i32, i32) {
    %c0_i32 = arith.constant 0 : i32
    %c0_i32_0 = arith.constant 0 : i32
    %c0_i32_1 = arith.constant 0 : i32
    return %c0_i32, %c0_i32_0 : i32, i32
  }
  func.func @transform_1(%arg0: i32) -> (i32, i32) {
    %c0_i32 = arith.constant 0 : i32
    %c0_i32_0 = arith.constant 0 : i32
    %c0_i32_1 = arith.constant 0 : i32
    return %c0_i32, %c0_i32_0 : i32, i32
  }
  func.func @transform_2(%arg0: i32) -> (i32, i32) {
    %c0_i32 = arith.constant 0 : i32
    %c0_i32_0 = arith.constant 0 : i32
    %c0_i32_1 = arith.constant 0 : i32
    return %c0_i32, %c0_i32_0 : i32, i32
  }
  func.func @transform_3(%arg0: i32) -> (i32, i32) {
    %c0_i32 = arith.constant 0 : i32
    %c0_i32_0 = arith.constant 0 : i32
    %c0_i32_1 = arith.constant 0 : i32
    return %c0_i32, %c0_i32_0 : i32, i32
  }
  func.func @transform_4(%arg0: i32) -> (i32, i32, i32) {
    %c0_i32 = arith.constant 0 : i32
    %c0_i32_0 = arith.constant 0 : i32
    %c0_i32_1 = arith.constant 0 : i32
    %c0_i32_2 = arith.constant 0 : i32
    return %c0_i32, %c0_i32_0, %c0_i32_1 : i32, i32, i32
  }
  func.func @transform_5(%arg0: i32) -> (i32, i32, i32) {
    %c0_i32 = arith.constant 0 : i32
    %c0_i32_0 = arith.constant 0 : i32
    %c0_i32_1 = arith.constant 0 : i32
    %c0_i32_2 = arith.constant 0 : i32
    return %c0_i32, %c0_i32_0, %c0_i32_1 : i32, i32, i32
  }
  func.func @transform_6(%arg0: i32) -> (i32, i32, i32) {
    %c0_i32 = arith.constant 0 : i32
    %c0_i32_0 = arith.constant 0 : i32
    %c0_i32_1 = arith.constant 0 : i32
    %c0_i32_2 = arith.constant 0 : i32
    return %c0_i32, %c0_i32_0, %c0_i32_1 : i32, i32, i32
  }
  func.func @transform_7(%arg0: i32) -> (i32, i32, i32) {
    %c0_i32 = arith.constant 0 : i32
    %c0_i32_0 = arith.constant 0 : i32
    %c0_i32_1 = arith.constant 0 : i32
    %c0_i32_2 = arith.constant 0 : i32
    return %c0_i32, %c0_i32_0, %c0_i32_1 : i32, i32, i32
  }
  func.func @transform_8(%arg0: i32) -> (i32, i32) {
    %c0_i32 = arith.constant 0 : i32
    %c0_i32_0 = arith.constant 0 : i32
    %c0_i32_1 = arith.constant 0 : i32
    return %c0_i32, %c0_i32_0 : i32, i32
  }
  func.func @transform_9(%arg0: i32) -> (i32, i32) {
    %c0_i32 = arith.constant 0 : i32
    %c0_i32_0 = arith.constant 0 : i32
    %c0_i32_1 = arith.constant 0 : i32
    return %c0_i32, %c0_i32_0 : i32, i32
  }
}

</mosaic_0001>

<bundles_post_ra>
// kernel: tpu_custom_call.1
= control target key start
LH: loop header
LB: loop body
LE: loop exit
PB: predicated region body
PF: predicated region fallthrough
CT: control target
= control target key end

     0   :  { %14 = vsyncpa [#allocation3], 0  ;;  %s5187_s0 = inlined_call_operand.hbm [shape: f32[16,64], index: 0, kind: input, shape index: {}]   ;;  %s5188_s1 = inlined_call_operand.vmem [shape: f32[128,8], index: 1, kind: input, shape index: {}]   ;;  %s5189_s2 = inlined_call_operand.vmem [shape: f32[128,8], index: 2, kind: input, shape index: {}]   ;;  %s5190_s3 = inlined_call_operand.vmem [shape: f32[64,64], index: 3, kind: input, shape index: {}]   ;;  %s5191_s4 = inlined_call_operand.vmem [shape: bf16[2,64,192], index: 4, kind: input, shape index: {}]   ;;  %s5192_s5 = inlined_call_operand.vmem [shape: bf16[2,64,64], index: 5, kind: input, shape index: {}]   ;;  %s5193_s6 = inlined_call_operand.vmem [shape: bf16[2,64,512], index: 6, kind: input, shape index: {}]   ;;  %s5194_s7 = inlined_call_operand.vmem [shape: bf16[2,256,64], index: 7, kind: input, shape index: {}]   ;;  %s5195_s8 = inlined_call_operand.vmem [shape: bf16[64,128], index: 8, kind: input, shape index: {}]   ;;  %s5196_s9 = inlined_call_operand.hbm [shape: f32[16,128], index: 9, kind: output, shape index: {}]  }
   0x1   :  { %15 = vsyncpa [#allocation4], 0  ;;  %s3719_s30 = smov [#allocation2]   ;;  %s3671_s13 = scalar_lea.hbm %s5187_s0, 256 }
   0x2   :  { %s21_s10 = sshll.u32 %s3719_s30, 4  ;;  %p3672_p0 = scmp.ne.s32.totalorder %s5187_s0, %s3671_s13  ;;  %s22_s10 = int_to_ptr.vmem [resolvable:$true] %s21_s10 }
   0x3   :  { %p3675_p1 = scmp.lt.u32.totalorder %s3671_s13, %s5187_s0 }
   0x5   :  { %p3677_p2 = pnand %p3675_p1, %p3672_p0 }
   0x7   :  { %3680 = shalt.err (!%p3677_p2)
}
   0x8   :  { %s3681_s18 = scalar_lea.vmem %s22_s10, 256  ;;  %p3686_p4 = scmp.lt.s32.totalorder %s22_s10, %s22_s10 }
   0x9   :  { %p3682_p3 = scmp.ne.s32.totalorder %s22_s10, %s3681_s18  ;;  %p3687_p5 = scmp.lt.s32.totalorder %s3681_s18, %s3681_s18 }
   0xb   :  { %p3688_p6 = por %p3687_p5, %p3686_p4 }
   0xd   :  { %p3689_p7 = pnand %p3688_p6, %p3682_p3 }
   0xf   :  { %3692 = shalt.err (!%p3689_p7)
}
  0x10   :  { %s3720_s19 = smov 128   ;;  %s3721_s20 = smov 8  }
  0x11   :  { %27 = dma.hbm_to_vmem [thread:$0]  %s5187_s0, 256, %s22_s10, [#allocation3], %s3720_s19, %s3720_s19, %s3721_s20  }
  0x12   :  { %3715 = dma.done.wait [#allocation3], 256  }
  0x13   :  { %3716 = vsyncadd [#allocation3], 4294967040  ;;  %v48_v0 = vld [vmem:[#allocation2] sm:$0xff]  ;;  %vm92_vm0 = vcmask 523264   ;;  %v49_v1 = vld [vmem:[#allocation2 + $0x8] sm:$0xff]  ;;  %v5197_v13 = vmov 0  }
  0x14   :  { %v90_v2 = vmul.f32 %v48_v0, %v48_v0  ;;  %v91_v3 = vmul.f32 %v49_v1, %v49_v1  ;;  %v3397_v6 = vld [vmem:[%s5191_s4 + $0x4] ss:$8 sps:$4 sm:$0xff]   ;;  %v3399_v7 = vld [vmem:[%s5191_s4] ss:$8 sps:$4 sm:$0xff]   ;;  %v3400_v8 = vld [vmem:[%s5191_s4 + $0x14] ss:$8 sps:$4 sm:$0xff]   ;;  %192 = vmatprep.mubr.bf16.mxu0 %v5197_v13 }
  0x15   :  { %160 = vmatprep.subr.bf16.mxu0 %v3397_v6  ;;  %v3402_v9 = vld [vmem:[%s5191_s4 + $0x10] ss:$8 sps:$4 sm:$0xff]   ;;  %v3403_v10 = vld [vmem:[%s5191_s4 + $0x24] ss:$8 sps:$4 sm:$0xff]   ;;  %v3405_v11 = vld [vmem:[%s5191_s4 + $0x20] ss:$8 sps:$4 sm:$0xff]  }
  0x16   :  { %v93_v4 = vsel %vm92_vm0, %v90_v2, 0.0  ;;  %v96_v5 = vsel %vm92_vm0, %v91_v3, 0.0  ;;  %161 = vmatpush1.bf16.msra.mxu0 %v3399_v7  ;;  %v3406_v12 = vld [vmem:[%s5191_s4 + $0x34] ss:$8 sps:$4 sm:$0xff]   ;;  %v3408_v14 = vld [vmem:[%s5191_s4 + $0x30] ss:$8 sps:$4 sm:$0xff]  }
  0x17   :  { %94 = vadd.xlane.f32.xlu0 %v93_v4  ;;  %162 = vmatprep.subr.bf16.mxu0 %v3400_v8  ;;  %v3829_v15 = vld [vmem:[%s5188_s1 + $0x40] sm:$0xff]  ;;  %v3836_v16 = vld [vmem:[%s5188_s1 + $0x48] sm:$0xff]  ;;  %v3848_v18 = vld [vmem:[%s5188_s1 + $0x50] sm:$0xff]  ;;  %s3723_s17 = smov 64   ;;  %s3724_s18 = smov 32   ;;  %vm683_vm1 = vcmask 64512  }
  0x18   :  { %v3841_v17 = vld [vmem:[%s5188_s1 + $0x68] sm:$0xff]  ;;  %493 = vrot.lane.b32.xlu1 %v3836_v16, %s3721_s20  ;;  %v3853_v19 = vld [vmem:[%s5188_s1 + $0x78] sm:$0xff]  ;;  %v3876_v22 = vld [vmem:[%s5188_s1 + $0x60] sm:$0xff]  ;;  %s3725_s23 = smov 48   ;;  %s3726_s24 = smov 16   ;;  %vm708_vm2 = vcmask 130048  }
  0x19   :  { %v3860_v20 = vld [vmem:[%s5188_s1 + $0x58] sm:$0xff]  ;;  %v3867_v21 = vld [vmem:[%s5188_s1 + $0x8] sm:$0xff]  ;;  %v3934_v44 = vld [vmem:[%s5188_s1 + $0x70] sm:$0xff]  ;;  %s3727_s28 = smov 112   ;;  %s3728_s29 = smov 96   ;;  %vm3732_vm3 = vmmov 0  }
  0x1a   :  { %163 = vmatpush1.bf16.msra.mxu0 %v3402_v9  ;;  %v3883_v23 = vld [vmem:[%s5188_s1 + $0x18] sm:$0xff]  ;;  %v3892_v24 = vld [vmem:[%s5188_s1 + $0x28] sm:$0xff]  ;;  %s3729_s30 = smov 80   ;;  %v3949_v45 = vld [vmem:[%s5188_s1] sm:$0xff]  ;;  %s3730_s10 = smov 120   ;;  %vm997_vm4 = vcmask 261120  }
  0x1b   :  { %97 = vadd.xlane.f32.xlu0 %v96_v5  ;;  %164 = vmatprep.subr.bf16.mxu0 %v3403_v10  ;;  %5225 = vst [vmem:[#allocation8_spill] sm:$0xff] %v3892_v24  ;;  %v3910_v42 = vld [vmem:[%s5188_s1 + $0x38] sm:$0xff]  ;;  %v3923_v43 = vld [vmem:[%s5189_s2 + $0x48] sm:$0xff]  ;;  %v3970_v48 = vld [vmem:[%s5188_s1 + $0x10] sm:$0xff]  ;;  %vm1000_vm5 = vcmask 392192  }
  0x1c   :  { %495 = vrot.lane.b32.xlu1 %v3848_v18, %s3721_s20  ;;  %5227 = vst [vmem:[#allocation10_spill] sm:$0xff] %v3910_v42  ;;  %v3954_v46 = vld [vmem:[%s5189_s2 + $0x58] sm:$0xff]  ;;  %v3963_v47 = vld [vmem:[%s5189_s2 + $0x68] sm:$0xff]  ;;  %5228 = vst [vmem:[#allocation11_spill] sm:$0xff] %v3970_v48 }
  0x1d   :  { %v3977_v49 = vld [vmem:[%s5189_s2 + $0x78] sm:$0xff]  ;;  %v3988_v50 = vld [vmem:[%s5189_s2 + $0x8] sm:$0xff]  ;;  %v3993_v51 = vld [vmem:[%s5188_s1 + $0x20] sm:$0xff] }
  0x1e   :  { %165 = vmatpush1.bf16.msra.mxu0 %v3405_v11  ;;  %5229 = vst [vmem:[#allocation12_spill] sm:$0xff] %v3993_v51  ;;  %v4004_v52 = vld [vmem:[%s5188_s1 + $0x30] sm:$0xff]  ;;  %v4011_v53 = vld [vmem:[%s5189_s2 + $0x40] sm:$0xff] }
  0x1f   :  { %166 = vmatprep.subr.bf16.mxu0 %v3406_v12  ;;  %5230 = vst [vmem:[#allocation13_spill] sm:$0xff] %v4004_v52  ;;  %v4018_v54 = vld [vmem:[%s5189_s2 + $0x50] sm:$0xff]  ;;  %v4025_v55 = vld [vmem:[%s5189_s2 + $0x60] sm:$0xff] }
  0x20   :  { %497 = vrot.lane.b32.xlu1 %v3860_v20, %s3721_s20  ;;  %v4032_v56 = vld [vmem:[%s5189_s2 + $0x70] sm:$0xff]  ;;  %v4039_v57 = vld [vmem:[%s5189_s2] sm:$0xff] }
  0x21   :  { %v4069_v5 = vld [vmem:[%s5189_s2 + $0x10] sm:$0xff] }
  0x22   :  { %167 = vmatpush1.bf16.msra.mxu0 %v3408_v14 }
  0x24   :  { %499 = vrot.lane.b32.xlu1 %v3876_v22, %s3721_s20 }
  0x31   :  { %491 = vrot.lane.b32.xlu0 %v3829_v15, %s3721_s20 }
  0x35   :  { %501 = vrot.lane.b32.xlu0 %v3841_v17, %s3721_s20 }
  0x39   :  { %505 = vrot.lane.b32.xlu0 %v3853_v19, %s3721_s20 }
  0x3d   :  { %477 = vrot.lane.b32.xlu0 %v3867_v21, %s3721_s20 }
  0x41   :  { %481 = vrot.lane.b32.xlu0 %v3883_v23, %s3721_s20 }
  0x45   :  { %485 = vrot.lane.b32.xlu0 %v3892_v24, %s3721_s20 }
  0x8a   :  { %v4043_v58 = vpop.permute.xlu1 %493 }
  0x8b   :  { %5231 = vst [vmem:[#allocation14_spill] sm:$0xff] %v4043_v58 }
  0x8e   :  { %v4045_v59 = vpop.permute.xlu1 %495 }
  0x8f   :  { %5232 = vst [vmem:[#allocation15_spill] sm:$0xff] %v4045_v59 }
  0x92   :  { %v4049_v61 = vpop.permute.xlu1 %497 }
  0x93   :  { %5234 = vst [vmem:[#allocation17_spill] sm:$0xff] %v4049_v61 }
  0x96   :  { %v4053_v63 = vpop.permute.xlu1 %499 }
  0x97   :  { %5236 = vst [vmem:[#allocation19_spill] sm:$0xff] %v4053_v63 }
  0xa4   :  { %v95_v25 = vpop.xlane.xlu0 %94 }
  0xa5   :  { %v100_v26 = vmul.f32 0.015625, %v95_v25 }
  0xa7   :  { %v102_v27 = vadd.f32 1e-05, %v100_v26 }
  0xa8   :  { %v98_v28 = vpop.xlane.xlu0 %97 }
  0xa9   :  { %v101_v29 = vmul.f32 0.015625, %v98_v28  ;;  %3513 = vrsqrt.f32 %v102_v27  ;;  %v4101_v28 = vld [vmem:[%s5189_s2 + $0x18] sm:$0xff] }
  0xab   :  { %v103_v30 = vadd.f32 1e-05, %v101_v29 }
  0xac   :  { %v4047_v60 = vpop.permute.xlu0 %491 }
  0xad   :  { %3515 = vrsqrt.f32 %v103_v30  ;;  %5233 = vst [vmem:[#allocation16_spill] sm:$0xff] %v4047_v60 }
  0xb0   :  { %v4051_v62 = vpop.permute.xlu0 %501 }
  0xb1   :  { %5235 = vst [vmem:[#allocation18_spill] sm:$0xff] %v4051_v62 }
  0xb3   :  { %v3514_v31 = vpop.eup %3513 }
  0xb4   :  { %v106_v33 = vmul.f32 %v3514_v31, %v48_v0  ;;  %v4055_v0 = vpop.permute.xlu0 %505 }
  0xb5   :  { %5237 = vst [vmem:[#allocation20_spill] sm:$0xff] %v4055_v0 }
  0xb7   :  { %v3516_v32 = vpop.eup %3515 }
  0xb8   :  { %v107_v34 = vmul.f32 %v3516_v32, %v49_v1  ;;  %v4061_v3 = vpop.permute.xlu0 %477 }
  0xb9   :  { %5238 = vst [vmem:[#allocation21_spill] sm:$0xff] %v4061_v3 }
  0xba   :  { %v116_v35 = vpack.c.bf16 %v107_v34, %v106_v33 }
  0xbc   :  { %2870 = vmatmul.mubr.msk.bf16.vlgmr.msra.gmra.mrb[0].mxu0 %vm92_vm0, %v116_v35  ;;  %v4071_v6 = vpop.permute.xlu0 %481 }
  0xbd   :  { %5239 = vst [vmem:[#allocation22_spill] sm:$0xff] %v4071_v6 }
  0xc0   :  { %v4080_v9 = vpop.permute.xlu0 %485 }
  0xc1   :  { %5240 = vst [vmem:[#allocation23_spill] sm:$0xff] %v4080_v9 }
 0x18f   :  { %v3897_v36 = vpop.f32.mrb[0].mxu0 }
 0x190   :  { %223 = vrot.lane.b32.xlu1 %v3897_v36, %s3723_s17  ;;  %v196_v37 = vpop.f32.mrb[1].mxu0 }
 0x191   :  { %v3901_v38 = vpop.f32.mrb[2].mxu0 }
 0x192   :  { %237 = vrot.lane.b32.xlu0 %v3901_v38, %s3724_s18  ;;  %v200_v39 = vpop.f32.mrb[3].mxu0  ;;  %v524_v33 = vmul.f32 %v4061_v3, %v3901_v38 }
 0x193   :  { %v3905_v40 = vpack.i.bf16 %v200_v39, %v196_v37  ;;  %v890_v41 = vpack.c.bf16 %v200_v39, %v196_v37 }
 0x194   :  { %229 = vrot.lane.b32.xlu1 %v3897_v36, %s3725_s23 }
 0x195   :  { %5226 = vst [vmem:[#allocation9_spill] sm:$0xff] %v3905_v40  ;;  %3150 = vmatprep.subr.bf16.mxu0 %v890_v41 }
 0x196   :  { %489 = vrot.lane.b32.xlu0 %v3910_v42, %s3721_s20  ;;  %3151 = vmatpush3.bf16.msra.mxu0 %v890_v41 }
 0x198   :  { %235 = vrot.lane.b32.xlu1 %v3897_v36, %s3724_s18 }
 0x19a   :  { %243 = vrot.lane.b32.xlu0 %v3901_v38, %s3726_s24 }
 0x19c   :  { %241 = vrot.lane.b32.xlu1 %v3897_v36, %s3726_s24 }
 0x19e   :  { %317 = vrot.lane.b32.xlu0 %v3923_v43, %s3721_s20 }
 0x1a0   :  { %225 = vrot.lane.b32.xlu1 %v3901_v38, %s3723_s17 }
 0x1a2   :  { %207 = vrot.lane.b32.xlu0 %v3901_v38, %s3727_s28 }
 0x1a4   :  { %503 = vrot.lane.b32.xlu1 %v3934_v44, %s3721_s20 }
 0x1a6   :  { %213 = vrot.lane.b32.xlu0 %v3901_v38, %s3728_s29 }
 0x1a8   :  { %231 = vrot.lane.b32.xlu1 %v3901_v38, %s3725_s23 }
 0x1aa   :  { %219 = vrot.lane.b32.xlu0 %v3901_v38, %s3729_s30 }
 0x1ac   :  { %475 = vrot.lane.b32.xlu1 %v3949_v45, %s3721_s20 }
 0x1ae   :  { %321 = vrot.lane.b32.xlu0 %v3954_v46, %s3721_s20 }
 0x1b0   :  { %205 = vrot.lane.b32.xlu1 %v3897_v36, %s3727_s28 }
 0x1b2   :  { %325 = vrot.lane.b32.xlu0 %v3963_v47, %s3721_s20 }
 0x1b4   :  { %479 = vrot.lane.b32.xlu1 %v3970_v48, %s3721_s20 }
 0x1b6   :  { %329 = vrot.lane.b32.xlu0 %v3977_v49, %s3721_s20 }
 0x1b8   :  { %211 = vrot.lane.b32.xlu1 %v3897_v36, %s3728_s29 }
 0x1ba   :  { %301 = vrot.lane.b32.xlu0 %v3988_v50, %s3721_s20 }
 0x1bc   :  { %483 = vrot.lane.b32.xlu1 %v3993_v51, %s3721_s20 }
 0x1c0   :  { %217 = vrot.lane.b32.xlu1 %v3897_v36, %s3729_s30 }
 0x1c4   :  { %487 = vrot.lane.b32.xlu1 %v4004_v52, %s3721_s20 }
 0x1c8   :  { %315 = vrot.lane.b32.xlu1 %v4011_v53, %s3721_s20 }
 0x1cc   :  { %319 = vrot.lane.b32.xlu1 %v4018_v54, %s3721_s20 }
 0x1d0   :  { %323 = vrot.lane.b32.xlu1 %v4025_v55, %s3721_s20 }
 0x1d4   :  { %327 = vrot.lane.b32.xlu1 %v4032_v56, %s3721_s20 }
 0x1d8   :  { %299 = vrot.lane.b32.xlu1 %v4039_v57, %s3721_s20 }
 0x202   :  { %v4057_v1 = vpop.permute.xlu1 %223 }
 0x203   :  { %v531_v2 = vmul.f32 %v4047_v60, %v4057_v1 }
 0x204   :  { %v4091_v25 = vpop.permute.xlu0 %237 }
 0x205   :  { %571 = vrot.lane.b32.xlu1 %v531_v2, %s3730_s10  ;;  %v536_v39 = vmul.f32 %v4051_v62, %v4091_v25 }
 0x206   :  { %v4064_v4 = vpop.permute.xlu1 %229 }
 0x207   :  { %v533_v8 = vmul.f32 %v4045_v59, %v4064_v4  ;;  %v453_v51 = vmul.f32 %v4064_v4, %v4018_v54 }
 0x208   :  { %v4106_v29 = vpop.permute.xlu0 %489 }
 0x209   :  { %303 = vrot.lane.b32.xlu1 %v4069_v5, %s3721_s20  ;;  %5242 = vst [vmem:[#allocation25_spill] sm:$0xff] %v4106_v29 }
 0x20a   :  { %v4075_v7 = vpop.permute.xlu1 %235 }
 0x20b   :  { %v535_v11 = vmul.f32 %v4053_v63, %v4075_v7 }
 0x20c   :  { %v4119_v35 = vpop.permute.xlu0 %243 }
 0x20d   :  { %575 = vrot.lane.b32.xlu1 %v533_v8, %s3730_s10 }
 0x20e   :  { %v4082_v10 = vpop.permute.xlu1 %241 }
 0x210   :  { %v4128_v41 = vpop.permute.xlu0 %317 }
 0x211   :  { %579 = vrot.lane.b32.xlu1 %v535_v11, %s3730_s10  ;;  %5244 = vst [vmem:[#allocation27_spill] sm:$0xff] %v4128_v41  ;;  %v4137_v11 = vld [vmem:[%s5189_s2 + $0x28] sm:$0xff] }
 0x212   :  { %v4087_v12 = vpop.permute.xlu1 %225 }
 0x213   :  { %v532_v14 = vmul.f32 %v4043_v58, %v4087_v12 }
 0x215   :  { %573 = vrot.lane.b32.xlu0 %v532_v14, %s3730_s10 }
 0x216   :  { %v4094_v26 = vpop.permute.xlu1 %503 }
 0x217   :  { %5241 = vst [vmem:[#allocation24_spill] sm:$0xff] %v4094_v26  ;;  %v537_v27 = vmul.f32 %v4094_v26, %v4082_v10 }
 0x219   :  { %305 = vrot.lane.b32.xlu0 %v4101_v28, %s3721_s20  ;;  %583 = vrot.lane.b32.xlu1 %v537_v27, %s3730_s10  ;;  %v538_v27 = vmul.f32 %v4055_v0, %v4119_v35 }
 0x21a   :  { %v4108_v30 = vpop.permute.xlu1 %231 }
 0x21b   :  { %v534_v31 = vmul.f32 %v4049_v61, %v4108_v30 }
 0x21d   :  { %577 = vrot.lane.b32.xlu0 %v534_v31, %s3730_s10  ;;  %v4146_v31 = vpop.permute.xlu0 %207 }
 0x21e   :  { %v4113_v32 = vpop.permute.xlu1 %475  ;;  %v526_v3 = vmul.f32 %v4071_v6, %v4146_v31 }
 0x21f   :  { %5243 = vst [vmem:[#allocation26_spill] sm:$0xff] %v4113_v32  ;;  %v523_v34 = vmul.f32 %v4113_v32, %v3897_v36 }
 0x221   :  { %555 = vrot.lane.b32.xlu1 %v523_v34, %s3730_s10  ;;  %557 = vrot.lane.b32.xlu0 %v524_v33, %s3730_s10  ;;  %v4151_v33 = vld [vmem:[%s5189_s2 + $0x20] sm:$0xff]  ;;  %v4172_v13 = vpop.permute.xlu0 %213 }
 0x222   :  { %v4123_v37 = vpop.permute.xlu1 %205  ;;  %v528_v0 = vmul.f32 %v4080_v9, %v4172_v13  ;;  %v356_v9 = vmul.f32 %v4128_v41, %v4087_v12 }
 0x225   :  { %581 = vrot.lane.b32.xlu0 %v536_v39, %s3730_s10  ;;  %v4161_v39 = vld [vmem:[%s5189_s2 + $0x30] sm:$0xff]  ;;  %v4188_v63 = vpop.permute.xlu0 %219 }
 0x226   :  { %v4130_v2 = vpop.permute.xlu1 %479 }
 0x227   :  { %5245 = vst [vmem:[#allocation28_spill] sm:$0xff] %v4130_v2  ;;  %v525_v8 = vmul.f32 %v4130_v2, %v4123_v37 }
 0x229   :  { %559 = vrot.lane.b32.xlu1 %v525_v8, %s3730_s10  ;;  %309 = vrot.lane.b32.xlu0 %v4137_v11, %s3721_s20  ;;  %v4166_v8 = vld [vmem:[%s5189_s2 + $0x38] sm:$0xff] }
 0x22a   :  { %v4142_v14 = vpop.permute.xlu1 %211 }
 0x22d   :  { %307 = vrot.lane.b32.xlu1 %v4151_v33, %s3721_s20  ;;  %585 = vrot.lane.b32.xlu0 %v538_v27, %s3730_s10 }
 0x22e   :  { %v4156_v34 = vpop.permute.xlu1 %483 }
 0x22f   :  { %5246 = vst [vmem:[#allocation29_spill] sm:$0xff] %v4156_v34  ;;  %v527_v2 = vmul.f32 %v4156_v34, %v4142_v14 }
 0x231   :  { %311 = vrot.lane.b32.xlu1 %v4161_v39, %s3721_s20  ;;  %313 = vrot.lane.b32.xlu0 %v4166_v8, %s3721_s20 }
 0x232   :  { %v4174_v27 = vpop.permute.xlu1 %217 }
 0x235   :  { %563 = vrot.lane.b32.xlu1 %v527_v2, %s3730_s10  ;;  %561 = vrot.lane.b32.xlu0 %v526_v3, %s3730_s10  ;;  %v530_v3 = vmul.f32 %v4106_v29, %v4188_v63 }
 0x236   :  { %v4182_v32 = vpop.permute.xlu1 %487 }
 0x237   :  { %5247 = vst [vmem:[#allocation30_spill] sm:$0xff] %v4182_v32  ;;  %v529_v26 = vmul.f32 %v4182_v32, %v4174_v27  ;;  %v4200_v32 = vpop.permute.xlu0 %321 }
 0x238   :  { %v358_v52 = vmul.f32 %v4200_v32, %v4108_v30 }
 0x239   :  { %567 = vrot.lane.b32.xlu1 %v529_v26, %s3730_s10  ;;  %565 = vrot.lane.b32.xlu0 %v528_v0, %s3730_s10 }
 0x23a   :  { %v4192_v34 = vpop.permute.xlu1 %315 }
 0x23b   :  { %5248 = vst [vmem:[#allocation31_spill] sm:$0xff] %v4192_v34  ;;  %v355_v2 = vmul.f32 %v4192_v34, %v4057_v1  ;;  %v4209_v34 = vpop.permute.xlu0 %325 }
 0x23c   :  { %5250 = vst [vmem:[#allocation33_spill] sm:$0xff] %v4209_v34 }
 0x23d   :  { %395 = vrot.lane.b32.xlu1 %v355_v2, %s3730_s10  ;;  %569 = vrot.lane.b32.xlu0 %v530_v3, %s3730_s10  ;;  %v360_v2 = vmul.f32 %v4209_v34, %v4091_v25 }
 0x23e   :  { %v4204_v26 = vpop.permute.xlu1 %319 }
 0x23f   :  { %5249 = vst [vmem:[#allocation32_spill] sm:$0xff] %v4204_v26  ;;  %v357_v0 = vmul.f32 %v4204_v26, %v4064_v4 }
 0x241   :  { %397 = vrot.lane.b32.xlu0 %v356_v9, %s3730_s10  ;;  %v4221_v9 = vpop.permute.xlu0 %329 }
 0x242   :  { %v4215_v3 = vpop.permute.xlu1 %323 }
 0x245   :  { %399 = vrot.lane.b32.xlu0 %v357_v0, %s3730_s10  ;;  %v4225_v26 = vpop.permute.xlu0 %301  ;;  %v451_v0 = vmul.f32 %v4057_v1, %v4011_v53  ;;  %v454_v53 = vmul.f32 %v4108_v30, %v3954_v46 }
 0x246   :  { %v4217_v29 = vpop.permute.xlu1 %327 }
 0x249   :  { %405 = vrot.lane.b32.xlu0 %v360_v2, %s3730_s10  ;;  %v452_v2 = vmul.f32 %v4087_v12, %v3923_v43 }
 0x24a   :  { %v4219_v41 = vpop.permute.xlu1 %299 }
 0x277   :  { %v572_v6 = vpop.permute.xlu1 %571 }
 0x278   :  { %v611_v61 = vadd.f32 %v572_v6, %v451_v0 }
 0x27b   :  { %v4223_v62 = vpop.permute.xlu1 %303 }
 0x27f   :  { %v576_v59 = vpop.permute.xlu1 %575 }
 0x280   :  { %v613_v48 = vadd.f32 %v576_v59, %v453_v51  ;;  %v456_v51 = vmul.f32 %v4091_v25, %v3963_v47  ;;  %v348_v47 = vmul.f32 %v4225_v26, %v3901_v38 }
 0x283   :  { %v580_v40 = vpop.permute.xlu1 %579 }
 0x287   :  { %v574_v34 = vpop.permute.xlu0 %573 }
 0x288   :  { %v612_v58 = vadd.f32 %v574_v34, %v452_v2 }
 0x28a   :  { %v3257_v60 = vpack.i.bf16 %v612_v58, %v611_v61  ;;  %v359_v58 = vmul.f32 %v4215_v3, %v4075_v7  ;;  %v444_v61 = vmul.f32 %v3901_v38, %v3988_v50 }
 0x28b   :  { %v4231_v42 = vpop.permute.xlu0 %305  ;;  %v584_v24 = vpop.permute.xlu1 %583 }
 0x28c   :  { %3258 = vrot.lane.b32.xlu1 %v3257_v60, %s3721_s20  ;;  %v443_v60 = vmul.f32 %v3897_v36, %v4039_v57  ;;  %v361_v57 = vmul.f32 %v4217_v29, %v4082_v10 }
 0x28f   :  { %v578_v43 = vpop.permute.xlu0 %577 }
 0x290   :  { %v614_v6 = vadd.f32 %v578_v43, %v454_v53  ;;  %401 = vrot.lane.b32.xlu1 %v358_v52, %s3730_s10  ;;  %v362_v52 = vmul.f32 %v4221_v9, %v4119_v35 }
 0x292   :  { %v3262_v34 = vpack.i.bf16 %v614_v6, %v613_v48  ;;  %v455_v48 = vmul.f32 %v4075_v7, %v4025_v55  ;;  %v347_v55 = vmul.f32 %v4219_v41, %v3897_v36 }
 0x293   :  { %v556_v54 = vpop.permute.xlu1 %555  ;;  %v558_v0 = vpop.permute.xlu0 %557 }
 0x294   :  { %v603_v2 = vadd.f32 %v556_v54, %v443_v60  ;;  %v604_v46 = vadd.f32 %v558_v0, %v444_v61  ;;  %403 = vrot.lane.b32.xlu1 %v359_v58, %s3730_s10  ;;  %3263 = vrot.lane.b32.xlu0 %v3262_v34, %s3721_s20  ;;  %v615_v53 = vadd.f32 %v580_v40, %v455_v48 }
 0x295   :  { %v457_v40 = vmul.f32 %v4082_v10, %v4032_v56  ;;  %v350_v61 = vmul.f32 %v4231_v42, %v4146_v31  ;;  %v458_v34 = vmul.f32 %v4119_v35, %v3977_v49  ;;  %v446_v48 = vmul.f32 %v4146_v31, %v4101_v28 }
 0x296   :  { %v3272_v50 = vpack.i.bf16 %v604_v46, %v603_v2  ;;  %v447_v28 = vmul.f32 %v4142_v14, %v4151_v33 }
 0x297   :  { %v582_v59 = vpop.permute.xlu0 %581  ;;  %v617_v2 = vadd.f32 %v584_v24, %v457_v40  ;;  %v445_v24 = vmul.f32 %v4123_v37, %v4069_v5  ;;  %v448_v5 = vmul.f32 %v4172_v13, %v4137_v11  ;;  %v449_v11 = vmul.f32 %v4174_v27, %v4161_v39 }
 0x298   :  { %v616_v43 = vadd.f32 %v582_v59, %v456_v51  ;;  %409 = vrot.lane.b32.xlu1 %v362_v52, %s3730_s10  ;;  %407 = vrot.lane.b32.xlu0 %v361_v57, %s3730_s10  ;;  %v349_v51 = vmul.f32 %v4223_v62, %v4123_v37  ;;  %v275_v39 = vmul.f32 %v4057_v1, %v3829_v15 }
 0x299   :  { %v278_v1 = vmul.f32 %v4108_v30, %v3860_v20  ;;  %v280_v20 = vmul.f32 %v4091_v25, %v3841_v17 }
 0x29a   :  { %v3267_v6 = vpack.i.bf16 %v616_v43, %v615_v53 }
 0x29b   :  { %v560_v58 = vpop.permute.xlu1 %559  ;;  %v4261_v60 = vpop.permute.xlu0 %309 }
 0x29c   :  { %381 = vrot.lane.b32.xlu0 %v348_v47, %s3730_s10  ;;  %3268 = vrot.lane.b32.xlu1 %v3267_v6, %s3721_s20  ;;  %v352_v49 = vmul.f32 %v4261_v60, %v4172_v13  ;;  %v605_v43 = vadd.f32 %v560_v58, %v445_v24 }
 0x29f   :  { %v4273_v54 = vpop.permute.xlu1 %307  ;;  %v586_v0 = vpop.permute.xlu0 %585 }
 0x2a0   :  { %v618_v46 = vadd.f32 %v586_v0, %v458_v34  ;;  %385 = vrot.lane.b32.xlu0 %v350_v61, %s3730_s10  ;;  %379 = vrot.lane.b32.xlu1 %v347_v55, %s3730_s10  ;;  %v351_v6 = vmul.f32 %v4273_v54, %v4142_v14 }
 0x2a2   :  { %v3277_v52 = vpack.i.bf16 %v618_v46, %v617_v2 }
 0x2a3   :  { %v4279_v56 = vpop.permute.xlu1 %311  ;;  %v4281_v57 = vpop.permute.xlu0 %313 }
 0x2a4   :  { %383 = vrot.lane.b32.xlu1 %v349_v51, %s3730_s10  ;;  %3278 = vrot.lane.b32.xlu0 %v3277_v52, %s3721_s20  ;;  %v353_v61 = vmul.f32 %v4279_v56, %v4174_v27  ;;  %v354_v34 = vmul.f32 %v4281_v57, %v4188_v63 }
 0x2a7   :  { %v564_v59 = vpop.permute.xlu1 %563  ;;  %v562_v53 = vpop.permute.xlu0 %561 }
 0x2a8   :  { %v606_v47 = vadd.f32 %v562_v53, %v446_v48  ;;  %3273 = vrot.lane.b32.xlu1 %v3272_v50, %s3721_s20  ;;  %389 = vrot.lane.b32.xlu0 %v352_v49, %s3730_s10  ;;  %v450_v50 = vmul.f32 %v4188_v63, %v4166_v8  ;;  %v607_v46 = vadd.f32 %v564_v59, %v447_v28 }
 0x2a9   :  { %v276_v59 = vmul.f32 %v4087_v12, %v3836_v16  ;;  %v277_v16 = vmul.f32 %v4064_v4, %v3848_v18  ;;  %v279_v4 = vmul.f32 %v4075_v7, %v3876_v22  ;;  %v282_v22 = vmul.f32 %v4119_v35, %v3853_v19 }
 0x2aa   :  { %v3282_v55 = vpack.i.bf16 %v606_v47, %v605_v43  ;;  %v281_v7 = vmul.f32 %v4082_v10, %v3934_v44 }
 0x2ab   :  { %v566_v40 = vpop.permute.xlu0 %565  ;;  %v568_v58 = vpop.permute.xlu1 %567 }
 0x2ac   :  { %387 = vrot.lane.b32.xlu1 %v351_v6, %s3730_s10  ;;  %3283 = vrot.lane.b32.xlu0 %v3282_v55, %s3721_s20  ;;  %v608_v0 = vadd.f32 %v566_v40, %v448_v5  ;;  %v609_v51 = vadd.f32 %v568_v58, %v449_v11 }
 0x2ae   :  { %v3287_v33 = vpack.i.bf16 %v608_v0, %v607_v46 }
 0x2af   :  { %v570_v2 = vpop.permute.xlu0 %569  ;;  %v396_v49 = vpop.permute.xlu1 %395 }
 0x2b0   :  { %v610_v52 = vadd.f32 %v570_v2, %v450_v50  ;;  %391 = vrot.lane.b32.xlu1 %v353_v61, %s3730_s10  ;;  %393 = vrot.lane.b32.xlu0 %v354_v34, %s3730_s10  ;;  %v435_v43 = vsub.f32 %v275_v39, %v396_v49 }
 0x2b2   :  { %v3292_v8 = vpack.i.bf16 %v610_v52, %v609_v51 }
 0x2b3   :  { %v398_v24 = vpop.permute.xlu0 %397 }
 0x2b4   :  { %3288 = vrot.lane.b32.xlu1 %v3287_v33, %s3721_s20  ;;  %3293 = vrot.lane.b32.xlu0 %v3292_v8, %s3721_s20  ;;  %v436_v47 = vsub.f32 %v276_v59, %v398_v24 }
 0x2b7   :  { %v400_v48 = vpop.permute.xlu0 %399 }
 0x2b8   :  { %v437_v34 = vsub.f32 %v277_v16, %v400_v48  ;;  %v267_v16 = vmul.f32 %v3897_v36, %v3949_v45 }
 0x2bb   :  { %v406_v28 = vpop.permute.xlu0 %405 }
 0x2bc   :  { %v440_v49 = vsub.f32 %v280_v20, %v406_v28 }
 0x2fe   :  { %v3259_v53 = vpop.permute.xlu1 %3258 }
 0x2ff   :  { %v3261_v6 = vunpack.i.h.bf16 %v3259_v53  ;;  %v3260_v55 = vunpack.i.l.bf16 %v3259_v53 }
 0x301   :  { %v692_v40 = vsel %vm683_vm1, %v435_v43, %v3260_v55  ;;  %v693_v5 = vsel %vm683_vm1, %v436_v47, %v3261_v6 }
 0x302   :  { %v402_v58 = vpop.permute.xlu1 %401  ;;  %v704_v50 = vpack.c.bf16 %v693_v5, %v692_v40 }
 0x303   :  { %v438_v11 = vsub.f32 %v278_v1, %v402_v58 }
 0x304   :  { %3234 = vmatprep.subr.msk.bf16.mxu1 %vm708_vm2, %v704_v50  ;;  %v722_v15 = vsel %vm708_vm2, %v704_v50, 0 }
 0x305   :  { %3135 = vmatpush3.bf16.xpose.msra.mxu1 %v722_v15  ;;  %v268_v15 = vmul.f32 %v3901_v38, %v3867_v21  ;;  %v270_v21 = vmul.f32 %v4146_v31, %v3883_v23  ;;  %v5251_v38 = vld [vmem:[#allocation11_spill] sm:$0xff] }
 0x306   :  { %v404_v12 = vpop.permute.xlu1 %403  ;;  %v3264_v61 = vpop.permute.xlu0 %3263  ;;  %v269_v36 = vmul.f32 %v4123_v37, %v5251_v38 }
 0x307   :  { %v3266_v0 = vunpack.i.h.bf16 %v3264_v61  ;;  %v3265_v2 = vunpack.i.l.bf16 %v3264_v61  ;;  %v439_v48 = vsub.f32 %v279_v4, %v404_v12 }
 0x309   :  { %v695_v46 = vsel %vm683_vm1, %v438_v11, %v3266_v0  ;;  %v694_v51 = vsel %vm683_vm1, %v437_v34, %v3265_v2 }
 0x30a   :  { %v410_v52 = vpop.permute.xlu1 %409  ;;  %v408_v33 = vpop.permute.xlu0 %407  ;;  %v705_v8 = vpack.c.bf16 %v695_v46, %v694_v51 }
 0x30b   :  { %v442_v5 = vsub.f32 %v282_v22, %v410_v52  ;;  %v441_v28 = vsub.f32 %v281_v7, %v408_v33 }
 0x30c   :  { %3235 = vmatprep.subr.msk.bf16.mxu1 %vm708_vm2, %v705_v8  ;;  %v725_v18 = vsel %vm708_vm2, %v705_v8, 0 }
 0x30d   :  { %3137 = vmatpush3.bf16.xpose.msra.mxu1 %v725_v18 }
 0x30e   :  { %v3269_v30 = vpop.permute.xlu1 %3268  ;;  %v382_v24 = vpop.permute.xlu0 %381 }
 0x30f   :  { %v3271_v39 = vunpack.i.h.bf16 %v3269_v30  ;;  %v3270_v59 = vunpack.i.l.bf16 %v3269_v30  ;;  %v428_v10 = vsub.f32 %v268_v15, %v382_v24  ;;  %v5252_v24 = vld [vmem:[#allocation8_spill] sm:$0xff] }
 0x311   :  { %v696_v53 = vsel %vm683_vm1, %v439_v48, %v3270_v59  ;;  %v697_v43 = vsel %vm683_vm1, %v440_v49, %v3271_v39  ;;  %v272_v49 = vmul.f32 %v4172_v13, %v5252_v24  ;;  %v5253_v48 = vld [vmem:[#allocation12_spill] sm:$0xff]  ;;  %v5254_v59 = vld [vmem:[#allocation13_spill] sm:$0xff] }
 0x312   :  { %v380_v47 = vpop.permute.xlu1 %379  ;;  %v386_v6 = vpop.permute.xlu0 %385  ;;  %v706_v55 = vpack.c.bf16 %v697_v43, %v696_v53  ;;  %v271_v39 = vmul.f32 %v4142_v14, %v5253_v48  ;;  %v273_v53 = vmul.f32 %v4174_v27, %v5254_v59  ;;  %v5255_v43 = vld [vmem:[#allocation10_spill] sm:$0xff] }
 0x313   :  { %v427_v61 = vsub.f32 %v267_v16, %v380_v47  ;;  %v430_v33 = vsub.f32 %v270_v21, %v386_v6  ;;  %v274_v47 = vmul.f32 %v4188_v63, %v5255_v43  ;;  %v5256_v16 = vmov 0  }
 0x314   :  { %3236 = vmatprep.subr.msk.bf16.mxu1 %vm708_vm2, %v706_v55  ;;  %v728_v17 = vsel %vm708_vm2, %v706_v55, 0 }
 0x315   :  { %3139 = vmatpush3.bf16.xpose.msra.mxu1 %v728_v17 }
 0x316   :  { %v384_v25 = vpop.permute.xlu1 %383  ;;  %v3279_v40 = vpop.permute.xlu0 %3278 }
 0x317   :  { %v3281_v58 = vunpack.i.h.bf16 %v3279_v40  ;;  %v3280_v50 = vunpack.i.l.bf16 %v3279_v40  ;;  %v429_v8 = vsub.f32 %v269_v36, %v384_v25 }
 0x319   :  { %v699_v1 = vsel %vm683_vm1, %v442_v5, %v3281_v58  ;;  %v698_v19 = vsel %vm683_vm1, %v441_v28, %v3280_v50 }
 0x31a   :  { %v3274_v35 = vpop.permute.xlu1 %3273  ;;  %v390_v12 = vpop.permute.xlu0 %389  ;;  %v707_v44 = vpack.c.bf16 %v699_v1, %v698_v19  ;;  %v82_v1 = vld [vmem:[%s5190_s3] sm:$0xff] }
 0x31b   :  { %v3276_v34 = vunpack.i.h.bf16 %v3274_v35  ;;  %v3275_v11 = vunpack.i.l.bf16 %v3274_v35  ;;  %v432_v6 = vsub.f32 %v272_v49, %v390_v12  ;;  %v85_v12 = vld [vmem:[%s5190_s3 + $0x18] sm:$0xff] }
 0x31c   :  { %3237 = vmatprep.subr.msk.bf16.mxu1 %vm708_vm2, %v707_v44  ;;  %v731_v0 = vsel %vm708_vm2, %v707_v44, 0  ;;  %v83_v44 = vld [vmem:[%s5190_s3 + $0x8] sm:$0xff] }
 0x31d   :  { %3141 = vmatpush3.bf16.xpose.msra.mxu1 %v731_v0  ;;  %v684_v45 = vsel %vm683_vm1, %v427_v61, %v3275_v11  ;;  %v685_v2 = vsel %vm683_vm1, %v428_v10, %v3276_v34  ;;  %v84_v34 = vld [vmem:[%s5190_s3 + $0x10] sm:$0xff] }
 0x31e   :  { %v388_v46 = vpop.permute.xlu1 %387  ;;  %v3284_v51 = vpop.permute.xlu0 %3283  ;;  %v700_v52 = vpack.c.bf16 %v685_v2, %v684_v45 }
 0x31f   :  { %v3286_v18 = vunpack.i.h.bf16 %v3284_v51  ;;  %v3285_v20 = vunpack.i.l.bf16 %v3284_v51  ;;  %v431_v55 = vsub.f32 %v271_v39, %v388_v46  ;;  %v86_v46 = vld [vmem:[%s5190_s3 + $0x20] sm:$0xff] }
 0x320   :  { %3142 = vmatprep.mubr.msk.bf16.mxu1 %vm708_vm2, %v700_v52 }
 0x321   :  { %v687_v4 = vsel %vm683_vm1, %v430_v33, %v3286_v18  ;;  %v686_v23 = vsel %vm683_vm1, %v429_v8, %v3285_v20  ;;  %v87_v8 = vld [vmem:[%s5190_s3 + $0x28] sm:$0xff]  ;;  %v88_v18 = vld [vmem:[%s5190_s3 + $0x30] sm:$0xff] }
 0x322   :  { %v392_v31 = vpop.permute.xlu1 %391  ;;  %v394_v37 = vpop.permute.xlu0 %393  ;;  %v701_v30 = vpack.c.bf16 %v687_v4, %v686_v23  ;;  %v89_v23 = vld [vmem:[%s5190_s3 + $0x38] sm:$0xff] }
 0x323   :  { %v433_v17 = vsub.f32 %v273_v53, %v392_v31  ;;  %v434_v22 = vsub.f32 %v274_v47, %v394_v37 }
 0x324   :  { %3143 = vmatmul.mubr.msk.bf16.vlgmr.msra.gmra.mrb[0].mxu1 %vm708_vm2, %v701_v30 }
 0x326   :  { %v3289_v7 = vpop.permute.xlu1 %3288  ;;  %v3294_v25 = vpop.permute.xlu0 %3293 }
 0x327   :  { %v3291_v40 = vunpack.i.h.bf16 %v3289_v7  ;;  %v3290_v5 = vunpack.i.l.bf16 %v3289_v7  ;;  %v3296_v13 = vunpack.i.h.bf16 %v3294_v25  ;;  %v3295_v28 = vunpack.i.l.bf16 %v3294_v25 }
 0x329   :  { %v688_v14 = vsel %vm683_vm1, %v431_v55, %v3290_v5  ;;  %v689_v58 = vsel %vm683_vm1, %v432_v6, %v3291_v40  ;;  %v691_v27 = vsel %vm683_vm1, %v434_v22, %v3296_v13  ;;  %v690_v63 = vsel %vm683_vm1, %v433_v17, %v3295_v28 }
 0x32a   :  { %v702_v50 = vpack.c.bf16 %v689_v58, %v688_v14  ;;  %v703_v15 = vpack.c.bf16 %v691_v27, %v690_v63 }
 0x32c   :  { %3146 = vmatprep.mubr.msk.bf16.mxu1 %vm708_vm2, %v702_v50 }
 0x32d   :  { %3147 = vmatmul.mubr.msk.bf16.gmra.mrb[4].mxu1 %vm708_vm2, %v703_v15 }
 0x32e   :  { %1230 = vmatprep.mubr.bf16.mxu1 %v5256_v16 }
 0x3f7   :  { %v3144_v19 = vpop.f32.mrb[0].mxu1 }
 0x3f8   :  { %v767_v35 = vpop.f32.mrb[1].mxu1  ;;  %v776_v36 = vadd.f32 %v3144_v19, %v84_v34 }
 0x3f9   :  { %v768_v10 = vadd.f32 %v767_v35, %v82_v1  ;;  %v3145_v61 = vpop.f32.mrb[2].mxu1 }
 0x3fa   :  { %v770_v11 = vpop.f32.mrb[3].mxu1  ;;  %v779_v0 = vadd.f32 %v3145_v61, %v85_v12  ;;  %v804_v33 = vsel %vm92_vm0, %v776_v36, -inf }
 0x3fb   :  { %v771_v21 = vadd.f32 %v770_v11, %v83_v44  ;;  %v798_v38 = vsel %vm92_vm0, %v768_v10, -inf }
 0x3fc   :  { %799 = vmax.xlane.f32.xlu1 %v798_v38  ;;  %v807_v2 = vsel %vm92_vm0, %v779_v0, -inf  ;;  %v5257_v38 = vld [vmem:[#allocation9_spill] sm:$0xff] }
 0x3fd   :  { %v801_v45 = vsel %vm92_vm0, %v771_v21, -inf }
 0x3fe   :  { %802 = vmax.xlane.f32.xlu0 %v801_v45 }
 0x400   :  { %v3148_v51 = vpop.f32.mrb[4].mxu1  ;;  %808 = vmax.xlane.f32.xlu1 %v807_v2 }
 0x401   :  { %v783_v52 = vpop.f32.mrb[5].mxu1  ;;  %v792_v24 = vadd.f32 %v3148_v51, %v88_v18 }
 0x402   :  { %v784_v20 = vadd.f32 %v783_v52, %v86_v46  ;;  %v3149_v4 = vpop.f32.mrb[6].mxu1  ;;  %805 = vmax.xlane.f32.xlu0 %v804_v33 }
 0x403   :  { %v786_v31 = vpop.f32.mrb[7].mxu1  ;;  %v795_v49 = vadd.f32 %v3149_v4, %v89_v23  ;;  %v816_v39 = vsel %vm92_vm0, %v792_v24, -inf }
 0x404   :  { %v787_v37 = vadd.f32 %v786_v31, %v87_v8  ;;  %v810_v30 = vsel %vm92_vm0, %v784_v20, -inf }
 0x405   :  { %v819_v59 = vsel %vm92_vm0, %v795_v49, -inf }
 0x406   :  { %811 = vmax.xlane.f32.xlu0 %v810_v30  ;;  %v813_v48 = vsel %vm92_vm0, %v787_v37, -inf }
 0x407   :  { %814 = vmax.xlane.f32.xlu1 %v813_v48 }
 0x40a   :  { %817 = vmax.xlane.f32.xlu0 %v816_v39 }
 0x40b   :  { %820 = vmax.xlane.f32.xlu1 %v819_v59 }
 0x489   :  { %v800_v53 = vpop.xlane.xlu1 %799 }
 0x48a   :  { %v822_v55 = vsub.f32 %v768_v10, %v800_v53 }
 0x48b   :  { %v803_v43 = vpop.xlane.xlu0 %802 }
 0x48c   :  { %v823_v47 = vsub.f32 %v771_v21, %v803_v43  ;;  %v830_v5 = vmul.f32 1.442695, %v822_v55 }
 0x48d   :  { %v809_v6 = vpop.xlane.xlu1 %808 }
 0x48e   :  { %v825_v17 = vsub.f32 %v779_v0, %v809_v6  ;;  %v832_v22 = vmul.f32 1.442695, %v823_v47 }
 0x48f   :  { %v806_v7 = vpop.xlane.xlu0 %805 }
 0x490   :  { %v836_v25 = vmul.f32 1.442695, %v825_v17  ;;  %v824_v40 = vsub.f32 %v776_v36, %v806_v7 }
 0x492   :  { %3517 = vpow2.f32 %v836_v25  ;;  %v834_v13 = vmul.f32 1.442695, %v824_v40 }
 0x493   :  { %3519 = vpow2.f32 %v832_v22  ;;  %v812_v28 = vpop.xlane.xlu0 %811 }
 0x494   :  { %3521 = vpow2.f32 %v834_v13  ;;  %v826_v14 = vsub.f32 %v784_v20, %v812_v28  ;;  %v815_v36 = vpop.xlane.xlu1 %814 }
 0x495   :  { %3523 = vpow2.f32 %v830_v5  ;;  %v827_v46 = vsub.f32 %v787_v37, %v815_v36 }
 0x496   :  { %v838_v63 = vmul.f32 1.442695, %v826_v14 }
 0x497   :  { %v818_v58 = vpop.xlane.xlu0 %817  ;;  %v840_v52 = vmul.f32 1.442695, %v827_v46 }
 0x498   :  { %v828_v27 = vsub.f32 %v792_v24, %v818_v58  ;;  %v821_v45 = vpop.xlane.xlu1 %820 }
 0x499   :  { %v829_v2 = vsub.f32 %v795_v49, %v821_v45 }
 0x49a   :  { %v842_v50 = vmul.f32 1.442695, %v828_v27 }
 0x49b   :  { %v844_v51 = vmul.f32 1.442695, %v829_v2  ;;  %v3731_v2 = vmov 0.0  }
 0x49c   :  { %v4406_v15 = vpop.eup %3517  ;;  %3525 = vpow2.f32 %v842_v50 }
 0x49d   :  { %v3520_v1 = vpop.eup %3519  ;;  %v855_v19 = vsel %vm92_vm0, %v4406_v15, 0.0  ;;  %3527 = vpow2.f32 %v838_v63 }
 0x49e   :  { %v4410_v35 = vpop.eup %3521  ;;  %856 = vadd.xlane.f32.xlu1 %v855_v19  ;;  %v849_v10 = vsel %vm92_vm0, %v3520_v1, 0.0  ;;  %3529 = vpow2.f32 %v844_v51 }
 0x49f   :  { %v852_v12 = vsel %vm92_vm0, %v4410_v35, 0.0  ;;  %v3524_v44 = vpop.eup %3523  ;;  %3531 = vpow2.f32 %v840_v52 }
 0x4a0   :  { %853 = vadd.xlane.f32.xlu0 %v852_v12  ;;  %v846_v61 = vsel %vm92_vm0, %v3524_v44, 0.0 }
 0x4a2   :  { %850 = vadd.xlane.f32.xlu1 %v849_v10 }
 0x4a4   :  { %847 = vadd.xlane.f32.xlu0 %v846_v61 }
 0x4a6   :  { %v4416_v34 = vpop.eup %3525 }
 0x4a7   :  { %v864_v11 = vsel %vm92_vm0, %v4416_v34, 0.0  ;;  %v4420_v0 = vpop.eup %3527 }
 0x4a8   :  { %865 = vadd.xlane.f32.xlu0 %v864_v11  ;;  %v858_v21 = vsel %vm92_vm0, %v4420_v0, 0.0  ;;  %v3530_v33 = vpop.eup %3529 }
 0x4a9   :  { %v867_v8 = vsel %vm92_vm0, %v3530_v33, 0.0  ;;  %v3532_v18 = vpop.eup %3531 }
 0x4aa   :  { %v861_v20 = vsel %vm92_vm0, %v3532_v18, 0.0 }
 0x4ac   :  { %859 = vadd.xlane.f32.xlu0 %v858_v21 }
 0x4b3   :  { %3303 = vrot.lane.b32.xlu1 %v5257_v38, %s3728_s29 }
 0x4c2   :  { %3298 = vrot.lane.b32.xlu0 %v5257_v38, %s3727_s28 }
 0x4d7   :  { %868 = vadd.xlane.f32.xlu1 %v867_v8 }
 0x4db   :  { %862 = vadd.xlane.f32.xlu1 %v861_v20 }
 0x4ec   :  { %3308 = vrot.lane.b32.xlu1 %v5257_v38, %s3729_s30 }
 0x52b   :  { %v857_v4 = vpop.xlane.xlu1 %856 }
 0x52d   :  { %v854_v23 = vpop.xlane.xlu0 %853 }
 0x52f   :  { %v851_v31 = vpop.xlane.xlu1 %850 }
 0x530   :  { %3533 = vrcp.f32 %v851_v31 }
 0x531   :  { %v848_v37 = vpop.xlane.xlu0 %847 }
 0x532   :  { %3535 = vrcp.f32 %v848_v37 }
 0x533   :  { %v3304_v48 = vpop.permute.xlu1 %3303  ;;  %3537 = vrcp.f32 %v854_v23 }
 0x534   :  { %v3306_v47 = vunpack.i.h.bf16 %v3304_v48  ;;  %v3305_v6 = vunpack.i.l.bf16 %v3304_v48  ;;  %3539 = vrcp.f32 %v857_v4 }
 0x535   :  { %v866_v30 = vpop.xlane.xlu0 %865 }
 0x536   :  { %v892_v25 = vpack.c.bf16 %v3306_v47, %v3305_v6 }
 0x539   :  { %v860_v24 = vpop.xlane.xlu0 %859 }
 0x53a   :  { %v3534_v49 = vpop.eup %3533  ;;  %3541 = vrcp.f32 %v860_v24 }
 0x53b   :  { %v879_v43 = vmul.f32 %v3534_v49, %v3520_v1 }
 0x53c   :  { %v3536_v39 = vpop.eup %3535 }
 0x53d   :  { %v3299_v59 = vpop.permute.xlu0 %3298  ;;  %v878_v53 = vmul.f32 %v3536_v39, %v3524_v44  ;;  %v3538_v13 = vpop.eup %3537 }
 0x53e   :  { %v3301_v55 = vunpack.i.h.bf16 %v3299_v59  ;;  %v3300_v17 = vunpack.i.l.bf16 %v3299_v59  ;;  %v3540_v27 = vpop.eup %3539  ;;  %v880_v63 = vmul.f32 %v3538_v13, %v4410_v35 }
 0x53f   :  { %v886_v22 = vpack.c.bf16 %v879_v43, %v878_v53  ;;  %v881_v19 = vmul.f32 %v3540_v27, %v4406_v15  ;;  %v3409_v15 = vld [vmem:[%s5192_s5] sm:$0xff]  }
 0x540   :  { %v891_v7 = vpack.c.bf16 %v3301_v55, %v3300_v17 }
 0x541   :  { %3158 = vmatprep.mubr.msk.bf16.mxu0 %vm92_vm0, %v886_v22  ;;  %v887_v44 = vpack.c.bf16 %v881_v19, %v880_v63  ;;  %v3630_v63 = vld [vmem:[#allocation2 + $0x8] sm:$0xff] }
 0x542   :  { %3152 = vmatprep.subr.bf16.mxu0 %v891_v7 }
 0x543   :  { %3153 = vmatpush3.bf16.msra.mxu0 %v891_v7 }
 0x544   :  { %3154 = vmatprep.subr.bf16.mxu0 %v892_v25  ;;  %v3542_v1 = vpop.eup %3541 }
 0x545   :  { %v882_v61 = vmul.f32 %v3542_v1, %v4420_v0  ;;  %v3410_v0 = vld [vmem:[%s5192_s5 + $0x8] sm:$0xff]  }
 0x547   :  { %3155 = vmatpush3.bf16.msra.mxu0 %v892_v25 }
 0x564   :  { %v869_v40 = vpop.xlane.xlu1 %868 }
 0x568   :  { %v863_v5 = vpop.xlane.xlu1 %862 }
 0x569   :  { %3543 = vrcp.f32 %v863_v5 }
 0x56a   :  { %3545 = vrcp.f32 %v869_v40 }
 0x56b   :  { %3547 = vrcp.f32 %v866_v30 }
 0x56c   :  { %v3309_v28 = vpop.permute.xlu1 %3308 }
 0x56d   :  { %v3311_v14 = vunpack.i.h.bf16 %v3309_v28  ;;  %v3310_v58 = vunpack.i.l.bf16 %v3309_v28  ;;  %v3629_v28 = vld [vmem:[#allocation2] sm:$0xff] }
 0x56f   :  { %v893_v50 = vpack.c.bf16 %v3311_v14, %v3310_v58 }
 0x571   :  { %3156 = vmatprep.subr.bf16.mxu0 %v893_v50 }
 0x572   :  { %3157 = vmatpush3.bf16.msra.mxu0 %v893_v50 }
 0x573   :  { %v3544_v12 = vpop.eup %3543  ;;  %3166 = vmatprep.subr.bf16.mxu0 %v3731_v2 }
 0x574   :  { %v3546_v10 = vpop.eup %3545  ;;  %v883_v11 = vmul.f32 %v3544_v12, %v3532_v18 }
 0x575   :  { %3159 = vmatmul.mubr.msk.bf16.vlgmr.msra.gmra.mrb[4].mxu0 %vm92_vm0, %v887_v44  ;;  %v3548_v21 = vpop.eup %3547  ;;  %v885_v36 = vmul.f32 %v3546_v10, %v3530_v33  ;;  %v3412_v33 = vld [vmem:[%s5192_s5 + $0x18] sm:$0xff]  }
 0x576   :  { %v888_v38 = vpack.c.bf16 %v883_v11, %v882_v61  ;;  %v884_v35 = vmul.f32 %v3548_v21, %v4416_v34  ;;  %3167 = vmatpush3.bf16.msra.mxu0 %v3409_v15  ;;  %v3411_v34 = vld [vmem:[%s5192_s5 + $0x10] sm:$0xff]   ;;  %v3418_v11 = vld [vmem:[%s5193_s6 + $0xc] ss:$16 sps:$4 sm:$0xff]   ;;  %v3422_v15 = vld [vmem:[%s5193_s6 + $0x28] ss:$16 sps:$4 sm:$0xff]  }
 0x577   :  { %3168 = vmatprep.subr.bf16.mxu0 %v3731_v2  ;;  %v3415_v61 = vld [vmem:[%s5193_s6 + $0x4] ss:$16 sps:$4 sm:$0xff]   ;;  %v3413_v21 = vld [vmem:[%s5193_s6] ss:$16 sps:$4 sm:$0xff]  }
 0x578   :  { %3162 = vmatprep.mubr.msk.bf16.mxu0 %vm92_vm0, %v888_v38  ;;  %v889_v45 = vpack.c.bf16 %v885_v36, %v884_v35  ;;  %v3416_v38 = vld [vmem:[%s5193_s6 + $0x8] ss:$16 sps:$4 sm:$0xff]   ;;  %1198 = vmatprep.subr.bf16.mxu1 %v3415_v61  ;;  %v3421_v36 = vld [vmem:[%s5193_s6 + $0x24] ss:$16 sps:$4 sm:$0xff]   ;;  %v3424_v35 = vld [vmem:[%s5193_s6 + $0x2c] ss:$16 sps:$4 sm:$0xff]  }
 0x579   :  { %1199 = vmatpush1.bf16.msra.mxu1 %v3413_v21 }
 0x57a   :  { %3169 = vmatpush3.bf16.msra.mxu0 %v3410_v0  ;;  %1200 = vmatprep.subr.bf16.mxu1 %v3421_v36  ;;  %v3427_v0 = vld [vmem:[%s5193_s6 + $0x44] ss:$16 sps:$4 sm:$0xff]  }
 0x57b   :  { %3170 = vmatprep.subr.bf16.mxu0 %v3731_v2 }
 0x57d   :  { %3163 = vmatmul.mubr.msk.bf16.gmra.mrb[8].mxu0 %vm92_vm0, %v889_v45  ;;  %v3419_v45 = vld [vmem:[%s5193_s6 + $0x20] ss:$16 sps:$4 sm:$0xff]  }
 0x57e   :  { %3171 = vmatpush3.bf16.msra.mxu0 %v3411_v34  ;;  %3174 = vmatprep.mubr.msk.bf16.mxu0 %vm3732_vm3, %v3731_v2  ;;  %v3430_v34 = vld [vmem:[%s5193_s6 + $0x4c] ss:$16 sps:$4 sm:$0xff]  }
 0x57f   :  { %3172 = vmatprep.subr.bf16.mxu0 %v3731_v2  ;;  %1201 = vmatpush1.bf16.msra.mxu1 %v3419_v45 }
 0x580   :  { %1202 = vmatprep.subr.bf16.mxu1 %v3427_v0 }
 0x582   :  { %3173 = vmatpush3.bf16.msra.mxu0 %v3412_v33  ;;  %v3436_v33 = vld [vmem:[%s5193_s6 + $0x6c] ss:$16 sps:$4 sm:$0xff]  }
 0x583   :  { %1241 = vmatprep.subr.bf16.mxu0 %v3418_v11 }
 0x648   :  { %v3160_v46 = vpop.f32.mrb[4].mxu0 }
 0x649   :  { %v940_v51 = vpop.f32.mrb[5].mxu0 }
 0x64a   :  { %v3161_v52 = vpop.f32.mrb[6].mxu0 }
 0x64b   :  { %v3312_v8 = vpack.i.bf16 %v3161_v52, %v3160_v46  ;;  %v943_v18 = vpop.f32.mrb[7].mxu0  ;;  %v3425_v46 = vld [vmem:[%s5193_s6 + $0x40] ss:$16 sps:$4 sm:$0xff]   ;;  %v3433_v52 = vld [vmem:[%s5193_s6 + $0x64] ss:$16 sps:$4 sm:$0xff]  }
 0x64c   :  { %1203 = vmatpush1.bf16.msra.mxu1 %v3425_v46 }
 0x64d   :  { %3313 = vrot.lane.b32.xlu0 %v3312_v8, %s3726_s24  ;;  %v3431_v8 = vld [vmem:[%s5193_s6 + $0x60] ss:$16 sps:$4 sm:$0xff]   ;;  %1204 = vmatprep.subr.bf16.mxu1 %v3433_v52 }
 0x650   :  { %v3164_v20 = vpop.f32.mrb[8].mxu0  ;;  %1205 = vmatpush1.bf16.msra.mxu1 %v3431_v8 }
 0x651   :  { %v956_v4 = vpop.f32.mrb[9].mxu0 }
 0x652   :  { %v3165_v23 = vpop.f32.mrb[10].mxu0 }
 0x653   :  { %v3322_v31 = vpack.i.bf16 %v3165_v23, %v3164_v20  ;;  %v959_v37 = vpop.f32.mrb[11].mxu0 }
 0x654   :  { %v3317_v30 = vpack.i.bf16 %v959_v37, %v956_v4 }
 0x655   :  { %3323 = vrot.lane.b32.xlu0 %v3322_v31, %s3725_s23 }
 0x656   :  { %3318 = vrot.lane.b32.xlu1 %v3317_v30, %s3724_s18 }
 0x6bf   :  { %v3314_v24 = vpop.permute.xlu0 %3313 }
 0x6c0   :  { %v3316_v49 = vunpack.i.h.bf16 %v3314_v24  ;;  %v3315_v48 = vunpack.i.l.bf16 %v3314_v24 }
 0x6c2   :  { %v995_v47 = vsel %vm708_vm2, %v940_v51, %v3315_v48  ;;  %v996_v6 = vsel %vm708_vm2, %v943_v18, %v3316_v49  ;;  %v3428_v51 = vld [vmem:[%s5193_s6 + $0x48] ss:$16 sps:$4 sm:$0xff]  }
 0x6c3   :  { %v3434_v18 = vld [vmem:[%s5193_s6 + $0x68] ss:$16 sps:$4 sm:$0xff]  }
 0x6c7   :  { %v3324_v39 = vpop.permute.xlu0 %3323 }
 0x6c8   :  { %v3319_v59 = vpop.permute.xlu1 %3318  ;;  %v3326_v55 = vunpack.i.h.bf16 %v3324_v39  ;;  %v3325_v17 = vunpack.i.l.bf16 %v3324_v39 }
 0x6c9   :  { %v3321_v53 = vunpack.i.h.bf16 %v3319_v59  ;;  %v3320_v43 = vunpack.i.l.bf16 %v3319_v59 }
 0x6cb   :  { %v999_v22 = vsel %vm997_vm4, %v996_v6, %v3321_v53  ;;  %v998_v7 = vsel %vm997_vm4, %v995_v47, %v3320_v43  ;;  %v3437_v53 = vld [vmem:[%s5194_s7 + $0x40] sm:$0xff]   ;;  %v3439_v47 = vld [vmem:[%s5194_s7 + $0x48] sm:$0xff]  }
 0x6cc   :  { %v1002_v25 = vsel %vm1000_vm5, %v999_v22, %v3326_v55  ;;  %v1001_v40 = vsel %vm1000_vm5, %v998_v7, %v3325_v17  ;;  %v3438_v43 = vld [vmem:[%s5194_s7] sm:$0xff]   ;;  %3064 = vmatprep.subr.bf16.mxu1 %v3437_v53  ;;  %v3440_v6 = vld [vmem:[%s5194_s7 + $0x8] sm:$0xff]   ;;  %v3441_v55 = vld [vmem:[%s5194_s7 + $0x50] sm:$0xff]  }
 0x6cd   :  { %v1011_v5 = vpack.c.bf16 %v1002_v25, %v1001_v40  ;;  %v3442_v17 = vld [vmem:[%s5194_s7 + $0x10] sm:$0xff]   ;;  %v3443_v22 = vld [vmem:[%s5194_s7 + $0x58] sm:$0xff]   ;;  %v3445_v25 = vld [vmem:[%s5194_s7 + $0x60] sm:$0xff]  }
 0x6ce   :  { %v3444_v7 = vld [vmem:[%s5194_s7 + $0x18] sm:$0xff]   ;;  %v3446_v40 = vld [vmem:[%s5194_s7 + $0x20] sm:$0xff]  }
 0x6cf   :  { %3175 = vmatmul.mubr.msk.bf16.vlgmr.msra.gmra.mrb[12].mxu0 %vm92_vm0, %v1011_v5  ;;  %v3447_v5 = vld [vmem:[%s5194_s7 + $0x68] sm:$0xff]  }
 0x6d0   :  { %1273 = vmatprep.mubr.bf16.mxu0 %v5256_v16  ;;  %1242 = vmatpush1.bf16.msra.mxu0 %v3416_v38 }
 0x6d1   :  { %1243 = vmatprep.subr.bf16.mxu0 %v3424_v35 }
 0x6d4   :  { %1244 = vmatpush1.bf16.msra.mxu0 %v3422_v15 }
 0x6d5   :  { %1245 = vmatprep.subr.bf16.mxu0 %v3430_v34 }
 0x6d8   :  { %1246 = vmatpush1.bf16.msra.mxu0 %v3428_v51 }
 0x6d9   :  { %1247 = vmatprep.subr.bf16.mxu0 %v3436_v33 }
 0x6dc   :  { %1248 = vmatpush1.bf16.msra.mxu0 %v3434_v18 }
 0x7a2   :  { %v1073_v13 = vpop.f32.mrb[12].mxu0 }
 0x7a3   :  { %v4469_v14 = vadd.f32 %v3629_v28, %v1073_v13  ;;  %v3176_v58 = vpop.f32.mrb[13].mxu0  ;;  %v3448_v13 = vld [vmem:[%s5194_s7 + $0x28] sm:$0xff]   ;;  %v3449_v28 = vld [vmem:[%s5194_s7 + $0x70] sm:$0xff]  }
 0x7a4   :  { %v1076_v27 = vpop.f32.mrb[14].mxu0  ;;  %v3450_v58 = vld [vmem:[%s5194_s7 + $0x30] sm:$0xff]  }
 0x7a5   :  { %v4471_v50 = vadd.f32 %v3630_v63, %v1076_v27  ;;  %v3177_v1 = vpop.f32.mrb[15].mxu0  ;;  %v1082_v19 = vmul.f32 %v4469_v14, %v4469_v14  ;;  %v3451_v27 = vld [vmem:[%s5194_s7 + $0x78] sm:$0xff]  }
 0x7a6   :  { %v3452_v63 = vld [vmem:[%s5194_s7 + $0x38] sm:$0xff]  }
 0x7a7   :  { %v1084_v12 = vsel %vm92_vm0, %v1082_v19, 0.0  ;;  %v1083_v44 = vmul.f32 %v4471_v50, %v4471_v50 }
 0x7a8   :  { %1085 = vadd.xlane.f32.xlu1 %v1084_v12 }
 0x7a9   :  { %v1087_v10 = vsel %vm92_vm0, %v1083_v44, 0.0 }
 0x7aa   :  { %1088 = vadd.xlane.f32.xlu0 %v1087_v10 }
 0x835   :  { %v1086_v20 = vpop.xlane.xlu1 %1085 }
 0x836   :  { %v1090_v4 = vmul.f32 0.015625, %v1086_v20 }
 0x837   :  { %v1089_v23 = vpop.xlane.xlu0 %1088 }
 0x838   :  { %v1092_v31 = vadd.f32 1e-05, %v1090_v4  ;;  %v1091_v37 = vmul.f32 0.015625, %v1089_v23 }
 0x83a   :  { %3549 = vrsqrt.f32 %v1092_v31  ;;  %v1093_v30 = vadd.f32 1e-05, %v1091_v37 }
 0x83c   :  { %3551 = vrsqrt.f32 %v1093_v30 }
 0x844   :  { %v3550_v24 = vpop.eup %3549 }
 0x845   :  { %v1096_v48 = vmul.f32 %v3550_v24, %v4469_v14 }
 0x846   :  { %v3552_v49 = vpop.eup %3551 }
 0x847   :  { %v1097_v39 = vmul.f32 %v3552_v49, %v4471_v50 }
 0x849   :  { %v1114_v59 = vpack.c.bf16 %v1097_v39, %v1096_v48 }
 0x84b   :  { %2900 = vmatmul.mubr.msk.bf16.vlgmr.msra.gmra.mrb[8].mxu1 %vm92_vm0, %v1114_v59  ;;  %2901 = vmatmul.mubr.msk.bf16.vlgmr.msra.gmra.mrb[16].mxu0 %vm92_vm0, %v1114_v59 }
 0x84c   :  { %1586 = vmatprep.mubr.bf16.mxu0 %v5256_v16  ;;  %3065 = vmatpush3.bf16.msra.mxu1 %v3438_v43 }
 0x84d   :  { %3066 = vmatprep.subr.bf16.mxu1 %v3439_v47 }
 0x850   :  { %3067 = vmatpush3.bf16.msra.mxu1 %v3440_v6 }
 0x851   :  { %3068 = vmatprep.subr.bf16.mxu1 %v3441_v55 }
 0x854   :  { %3069 = vmatpush3.bf16.msra.mxu1 %v3442_v17 }
 0x855   :  { %3070 = vmatprep.subr.bf16.mxu1 %v3443_v22 }
 0x858   :  { %3071 = vmatpush3.bf16.msra.mxu1 %v3444_v7 }
 0x859   :  { %3072 = vmatprep.subr.bf16.mxu1 %v3445_v25 }
 0x85c   :  { %3073 = vmatpush3.bf16.msra.mxu1 %v3446_v40 }
 0x85d   :  { %3074 = vmatprep.subr.bf16.mxu1 %v3447_v5 }
 0x860   :  { %3075 = vmatpush3.bf16.msra.mxu1 %v3448_v13 }
 0x861   :  { %3076 = vmatprep.subr.bf16.mxu1 %v3449_v28 }
 0x864   :  { %3077 = vmatpush3.bf16.msra.mxu1 %v3450_v58 }
 0x865   :  { %3078 = vmatprep.subr.bf16.mxu1 %v3451_v27 }
 0x868   :  { %3079 = vmatpush3.bf16.msra.mxu1 %v3452_v63 }
 0x91e   :  { %v1232_v1 = vpop.f32.mrb[8].mxu1  ;;  %v1275_v19 = vpop.f32.mrb[16].mxu0 }
 0x91f   :  { %v1284_v12 = vsub.f32 0.0, %v1232_v1  ;;  %v1234_v44 = vpop.f32.mrb[9].mxu1  ;;  %v1277_v10 = vpop.f32.mrb[17].mxu0 }
 0x920   :  { %v1285_v61 = vsub.f32 0.0, %v1234_v44  ;;  %v1236_v11 = vpop.f32.mrb[10].mxu1  ;;  %v1279_v21 = vpop.f32.mrb[18].mxu0 }
 0x921   :  { %v1288_v38 = vmul.f32 1.442695, %v1284_v12  ;;  %v1286_v36 = vsub.f32 0.0, %v1236_v11  ;;  %v1238_v35 = vpop.f32.mrb[11].mxu1  ;;  %v1281_v45 = vpop.f32.mrb[19].mxu0 }
 0x922   :  { %v1290_v15 = vmul.f32 1.442695, %v1285_v61  ;;  %v1287_v0 = vsub.f32 0.0, %v1238_v35  ;;  %v3458_v12 = vld [vmem:[%s5191_s4 + $0x54] ss:$8 sps:$4 sm:$0xff]  }
 0x923   :  { %3553 = vpow2.f32 %v1288_v38  ;;  %v1292_v34 = vmul.f32 1.442695, %v1286_v36  ;;  %v3459_v61 = vld [vmem:[%s5191_s4 + $0x60] ss:$8 sps:$4 sm:$0xff]  }
 0x924   :  { %3555 = vpow2.f32 %v1290_v15  ;;  %v1294_v46 = vmul.f32 1.442695, %v1287_v0 }
 0x925   :  { %3557 = vpow2.f32 %v1292_v34 }
 0x926   :  { %3559 = vpow2.f32 %v1294_v46 }
 0x92d   :  { %v3554_v51 = vpop.eup %3553 }
 0x92e   :  { %v3556_v52 = vpop.eup %3555  ;;  %v1296_v33 = vadd.f32 1.0, %v3554_v51 }
 0x92f   :  { %v3558_v8 = vpop.eup %3557  ;;  %v1297_v18 = vadd.f32 1.0, %v3556_v52 }
 0x930   :  { %v3560_v20 = vpop.eup %3559  ;;  %3561 = vrcp.f32 %v1296_v33  ;;  %v1298_v4 = vadd.f32 1.0, %v3558_v8 }
 0x931   :  { %3563 = vrcp.f32 %v1297_v18  ;;  %v1299_v23 = vadd.f32 1.0, %v3560_v20 }
 0x932   :  { %3565 = vrcp.f32 %v1298_v4 }
 0x933   :  { %3567 = vrcp.f32 %v1299_v23 }
 0x93a   :  { %v3562_v31 = vpop.eup %3561 }
 0x93b   :  { %v3564_v37 = vpop.eup %3563  ;;  %v1304_v30 = vmul.f32 %v3562_v31, %v1232_v1 }
 0x93c   :  { %v3566_v24 = vpop.eup %3565  ;;  %v1305_v49 = vmul.f32 %v3564_v37, %v1234_v44  ;;  %v3456_v44 = vld [vmem:[%s5191_s4 + $0x50] ss:$8 sps:$4 sm:$0xff]  }
 0x93d   :  { %v3568_v48 = vpop.eup %3567  ;;  %v1308_v39 = vmul.f32 %v1304_v30, %v1275_v19  ;;  %v1306_v59 = vmul.f32 %v3566_v24, %v1236_v11  ;;  %v3464_v11 = vld [vmem:[%s5191_s4 + $0x74] ss:$8 sps:$4 sm:$0xff]   ;;  %v5258_v30 = vld [vmem:[#allocation16_spill] sm:$0xff] }
 0x93e   :  { %v1309_v53 = vmul.f32 %v1305_v49, %v1277_v10  ;;  %v1307_v43 = vmul.f32 %v3568_v48, %v1238_v35  ;;  %v3461_v10 = vld [vmem:[%s5191_s4 + $0x64] ss:$8 sps:$4 sm:$0xff]   ;;  %v5259_v48 = vld [vmem:[#allocation14_spill] sm:$0xff] }
 0x93f   :  { %v1310_v47 = vmul.f32 %v1306_v59, %v1279_v21  ;;  %v3462_v21 = vld [vmem:[%s5191_s4 + $0x70] ss:$8 sps:$4 sm:$0xff]  }
 0x940   :  { %v1311_v6 = vmul.f32 %v1307_v43, %v1281_v45  ;;  %v5260_v43 = vld [vmem:[#allocation17_spill] sm:$0xff] }
 0x941   :  { %v1344_v55 = vpack.c.bf16 %v1310_v47, %v1308_v39 }
 0x942   :  { %v1345_v17 = vpack.c.bf16 %v1311_v6, %v1309_v53  ;;  %v5261_v6 = vld [vmem:[#allocation15_spill] sm:$0xff] }
 0x944   :  { %1474 = vmatprep.mubr.bf16.mxu1 %v1345_v17 }
 0x945   :  { %1475 = vmatmul.mubr.bf16.vlgmr.msra.gmra.mrb[12].mxu1 %v1344_v55 }
 0xa18   :  { %v3080_v22 = vpop.f32.mrb[12].mxu1 }
 0xa19   :  { %v3081_v7 = vpop.f32.mrb[13].mxu1 }
 0xa1a   :  { %v3082_v25 = vadd.f32 %v3081_v7, %v3080_v22  ;;  %v3083_v40 = vpop.f32.mrb[14].mxu1  ;;  %v5262_v7 = vld [vmem:[#allocation18_spill] sm:$0xff] }
 0xa1b   :  { %v3084_v5 = vpop.f32.mrb[15].mxu1 }
 0xa1c   :  { %v4581_v13 = vadd.f32 %v3082_v25, %v4469_v14  ;;  %v3085_v28 = vadd.f32 %v3084_v5, %v3083_v40  ;;  %v3455_v14 = vld [vmem:[%s5191_s4 + $0x44] ss:$8 sps:$4 sm:$0xff]   ;;  %v5263_v40 = vld [vmem:[#allocation19_spill] sm:$0xff] }
 0xa1d   :  { %1554 = vmatprep.subr.bf16.mxu0 %v3455_v14 }
 0xa1e   :  { %v4584_v58 = vadd.f32 %v3085_v28, %v4471_v50  ;;  %v1485_v27 = vmul.f32 %v4581_v13, %v4581_v13  ;;  %v3453_v50 = vld [vmem:[%s5191_s4 + $0x40] ss:$8 sps:$4 sm:$0xff]  }
 0xa1f   :  { %1555 = vmatpush1.bf16.msra.mxu0 %v3453_v50 }
 0xa20   :  { %v1487_v63 = vsel %vm92_vm0, %v1485_v27, 0.0  ;;  %v1486_v1 = vmul.f32 %v4584_v58, %v4584_v58  ;;  %1556 = vmatprep.subr.bf16.mxu0 %v3458_v12 }
 0xa21   :  { %1488 = vadd.xlane.f32.xlu0 %v1487_v63  ;;  %v5264_v63 = vld [vmem:[#allocation20_spill] sm:$0xff] }
 0xa22   :  { %v1490_v19 = vsel %vm92_vm0, %v1486_v1, 0.0 }
 0xa23   :  { %1491 = vadd.xlane.f32.xlu1 %v1490_v19  ;;  %1557 = vmatpush1.bf16.msra.mxu0 %v3456_v44  ;;  %v5265_v19 = vld [vmem:[#allocation24_spill] sm:$0xff]  ;;  %v5266_v44 = vld [vmem:[#allocation26_spill] sm:$0xff] }
 0xa24   :  { %1558 = vmatprep.subr.bf16.mxu0 %v3461_v10 }
 0xa27   :  { %1559 = vmatpush1.bf16.msra.mxu0 %v3459_v61  ;;  %v5267_v61 = vld [vmem:[#allocation21_spill] sm:$0xff] }
 0xa28   :  { %1560 = vmatprep.subr.bf16.mxu0 %v3464_v11 }
 0xa2b   :  { %1561 = vmatpush1.bf16.msra.mxu0 %v3462_v21 }
 0xaae   :  { %v1489_v38 = vpop.xlane.xlu0 %1488 }
 0xaaf   :  { %v1493_v36 = vmul.f32 0.015625, %v1489_v38 }
 0xab0   :  { %v1492_v35 = vpop.xlane.xlu1 %1491 }
 0xab1   :  { %v1495_v45 = vadd.f32 1e-05, %v1493_v36  ;;  %v1494_v15 = vmul.f32 0.015625, %v1492_v35  ;;  %v5268_v36 = vld [vmem:[#allocation22_spill] sm:$0xff] }
 0xab3   :  { %3569 = vrsqrt.f32 %v1495_v45  ;;  %v1496_v0 = vadd.f32 1e-05, %v1494_v15  ;;  %v5269_v45 = vld [vmem:[#allocation28_spill] sm:$0xff] }
 0xab5   :  { %3571 = vrsqrt.f32 %v1496_v0  ;;  %v5270_v0 = vld [vmem:[#allocation23_spill] sm:$0xff] }
 0xabd   :  { %v3570_v34 = vpop.eup %3569 }
 0xabe   :  { %v1499_v51 = vmul.f32 %v3570_v34, %v4581_v13 }
 0xabf   :  { %v3572_v46 = vpop.eup %3571 }
 0xac0   :  { %v1500_v52 = vmul.f32 %v3572_v46, %v4584_v58  ;;  %v5271_v46 = vld [vmem:[#allocation29_spill] sm:$0xff] }
 0xac2   :  { %v1510_v33 = vpack.c.bf16 %v1500_v52, %v1499_v51 }
 0xac4   :  { %2934 = vmatmul.mubr.msk.bf16.vlgmr.msra.gmra.mrb[20].mxu0 %vm92_vm0, %v1510_v33 }
 0xb97   :  { %v4619_v8 = vpop.f32.mrb[20].mxu0 }
 0xb98   :  { %1617 = vrot.lane.b32.xlu0 %v4619_v8, %s3723_s17  ;;  %v1590_v18 = vpop.f32.mrb[21].mxu0  ;;  %v1789_v10 = vmul.f32 %v4619_v8, %v5266_v44 }
 0xb99   :  { %v4623_v20 = vpop.f32.mrb[22].mxu0 }
 0xb9a   :  { %1619 = vrot.lane.b32.xlu1 %v4623_v20, %s3723_s17  ;;  %v1594_v4 = vpop.f32.mrb[23].mxu0  ;;  %v1790_v11 = vmul.f32 %v4623_v20, %v5267_v61  ;;  %v3633_v61 = vld [vmem:[%s5189_s2 + $0x58] sm:$0xff] }
 0xb9b   :  { %v4627_v23 = vpack.i.bf16 %v1594_v4, %v1590_v18  ;;  %v2154_v31 = vpack.c.bf16 %v1594_v4, %v1590_v18  ;;  %v5272_v18 = vld [vmem:[#allocation25_spill] sm:$0xff] }
 0xb9c   :  { %1625 = vrot.lane.b32.xlu0 %v4623_v20, %s3725_s23 }
 0xb9d   :  { %3194 = vmatprep.subr.bf16.mxu1 %v2154_v31 }
 0xb9e   :  { %1623 = vrot.lane.b32.xlu1 %v4619_v8, %s3725_s23  ;;  %3195 = vmatpush3.bf16.msra.mxu1 %v2154_v31  ;;  %v5273_v31 = vld [vmem:[#allocation30_spill] sm:$0xff] }
 0xba0   :  { %1631 = vrot.lane.b32.xlu0 %v4623_v20, %s3724_s18 }
 0xba2   :  { %1629 = vrot.lane.b32.xlu1 %v4619_v8, %s3724_s18 }
 0xba4   :  { %1637 = vrot.lane.b32.xlu0 %v4623_v20, %s3726_s24 }
 0xba6   :  { %1635 = vrot.lane.b32.xlu1 %v4619_v8, %s3726_s24 }
 0xba8   :  { %1601 = vrot.lane.b32.xlu0 %v4623_v20, %s3727_s28 }
 0xbaa   :  { %1599 = vrot.lane.b32.xlu1 %v4619_v8, %s3727_s28 }
 0xbac   :  { %1607 = vrot.lane.b32.xlu0 %v4623_v20, %s3728_s29 }
 0xbae   :  { %1605 = vrot.lane.b32.xlu1 %v4619_v8, %s3728_s29 }
 0xbb0   :  { %1613 = vrot.lane.b32.xlu0 %v4623_v20, %s3729_s30 }
 0xbb2   :  { %1611 = vrot.lane.b32.xlu1 %v4619_v8, %s3729_s30 }
 0xc0a   :  { %v4653_v37 = vpop.permute.xlu0 %1617 }
 0xc0b   :  { %v1797_v24 = vmul.f32 %v4653_v37, %v5258_v30 }
 0xc0c   :  { %v4657_v49 = vpop.permute.xlu1 %1619 }
 0xc0d   :  { %v1798_v39 = vmul.f32 %v4657_v49, %v5259_v48  ;;  %1837 = vrot.lane.b32.xlu1 %v1797_v24, %s3730_s10  ;;  %v5274_v24 = vld [vmem:[#allocation31_spill] sm:$0xff] }
 0xc0e   :  { %v4662_v59 = vpop.permute.xlu0 %1625  ;;  %v1685_v48 = vmul.f32 %v4653_v37, %v5274_v24 }
 0xc0f   :  { %1839 = vrot.lane.b32.xlu0 %v1798_v39, %s3730_s10  ;;  %v1800_v47 = vmul.f32 %v4662_v59, %v5260_v43  ;;  %v5275_v39 = vld [vmem:[#allocation27_spill] sm:$0xff] }
 0xc10   :  { %v4665_v53 = vpop.permute.xlu1 %1623  ;;  %v1686_v43 = vmul.f32 %v4657_v49, %v5275_v39 }
 0xc11   :  { %v1799_v55 = vmul.f32 %v4665_v53, %v5261_v6 }
 0xc12   :  { %v4671_v17 = vpop.permute.xlu0 %1631 }
 0xc13   :  { %1843 = vrot.lane.b32.xlu0 %v1800_v47, %s3730_s10  ;;  %1841 = vrot.lane.b32.xlu1 %v1799_v55, %s3730_s10  ;;  %v1802_v25 = vmul.f32 %v4671_v17, %v5262_v7  ;;  %v5276_v47 = vld [vmem:[#allocation32_spill] sm:$0xff]  ;;  %v5277_v55 = vld [vmem:[#allocation33_spill] sm:$0xff] }
 0xc14   :  { %v4675_v22 = vpop.permute.xlu1 %1629  ;;  %v1687_v6 = vmul.f32 %v4665_v53, %v5276_v47  ;;  %v1690_v7 = vmul.f32 %v4671_v17, %v5277_v55  ;;  %v3637_v55 = vld [vmem:[%s5189_s2 + $0x78] sm:$0xff] }
 0xc15   :  { %v1801_v5 = vmul.f32 %v4675_v22, %v5263_v40  ;;  %v3631_v40 = vld [vmem:[%s5189_s2 + $0x40] sm:$0xff] }
 0xc16   :  { %v4681_v28 = vpop.permute.xlu0 %1637 }
 0xc17   :  { %1847 = vrot.lane.b32.xlu0 %v1802_v25, %s3730_s10  ;;  %1845 = vrot.lane.b32.xlu1 %v1801_v5, %s3730_s10  ;;  %v1804_v1 = vmul.f32 %v4681_v28, %v5264_v63  ;;  %v1781_v5 = vmul.f32 %v3631_v40, %v4653_v37  ;;  %v3632_v63 = vld [vmem:[%s5189_s2 + $0x48] sm:$0xff] }
 0xc18   :  { %v4685_v27 = vpop.permute.xlu1 %1635 }
 0xc19   :  { %v1803_v14 = vmul.f32 %v4685_v27, %v5265_v19  ;;  %v1691_v47 = vmul.f32 %v4685_v27, %v4217_v29  ;;  %v3639_v29 = vld [vmem:[%s5189_s2] sm:$0xff] }
 0xc1a   :  { %v4691_v50 = vpop.permute.xlu0 %1601 }
 0xc1b   :  { %1851 = vrot.lane.b32.xlu0 %v1804_v1, %s3730_s10  ;;  %1849 = vrot.lane.b32.xlu1 %v1803_v14, %s3730_s10  ;;  %v1792_v35 = vmul.f32 %v4691_v50, %v5268_v36  ;;  %v1782_v1 = vmul.f32 %v3632_v63, %v4657_v49  ;;  %v3634_v36 = vld [vmem:[%s5189_s2 + $0x50] sm:$0xff] }
 0xc1c   :  { %v4695_v12 = vpop.permute.xlu1 %1599 }
 0xc1d   :  { %v1791_v15 = vmul.f32 %v4695_v12, %v5269_v45 }
 0xc1e   :  { %v4703_v21 = vpop.permute.xlu0 %1607 }
 0xc1f   :  { %1821 = vrot.lane.b32.xlu1 %v1789_v10, %s3730_s10  ;;  %1823 = vrot.lane.b32.xlu0 %v1790_v11, %s3730_s10  ;;  %v1794_v34 = vmul.f32 %v4703_v21, %v5270_v0  ;;  %v1784_v11 = vmul.f32 %v3633_v61, %v4662_v59 }
 0xc20   :  { %v4705_v38 = vpop.permute.xlu1 %1605 }
 0xc21   :  { %v1793_v51 = vmul.f32 %v4705_v38, %v5271_v46  ;;  %v1688_v46 = vmul.f32 %v4662_v59, %v4200_v32  ;;  %v1689_v32 = vmul.f32 %v4675_v22, %v4215_v3 }
 0xc22   :  { %v4717_v52 = vpop.permute.xlu0 %1613 }
 0xc23   :  { %1825 = vrot.lane.b32.xlu1 %v1791_v15, %s3730_s10  ;;  %1827 = vrot.lane.b32.xlu0 %v1792_v35, %s3730_s10  ;;  %v1796_v4 = vmul.f32 %v4717_v52, %v5272_v18  ;;  %v1783_v35 = vmul.f32 %v3634_v36, %v4665_v53  ;;  %v3635_v18 = vld [vmem:[%s5189_s2 + $0x68] sm:$0xff] }
 0xc24   :  { %v4719_v33 = vpop.permute.xlu1 %1611 }
 0xc25   :  { %v1795_v30 = vmul.f32 %v4719_v33, %v5273_v31  ;;  %v3636_v31 = vld [vmem:[%s5189_s2 + $0x60] sm:$0xff] }
 0xc27   :  { %1829 = vrot.lane.b32.xlu1 %v1793_v51, %s3730_s10  ;;  %1831 = vrot.lane.b32.xlu0 %v1794_v34, %s3730_s10 }
 0xc2b   :  { %1833 = vrot.lane.b32.xlu1 %v1795_v30, %s3730_s10  ;;  %1835 = vrot.lane.b32.xlu0 %v1796_v4, %s3730_s10  ;;  %v1786_v4 = vmul.f32 %v3635_v18, %v4671_v17  ;;  %v1785_v30 = vmul.f32 %v3636_v31, %v4675_v22 }
 0xc2f   :  { %1725 = vrot.lane.b32.xlu1 %v1685_v48, %s3730_s10  ;;  %1727 = vrot.lane.b32.xlu0 %v1686_v43, %s3730_s10 }
 0xc33   :  { %1729 = vrot.lane.b32.xlu0 %v1687_v6, %s3730_s10 }
 0xc37   :  { %1735 = vrot.lane.b32.xlu0 %v1690_v7, %s3730_s10  ;;  %v1788_v7 = vmul.f32 %v3637_v55, %v4681_v28 }
 0xc7f   :  { %v1838_v25 = vpop.permute.xlu1 %1837 }
 0xc80   :  { %v1877_v14 = vadd.f32 %v1838_v25, %v1781_v5  ;;  %v3638_v25 = vld [vmem:[%s5189_s2 + $0x70] sm:$0xff] }
 0xc81   :  { %v1840_v19 = vpop.permute.xlu0 %1839  ;;  %v1787_v40 = vmul.f32 %v3638_v25, %v4685_v27  ;;  %v1679_v25 = vmul.f32 %v4695_v12, %v4223_v62  ;;  %v3646_v62 = vld [vmem:[%s5189_s2 + $0x38] sm:$0xff] }
 0xc82   :  { %v1878_v44 = vadd.f32 %v1840_v19, %v1782_v1  ;;  %v1773_v19 = vmul.f32 %v3639_v29, %v4619_v8  ;;  %v1780_v29 = vmul.f32 %v3646_v62, %v4717_v52 }
 0xc84   :  { %v3327_v10 = vpack.i.bf16 %v1878_v44, %v1877_v14  ;;  %v1692_v14 = vmul.f32 %v4681_v28, %v4221_v9  ;;  %v1680_v9 = vmul.f32 %v4691_v50, %v4231_v42 }
 0xc85   :  { %v1844_v45 = vpop.permute.xlu0 %1843  ;;  %v1842_v15 = vpop.permute.xlu1 %1841 }
 0xc86   :  { %v1880_v0 = vadd.f32 %v1844_v45, %v1784_v11  ;;  %v1879_v34 = vadd.f32 %v1842_v15, %v1783_v35  ;;  %3328 = vrot.lane.b32.xlu1 %v3327_v10, %s3721_s20  ;;  %v3640_v10 = vld [vmem:[%s5189_s2 + $0x8] sm:$0xff]  ;;  %v1678_v11 = vmul.f32 %v4623_v20, %v4225_v26  ;;  %v3642_v26 = vld [vmem:[%s5189_s2 + $0x18] sm:$0xff] }
 0xc87   :  { %v1774_v61 = vmul.f32 %v3640_v10, %v4623_v20  ;;  %v1683_v10 = vmul.f32 %v4719_v33, %v4279_v56  ;;  %v3648_v56 = vld [vmem:[%s5188_s1 + $0x48] sm:$0xff] }
 0xc88   :  { %v3332_v51 = vpack.i.bf16 %v1880_v0, %v1879_v34  ;;  %v3641_v34 = vld [vmem:[%s5189_s2 + $0x10] sm:$0xff] }
 0xc89   :  { %v1848_v24 = vpop.permute.xlu0 %1847  ;;  %v1846_v48 = vpop.permute.xlu1 %1845 }
 0xc8a   :  { %v1882_v39 = vadd.f32 %v1848_v24, %v1786_v4  ;;  %v1881_v43 = vadd.f32 %v1846_v48, %v1785_v30  ;;  %1731 = vrot.lane.b32.xlu1 %v1688_v46, %s3730_s10  ;;  %3333 = vrot.lane.b32.xlu0 %v3332_v51, %s3721_s20  ;;  %v1775_v46 = vmul.f32 %v3641_v34, %v4695_v12  ;;  %v3643_v24 = vld [vmem:[%s5189_s2 + $0x20] sm:$0xff] }
 0xc8b   :  { %v1776_v51 = vmul.f32 %v3642_v26, %v4691_v50  ;;  %v1777_v48 = vmul.f32 %v3643_v24, %v4705_v38 }
 0xc8c   :  { %v3337_v6 = vpack.i.bf16 %v1882_v39, %v1881_v43  ;;  %v3644_v39 = vld [vmem:[%s5189_s2 + $0x28] sm:$0xff] }
 0xc8d   :  { %v1852_v5 = vpop.permute.xlu0 %1851  ;;  %v1850_v63 = vpop.permute.xlu1 %1849  ;;  %v1778_v43 = vmul.f32 %v3644_v39, %v4703_v21 }
 0xc8e   :  { %v1884_v1 = vadd.f32 %v1852_v5, %v1788_v7  ;;  %v1883_v3 = vadd.f32 %v1850_v63, %v1787_v40  ;;  %1733 = vrot.lane.b32.xlu1 %v1689_v32, %s3730_s10  ;;  %1737 = vrot.lane.b32.xlu0 %v1691_v47, %s3730_s10  ;;  %v1677_v32 = vmul.f32 %v4619_v8, %v4219_v41 }
 0xc8f   :  { %v1682_v40 = vmul.f32 %v4703_v21, %v4261_v60  ;;  %v1681_v60 = vmul.f32 %v4705_v38, %v4273_v54 }
 0xc90   :  { %v3347_v44 = vpack.i.bf16 %v1884_v1, %v1883_v3  ;;  %v3645_v1 = vld [vmem:[%s5189_s2 + $0x30] sm:$0xff] }
 0xc91   :  { %v1822_v36 = vpop.permute.xlu1 %1821  ;;  %v1824_v35 = vpop.permute.xlu0 %1823  ;;  %v1779_v3 = vmul.f32 %v3645_v1, %v4719_v33  ;;  %v3652_v1 = vld [vmem:[%s5188_s1 + $0x60] sm:$0xff] }
 0xc92   :  { %v1869_v45 = vadd.f32 %v1822_v36, %v1773_v19  ;;  %v1870_v15 = vadd.f32 %v1824_v35, %v1774_v61  ;;  %1739 = vrot.lane.b32.xlu1 %v1692_v14, %s3730_s10  ;;  %1711 = vrot.lane.b32.xlu0 %v1678_v11, %s3730_s10  ;;  %v1684_v19 = vmul.f32 %v4717_v52, %v4281_v57  ;;  %v3647_v57 = vld [vmem:[%s5188_s1 + $0x40] sm:$0xff] }
 0xc93   :  { %v1669_v35 = vmul.f32 %v3647_v57, %v4653_v37 }
 0xc94   :  { %v3342_v0 = vpack.i.bf16 %v1870_v15, %v1869_v45  ;;  %v1670_v45 = vmul.f32 %v3648_v56, %v4657_v49  ;;  %v3650_v49 = vld [vmem:[%s5188_s1 + $0x58] sm:$0xff] }
 0xc95   :  { %v1826_v18 = vpop.permute.xlu1 %1825  ;;  %v1828_v4 = vpop.permute.xlu0 %1827 }
 0xc96   :  { %v1871_v31 = vadd.f32 %v1826_v18, %v1775_v46  ;;  %v1872_v30 = vadd.f32 %v1828_v4, %v1776_v51  ;;  %3338 = vrot.lane.b32.xlu1 %v3337_v6, %s3721_s20  ;;  %1715 = vrot.lane.b32.xlu0 %v1680_v9, %s3730_s10  ;;  %v3649_v51 = vld [vmem:[%s5188_s1 + $0x50] sm:$0xff] }
 0xc97   :  { %v1671_v18 = vmul.f32 %v3649_v51, %v4665_v53  ;;  %v3655_v51 = vld [vmem:[%s5188_s1 + $0x8] sm:$0xff] }
 0xc98   :  { %v3352_v42 = vpack.i.bf16 %v1872_v30, %v1871_v31  ;;  %v1672_v31 = vmul.f32 %v3650_v49, %v4662_v59  ;;  %v3657_v49 = vld [vmem:[%s5188_s1] sm:$0xff] }
 0xc99   :  { %v1830_v47 = vpop.permute.xlu1 %1829  ;;  %v1832_v6 = vpop.permute.xlu0 %1831 }
 0xc9a   :  { %v1873_v55 = vadd.f32 %v1830_v47, %v1777_v48  ;;  %v1874_v7 = vadd.f32 %v1832_v6, %v1778_v43  ;;  %1709 = vrot.lane.b32.xlu1 %v1677_v32, %s3730_s10  ;;  %3348 = vrot.lane.b32.xlu0 %v3347_v44, %s3721_s20 }
 0xc9c   :  { %v3357_v5 = vpack.i.bf16 %v1874_v7, %v1873_v55 }
 0xc9d   :  { %v1834_v41 = vpop.permute.xlu1 %1833  ;;  %v1836_v63 = vpop.permute.xlu0 %1835 }
 0xc9e   :  { %1713 = vrot.lane.b32.xlu1 %v1679_v25, %s3730_s10  ;;  %1719 = vrot.lane.b32.xlu0 %v1682_v40, %s3730_s10  ;;  %v1875_v14 = vadd.f32 %v1834_v41, %v1779_v3  ;;  %v1876_v44 = vadd.f32 %v1836_v63, %v1780_v29  ;;  %v3651_v41 = vld [vmem:[%s5188_s1 + $0x68] sm:$0xff]  ;;  %v1673_v3 = vmul.f32 %v3652_v1, %v4675_v22 }
 0xc9f   :  { %v1674_v63 = vmul.f32 %v3651_v41, %v4671_v17  ;;  %v3654_v17 = vld [vmem:[%s5188_s1 + $0x78] sm:$0xff] }
 0xca0   :  { %v3362_v61 = vpack.i.bf16 %v1876_v44, %v1875_v14 }
 0xca1   :  { %v1728_v54 = vpop.permute.xlu0 %1727  ;;  %v1726_v36 = vpop.permute.xlu1 %1725 }
 0xca2   :  { %3343 = vrot.lane.b32.xlu1 %v3342_v0, %s3721_s20  ;;  %3353 = vrot.lane.b32.xlu0 %v3352_v42, %s3721_s20  ;;  %v1765_v0 = vsub.f32 %v1669_v35, %v1726_v36  ;;  %v1766_v34 = vsub.f32 %v1670_v45, %v1728_v54  ;;  %v1676_v54 = vmul.f32 %v3654_v17, %v4681_v28 }
 0xca5   :  { %v1730_v11 = vpop.permute.xlu0 %1729 }
 0xca6   :  { %1717 = vrot.lane.b32.xlu1 %v1681_v60, %s3730_s10  ;;  %1723 = vrot.lane.b32.xlu0 %v1684_v19, %s3730_s10  ;;  %v1767_v48 = vsub.f32 %v1671_v18, %v1730_v11  ;;  %v1662_v18 = vmul.f32 %v3655_v51, %v4623_v20 }
 0xca9   :  { %v1736_v15 = vpop.permute.xlu0 %1735 }
 0xcaa   :  { %1721 = vrot.lane.b32.xlu1 %v1683_v10, %s3730_s10  ;;  %3363 = vrot.lane.b32.xlu0 %v3362_v61, %s3721_s20  ;;  %v1770_v60 = vsub.f32 %v1674_v63, %v1736_v15  ;;  %v3653_v10 = vld [vmem:[%s5188_s1 + $0x70] sm:$0xff] }
 0xcab   :  { %v1675_v61 = vmul.f32 %v3653_v10, %v4685_v27  ;;  %v3659_v63 = vld [vmem:[%s5188_s1 + $0x30] sm:$0xff]  ;;  %v3661_v10 = vld [vmem:[%s5188_s1 + $0x28] sm:$0xff] }
 0xcac   :  { %v1667_v1 = vmul.f32 %v3659_v63, %v4719_v33  ;;  %v3662_v33 = vld [vmem:[%s5188_s1 + $0x20] sm:$0xff] }
 0xcad   :  { %v1665_v17 = vmul.f32 %v3662_v33, %v4705_v38 }
 0xcae   :  { %3358 = vrot.lane.b32.xlu1 %v3357_v5, %s3721_s20 }
 0xcf8   :  { %v3329_v9 = vpop.permute.xlu1 %3328 }
 0xcf9   :  { %v3331_v46 = vunpack.i.h.bf16 %v3329_v9  ;;  %v3330_v26 = vunpack.i.l.bf16 %v3329_v9 }
 0xcfb   :  { %v1957_v37 = vsel %vm683_vm1, %v1765_v0, %v3330_v26  ;;  %v1958_v4 = vsel %vm683_vm1, %v1766_v34, %v3331_v46 }
 0xcfc   :  { %v1969_v30 = vpack.c.bf16 %v1958_v4, %v1957_v37  ;;  %v1732_v42 = vpop.permute.xlu1 %1731  ;;  %v3334_v24 = vpop.permute.xlu0 %3333  ;;  %v3656_v37 = vld [vmem:[%s5188_s1 + $0x18] sm:$0xff] }
 0xcfd   :  { %v1768_v39 = vsub.f32 %v1672_v31, %v1732_v42  ;;  %v3336_v43 = vunpack.i.h.bf16 %v3334_v24  ;;  %v3335_v32 = vunpack.i.l.bf16 %v3334_v24  ;;  %v1664_v4 = vmul.f32 %v3656_v37, %v4691_v50 }
 0xcfe   :  { %3238 = vmatprep.subr.msk.bf16.mxu0 %vm708_vm2, %v1969_v30  ;;  %v1986_v53 = vsel %vm708_vm2, %v1969_v30, 0  ;;  %v1661_v31 = vmul.f32 %v3657_v49, %v4619_v8  ;;  %v3658_v30 = vld [vmem:[%s5188_s1 + $0x10] sm:$0xff] }
 0xcff   :  { %v1960_v47 = vsel %vm683_vm1, %v1768_v39, %v3336_v43  ;;  %v1959_v6 = vsel %vm683_vm1, %v1767_v48, %v3335_v32  ;;  %3179 = vmatpush3.bf16.xpose.msra.mxu0 %v1986_v53  ;;  %v1663_v42 = vmul.f32 %v3658_v30, %v4695_v12  ;;  %v3666_v49 = vld [vmem:[%s5190_s3 + $0x10] sm:$0xff] }
 0xd00   :  { %v1970_v55 = vpack.c.bf16 %v1960_v47, %v1959_v6  ;;  %v1734_v7 = vpop.permute.xlu1 %1733  ;;  %v1738_v25 = vpop.permute.xlu0 %1737 }
 0xd01   :  { %v1769_v19 = vsub.f32 %v1673_v3, %v1734_v7  ;;  %v1771_v56 = vsub.f32 %v1675_v61, %v1738_v25  ;;  %v1666_v61 = vmul.f32 %v3661_v10, %v4703_v21 }
 0xd02   :  { %3239 = vmatprep.subr.msk.bf16.mxu0 %vm708_vm2, %v1970_v55  ;;  %v1989_v5 = vsel %vm708_vm2, %v1970_v55, 0 }
 0xd04   :  { %v1740_v59 = vpop.permute.xlu1 %1739  ;;  %v1712_v40 = vpop.permute.xlu0 %1711 }
 0xd05   :  { %v1772_v45 = vsub.f32 %v1676_v54, %v1740_v59  ;;  %v1758_v20 = vsub.f32 %v1662_v18, %v1712_v40  ;;  %v3665_v18 = vld [vmem:[%s5190_s3 + $0x8] sm:$0xff] }
 0xd07   :  { %3181 = vmatpush3.bf16.xpose.msra.mxu0 %v1989_v5 }
 0xd08   :  { %v3339_v62 = vpop.permute.xlu1 %3338  ;;  %v1716_v29 = vpop.permute.xlu0 %1715 }
 0xd09   :  { %v3341_v14 = vunpack.i.h.bf16 %v3339_v62  ;;  %v3340_v44 = vunpack.i.l.bf16 %v3339_v62  ;;  %v1760_v24 = vsub.f32 %v1664_v4, %v1716_v29  ;;  %v3660_v29 = vld [vmem:[%s5188_s1 + $0x38] sm:$0xff] }
 0xd0b   :  { %v1961_v22 = vsel %vm683_vm1, %v1769_v19, %v3340_v44  ;;  %v1962_v11 = vsel %vm683_vm1, %v1770_v60, %v3341_v14  ;;  %v1668_v60 = vmul.f32 %v3660_v29, %v4717_v52 }
 0xd0c   :  { %v1971_v36 = vpack.c.bf16 %v1962_v11, %v1961_v22  ;;  %v1710_v57 = vpop.permute.xlu1 %1709  ;;  %v3349_v35 = vpop.permute.xlu0 %3348 }
 0xd0d   :  { %v3351_v15 = vunpack.i.h.bf16 %v3349_v35  ;;  %v3350_v9 = vunpack.i.l.bf16 %v3349_v35  ;;  %v1757_v48 = vsub.f32 %v1661_v31, %v1710_v57 }
 0xd0e   :  { %3240 = vmatprep.subr.msk.bf16.mxu0 %vm708_vm2, %v1971_v36  ;;  %v1992_v27 = vsel %vm708_vm2, %v1971_v36, 0 }
 0xd0f   :  { %v1964_v0 = vsel %vm683_vm1, %v1772_v45, %v3351_v15  ;;  %v1963_v34 = vsel %vm683_vm1, %v1771_v56, %v3350_v9  ;;  %3183 = vmatpush3.bf16.xpose.msra.mxu0 %v1992_v27 }
 0xd10   :  { %v1972_v28 = vpack.c.bf16 %v1964_v0, %v1963_v34  ;;  %v1714_v46 = vpop.permute.xlu1 %1713  ;;  %v1720_v26 = vpop.permute.xlu0 %1719  ;;  %v3663_v0 = vld [vmem:[%s5190_s3] sm:$0xff] }
 0xd11   :  { %v1759_v39 = vsub.f32 %v1663_v42, %v1714_v46  ;;  %v1762_v52 = vsub.f32 %v1666_v61, %v1720_v26  ;;  %v3664_v26 = vld [vmem:[%s5190_s3 + $0x18] sm:$0xff] }
 0xd12   :  { %3241 = vmatprep.subr.msk.bf16.mxu0 %vm708_vm2, %v1972_v28  ;;  %v1995_v8 = vsel %vm708_vm2, %v1972_v28, 0 }
 0xd14   :  { %v3344_v43 = vpop.permute.xlu1 %3343  ;;  %v3354_v50 = vpop.permute.xlu0 %3353 }
 0xd15   :  { %v3346_v32 = vunpack.i.h.bf16 %v3344_v43  ;;  %v3345_v53 = vunpack.i.l.bf16 %v3344_v43  ;;  %v3356_v47 = vunpack.i.h.bf16 %v3354_v50  ;;  %v3355_v6 = vunpack.i.l.bf16 %v3354_v50 }
 0xd17   :  { %v1949_v55 = vsel %vm683_vm1, %v1757_v48, %v3345_v53  ;;  %v1950_v7 = vsel %vm683_vm1, %v1758_v20, %v3346_v32  ;;  %v1952_v12 = vsel %vm683_vm1, %v1760_v24, %v3356_v47  ;;  %v1951_v25 = vsel %vm683_vm1, %v1759_v39, %v3355_v6  ;;  %3185 = vmatpush3.bf16.xpose.msra.mxu0 %v1995_v8  ;;  %v3667_v39 = vld [vmem:[%s5190_s3 + $0x20] sm:$0xff]  ;;  %v3668_v53 = vld [vmem:[%s5190_s3 + $0x28] sm:$0xff]  ;;  %v3669_v8 = vld [vmem:[%s5190_s3 + $0x30] sm:$0xff] }
 0xd18   :  { %v1965_v59 = vpack.c.bf16 %v1950_v7, %v1949_v55  ;;  %v1966_v40 = vpack.c.bf16 %v1952_v12, %v1951_v25  ;;  %v1718_v5 = vpop.permute.xlu1 %1717  ;;  %v1724_v41 = vpop.permute.xlu0 %1723  ;;  %v3670_v7 = vld [vmem:[%s5190_s3 + $0x38] sm:$0xff] }
 0xd19   :  { %v1764_v54 = vsub.f32 %v1668_v60, %v1724_v41  ;;  %v1761_v11 = vsub.f32 %v1665_v17, %v1718_v5 }
 0xd1a   :  { %3186 = vmatprep.mubr.msk.bf16.mxu0 %vm708_vm2, %v1965_v59 }
 0xd1c   :  { %v1722_v3 = vpop.permute.xlu1 %1721  ;;  %v3364_v62 = vpop.permute.xlu0 %3363 }
 0xd1d   :  { %v1763_v19 = vsub.f32 %v1667_v1, %v1722_v3  ;;  %v3366_v14 = vunpack.i.h.bf16 %v3364_v62  ;;  %v3365_v44 = vunpack.i.l.bf16 %v3364_v62 }
 0xd1e   :  { %3187 = vmatmul.mubr.msk.bf16.vlgmr.msra.gmra.mrb[24].mxu0 %vm708_vm2, %v1966_v40 }
 0xd1f   :  { %v1956_v35 = vsel %vm683_vm1, %v1764_v54, %v3366_v14  ;;  %v1955_v56 = vsel %vm683_vm1, %v1763_v19, %v3365_v44 }
 0xd20   :  { %v3359_v22 = vpop.permute.xlu1 %3358  ;;  %v1968_v9 = vpack.c.bf16 %v1956_v35, %v1955_v56 }
 0xd21   :  { %v3361_v36 = vunpack.i.h.bf16 %v3359_v22  ;;  %v3360_v57 = vunpack.i.l.bf16 %v3359_v22 }
 0xd23   :  { %v1953_v45 = vsel %vm683_vm1, %v1761_v11, %v3360_v57  ;;  %v1954_v21 = vsel %vm683_vm1, %v1762_v52, %v3361_v36 }
 0xd24   :  { %v1967_v15 = vpack.c.bf16 %v1954_v21, %v1953_v45 }
 0xd26   :  { %3190 = vmatprep.mubr.msk.bf16.mxu0 %vm708_vm2, %v1967_v15 }
 0xd27   :  { %3191 = vmatmul.mubr.msk.bf16.gmra.mrb[28].mxu0 %vm708_vm2, %v1968_v9 }
 0xd28   :  { %2494 = vmatprep.mubr.bf16.mxu0 %v5256_v16 }
 0xdf1   :  { %v3188_v38 = vpop.f32.mrb[24].mxu0 }
 0xdf2   :  { %v2031_v27 = vpop.f32.mrb[25].mxu0  ;;  %v2040_v31 = vadd.f32 %v3666_v49, %v3188_v38 }
 0xdf3   :  { %v2032_v34 = vadd.f32 %v3663_v0, %v2031_v27  ;;  %v3189_v28 = vpop.f32.mrb[26].mxu0 }
 0xdf4   :  { %v2034_v46 = vpop.f32.mrb[27].mxu0  ;;  %v2043_v51 = vadd.f32 %v3664_v26, %v3189_v28  ;;  %v2068_v48 = vsel %vm92_vm0, %v2040_v31, -inf }
 0xdf5   :  { %v2035_v37 = vadd.f32 %v3665_v18, %v2034_v46  ;;  %v2062_v4 = vsel %vm92_vm0, %v2032_v34, -inf }
 0xdf6   :  { %2063 = vmax.xlane.f32.xlu1 %v2062_v4  ;;  %v2071_v42 = vsel %vm92_vm0, %v2043_v51, -inf }
 0xdf7   :  { %v2065_v30 = vsel %vm92_vm0, %v2035_v37, -inf }
 0xdf8   :  { %2066 = vmax.xlane.f32.xlu0 %v2065_v30 }
 0xdfa   :  { %v3192_v20 = vpop.f32.mrb[28].mxu0  ;;  %2072 = vmax.xlane.f32.xlu1 %v2071_v42 }
 0xdfb   :  { %v2047_v24 = vpop.f32.mrb[29].mxu0  ;;  %v2056_v55 = vadd.f32 %v3669_v8, %v3192_v20 }
 0xdfc   :  { %v2048_v43 = vadd.f32 %v3667_v39, %v2047_v24  ;;  %v3193_v50 = vpop.f32.mrb[30].mxu0  ;;  %2069 = vmax.xlane.f32.xlu0 %v2068_v48 }
 0xdfd   :  { %v2050_v32 = vpop.f32.mrb[31].mxu0  ;;  %v2059_v12 = vadd.f32 %v3670_v7, %v3193_v50  ;;  %v2080_v59 = vsel %vm92_vm0, %v2056_v55, -inf }
 0xdfe   :  { %v2051_v47 = vadd.f32 %v3668_v53, %v2050_v32  ;;  %v2074_v6 = vsel %vm92_vm0, %v2048_v43, -inf }
 0xdff   :  { %v2083_v40 = vsel %vm92_vm0, %v2059_v12, -inf }
 0xe00   :  { %2075 = vmax.xlane.f32.xlu0 %v2074_v6  ;;  %v2077_v25 = vsel %vm92_vm0, %v2051_v47, -inf }
 0xe01   :  { %2078 = vmax.xlane.f32.xlu1 %v2077_v25 }
 0xe04   :  { %2081 = vmax.xlane.f32.xlu0 %v2080_v59 }
 0xe05   :  { %2084 = vmax.xlane.f32.xlu1 %v2083_v40 }
 0xe83   :  { %v2064_v5 = vpop.xlane.xlu1 %2063 }
 0xe84   :  { %v2086_v3 = vsub.f32 %v2032_v34, %v2064_v5 }
 0xe85   :  { %v2067_v41 = vpop.xlane.xlu0 %2066 }
 0xe86   :  { %v2087_v63 = vsub.f32 %v2035_v37, %v2067_v41  ;;  %v2094_v44 = vmul.f32 1.442695, %v2086_v3 }
 0xe87   :  { %v2073_v1 = vpop.xlane.xlu1 %2072 }
 0xe88   :  { %v2089_v62 = vsub.f32 %v2043_v51, %v2073_v1  ;;  %v2096_v29 = vmul.f32 1.442695, %v2087_v63 }
 0xe89   :  { %v2070_v60 = vpop.xlane.xlu0 %2069 }
 0xe8a   :  { %v2100_v19 = vmul.f32 1.442695, %v2089_v62  ;;  %v2088_v14 = vsub.f32 %v2040_v31, %v2070_v60 }
 0xe8c   :  { %3573 = vpow2.f32 %v2100_v19  ;;  %v2098_v10 = vmul.f32 1.442695, %v2088_v14 }
 0xe8d   :  { %3575 = vpow2.f32 %v2096_v29  ;;  %v2076_v61 = vpop.xlane.xlu0 %2075 }
 0xe8e   :  { %3577 = vpow2.f32 %v2098_v10  ;;  %v2090_v33 = vsub.f32 %v2048_v43, %v2076_v61  ;;  %v2079_v34 = vpop.xlane.xlu1 %2078 }
 0xe8f   :  { %3579 = vpow2.f32 %v2094_v44  ;;  %v2091_v26 = vsub.f32 %v2051_v47, %v2079_v34 }
 0xe90   :  { %v2102_v22 = vmul.f32 1.442695, %v2090_v33 }
 0xe91   :  { %v2082_v17 = vpop.xlane.xlu0 %2081  ;;  %v2104_v18 = vmul.f32 1.442695, %v2091_v26 }
 0xe92   :  { %v2092_v54 = vsub.f32 %v2056_v55, %v2082_v17  ;;  %v2085_v28 = vpop.xlane.xlu1 %2084 }
 0xe93   :  { %v2093_v46 = vsub.f32 %v2059_v12, %v2085_v28 }
 0xe94   :  { %v2106_v52 = vmul.f32 1.442695, %v2092_v54 }
 0xe95   :  { %v2108_v51 = vmul.f32 1.442695, %v2093_v46 }
 0xe96   :  { %v4974_v11 = vpop.eup %3573  ;;  %3581 = vpow2.f32 %v2106_v52 }
 0xe97   :  { %v3576_v36 = vpop.eup %3575  ;;  %v2119_v57 = vsel %vm92_vm0, %v4974_v11, 0.0  ;;  %3583 = vpow2.f32 %v2102_v22 }
 0xe98   :  { %v4978_v35 = vpop.eup %3577  ;;  %2120 = vadd.xlane.f32.xlu1 %v2119_v57  ;;  %v2113_v21 = vsel %vm92_vm0, %v3576_v36, 0.0  ;;  %3585 = vpow2.f32 %v2108_v51  ;;  %v3465_v57 = vld [vmem:[%s5192_s5 + $0x20] sm:$0xff]  }
 0xe99   :  { %v2116_v56 = vsel %vm92_vm0, %v4978_v35, 0.0  ;;  %v3580_v45 = vpop.eup %3579  ;;  %3587 = vpow2.f32 %v2104_v18 }
 0xe9a   :  { %2117 = vadd.xlane.f32.xlu0 %v2116_v56  ;;  %v2110_v15 = vsel %vm92_vm0, %v3580_v45, 0.0  ;;  %v3467_v56 = vld [vmem:[%s5192_s5 + $0x30] sm:$0xff]  }
 0xe9c   :  { %2114 = vadd.xlane.f32.xlu1 %v2113_v21 }
 0xe9e   :  { %2111 = vadd.xlane.f32.xlu0 %v2110_v15 }
 0xea0   :  { %v4984_v9 = vpop.eup %3581 }
 0xea1   :  { %v2128_v38 = vsel %vm92_vm0, %v4984_v9, 0.0  ;;  %v4988_v27 = vpop.eup %3583 }
 0xea2   :  { %2129 = vadd.xlane.f32.xlu0 %v2128_v38  ;;  %v2122_v0 = vsel %vm92_vm0, %v4988_v27, 0.0  ;;  %v3586_v37 = vpop.eup %3585 }
 0xea3   :  { %v2131_v4 = vsel %vm92_vm0, %v3586_v37, 0.0  ;;  %v3588_v49 = vpop.eup %3587 }
 0xea4   :  { %v2125_v31 = vsel %vm92_vm0, %v3588_v49, 0.0 }
 0xea6   :  { %2123 = vadd.xlane.f32.xlu0 %v2122_v0 }
 0xead   :  { %3373 = vrot.lane.b32.xlu1 %v4627_v23, %s3728_s29  ;;  %s3733_s29 = smov [#allocation5]  }
 0xebc   :  { %3368 = vrot.lane.b32.xlu0 %v4627_v23, %s3727_s28 }
 0xed1   :  { %2132 = vadd.xlane.f32.xlu1 %v2131_v4 }
 0xed5   :  { %2126 = vadd.xlane.f32.xlu1 %v2125_v31 }
 0xee6   :  { %3378 = vrot.lane.b32.xlu1 %v4627_v23, %s3729_s30  ;;  %s2850_s30 = sshll.u32 %s3733_s29, 4  ;;  %s2851_s30 = int_to_ptr.vmem [resolvable:$true] %s2850_s30 }
 0xee7   :  { %p3698_p9 = scmp.lt.s32.totalorder %s2851_s30, %s2851_s30 }
 0xf25   :  { %v2121_v30 = vpop.xlane.xlu1 %2120 }
 0xf27   :  { %v2118_v42 = vpop.xlane.xlu0 %2117 }
 0xf29   :  { %v2115_v20 = vpop.xlane.xlu1 %2114 }
 0xf2a   :  { %3589 = vrcp.f32 %v2115_v20 }
 0xf2b   :  { %v2112_v24 = vpop.xlane.xlu0 %2111 }
 0xf2c   :  { %3591 = vrcp.f32 %v2112_v24 }
 0xf2d   :  { %v3374_v50 = vpop.permute.xlu1 %3373  ;;  %3593 = vrcp.f32 %v2118_v42 }
 0xf2e   :  { %v3376_v8 = vunpack.i.h.bf16 %v3374_v50  ;;  %v3375_v55 = vunpack.i.l.bf16 %v3374_v50  ;;  %3595 = vrcp.f32 %v2121_v30 }
 0xf2f   :  { %v2130_v48 = vpop.xlane.xlu0 %2129 }
 0xf30   :  { %v2156_v59 = vpack.c.bf16 %v3376_v8, %v3375_v55 }
 0xf33   :  { %v2124_v39 = vpop.xlane.xlu0 %2123 }
 0xf34   :  { %v3590_v43 = vpop.eup %3589  ;;  %3597 = vrcp.f32 %v2124_v39 }
 0xf35   :  { %v2143_v6 = vmul.f32 %v3590_v43, %v3576_v36 }
 0xf36   :  { %v3592_v32 = vpop.eup %3591 }
 0xf37   :  { %v3369_v53 = vpop.permute.xlu0 %3368  ;;  %v2142_v47 = vmul.f32 %v3592_v32, %v3580_v45  ;;  %v3594_v41 = vpop.eup %3593 }
 0xf38   :  { %v3371_v7 = vunpack.i.h.bf16 %v3369_v53  ;;  %v3370_v12 = vunpack.i.l.bf16 %v3369_v53  ;;  %v3596_v62 = vpop.eup %3595  ;;  %v2144_v29 = vmul.f32 %v3594_v41, %v4978_v35  ;;  %v3466_v35 = vld [vmem:[%s5192_s5 + $0x28] sm:$0xff]  }
 0xf39   :  { %v2150_v25 = vpack.c.bf16 %v2143_v6, %v2142_v47  ;;  %v2145_v14 = vmul.f32 %v3596_v62, %v4974_v11  ;;  %v3472_v41 = vld [vmem:[%s5193_s6 + $0x88] ss:$16 sps:$4 sm:$0xff]  }
 0xf3a   :  { %v2155_v23 = vpack.c.bf16 %v3371_v7, %v3370_v12  ;;  %v3478_v62 = vld [vmem:[%s5193_s6 + $0xa8] ss:$16 sps:$4 sm:$0xff]  }
 0xf3b   :  { %3202 = vmatprep.mubr.msk.bf16.mxu1 %vm92_vm0, %v2150_v25  ;;  %v2151_v10 = vpack.c.bf16 %v2145_v14, %v2144_v29  ;;  %v3483_v29 = vld [vmem:[%s5193_s6 + $0xc4] ss:$16 sps:$4 sm:$0xff]   ;;  %v3484_v14 = vld [vmem:[%s5193_s6 + $0xc8] ss:$16 sps:$4 sm:$0xff]  }
 0xf3c   :  { %3196 = vmatprep.subr.bf16.mxu1 %v2155_v23 }
 0xf3d   :  { %3197 = vmatpush3.bf16.msra.mxu1 %v2155_v23 }
 0xf3e   :  { %3198 = vmatprep.subr.bf16.mxu1 %v2156_v59  ;;  %v3598_v19 = vpop.eup %3597 }
 0xf3f   :  { %v2146_v33 = vmul.f32 %v3598_v19, %v4988_v27  ;;  %v3468_v27 = vld [vmem:[%s5192_s5 + $0x38] sm:$0xff]   ;;  %v3481_v19 = vld [vmem:[%s5193_s6 + $0xc0] ss:$16 sps:$4 sm:$0xff]  }
 0xf41   :  { %3199 = vmatpush3.bf16.msra.mxu1 %v2156_v59 }
 0xf5e   :  { %v2133_v40 = vpop.xlane.xlu1 %2132 }
 0xf62   :  { %v2127_v5 = vpop.xlane.xlu1 %2126 }
 0xf63   :  { %3599 = vrcp.f32 %v2127_v5  ;;  %v3469_v5 = vld [vmem:[%s5193_s6 + $0x80] ss:$16 sps:$4 sm:$0xff]  }
 0xf64   :  { %3601 = vrcp.f32 %v2133_v40 }
 0xf65   :  { %3603 = vrcp.f32 %v2130_v48 }
 0xf66   :  { %v3379_v63 = vpop.permute.xlu1 %3378 }
 0xf67   :  { %v3381_v1 = vunpack.i.h.bf16 %v3379_v63  ;;  %v3380_v3 = vunpack.i.l.bf16 %v3379_v63  ;;  %v3477_v63 = vld [vmem:[%s5193_s6 + $0xa4] ss:$16 sps:$4 sm:$0xff]  }
 0xf69   :  { %v2157_v60 = vpack.c.bf16 %v3381_v1, %v3380_v3  ;;  %v3480_v1 = vld [vmem:[%s5193_s6 + $0xac] ss:$16 sps:$4 sm:$0xff]   ;;  %v3475_v3 = vld [vmem:[%s5193_s6 + $0xa0] ss:$16 sps:$4 sm:$0xff]  }
 0xf6b   :  { %3200 = vmatprep.subr.bf16.mxu1 %v2157_v60 }
 0xf6c   :  { %3201 = vmatpush3.bf16.msra.mxu1 %v2157_v60  ;;  %v3486_v60 = vld [vmem:[%s5193_s6 + $0xcc] ss:$16 sps:$4 sm:$0xff]  }
 0xf6d   :  { %v3600_v44 = vpop.eup %3599  ;;  %3210 = vmatprep.subr.bf16.mxu1 %v3731_v2 }
 0xf6e   :  { %v3602_v61 = vpop.eup %3601  ;;  %v2147_v17 = vmul.f32 %v3600_v44, %v3588_v49  ;;  %v3489_v44 = vld [vmem:[%s5193_s6 + $0xe4] ss:$16 sps:$4 sm:$0xff]  }
 0xf6f   :  { %3203 = vmatmul.mubr.msk.bf16.vlgmr.msra.gmra.mrb[16].mxu1 %vm92_vm0, %v2151_v10  ;;  %v3604_v54 = vpop.eup %3603  ;;  %v2149_v52 = vmul.f32 %v3602_v61, %v3586_v37  ;;  %v3492_v10 = vld [vmem:[%s5193_s6 + $0xec] ss:$16 sps:$4 sm:$0xff]   ;;  %v3487_v61 = vld [vmem:[%s5193_s6 + $0xe0] ss:$16 sps:$4 sm:$0xff]  }
 0xf70   :  { %v2152_v22 = vpack.c.bf16 %v2147_v17, %v2146_v33  ;;  %v2148_v36 = vmul.f32 %v3604_v54, %v4984_v9  ;;  %3211 = vmatpush3.bf16.msra.mxu1 %v3465_v57  ;;  %v3490_v33 = vld [vmem:[%s5193_s6 + $0xe8] ss:$16 sps:$4 sm:$0xff]  }
 0xf71   :  { %3212 = vmatprep.subr.bf16.mxu1 %v3731_v2 }
 0xf72   :  { %3206 = vmatprep.mubr.msk.bf16.mxu1 %vm92_vm0, %v2152_v22  ;;  %v2153_v11 = vpack.c.bf16 %v2149_v52, %v2148_v36 }
 0xf74   :  { %3213 = vmatpush3.bf16.msra.mxu1 %v3466_v35 }
 0xf75   :  { %3214 = vmatprep.subr.bf16.mxu1 %v3731_v2 }
 0xf77   :  { %3207 = vmatmul.mubr.msk.bf16.gmra.mrb[20].mxu1 %vm92_vm0, %v2153_v11 }
 0xf78   :  { %3218 = vmatprep.mubr.msk.bf16.mxu1 %vm3732_vm3, %v3731_v2  ;;  %3215 = vmatpush3.bf16.msra.mxu1 %v3467_v56 }
 0xf79   :  { %3216 = vmatprep.subr.bf16.mxu1 %v3731_v2 }
 0xf7c   :  { %3217 = vmatpush3.bf16.msra.mxu1 %v3468_v27  ;;  %v3496_v27 = vld [vmem:[%s5194_s7 + $0x88] sm:$0xff]  }
0x1042   :  { %v3204_v45 = vpop.f32.mrb[16].mxu1 }
0x1043   :  { %v2204_v21 = vpop.f32.mrb[17].mxu1 }
0x1044   :  { %v3205_v15 = vpop.f32.mrb[18].mxu1 }
0x1045   :  { %v3382_v9 = vpack.i.bf16 %v3205_v15, %v3204_v45  ;;  %v2207_v38 = vpop.f32.mrb[19].mxu1  ;;  %v3493_v15 = vld [vmem:[%s5194_s7 + $0xc0] sm:$0xff]  }
0x1047   :  { %3383 = vrot.lane.b32.xlu0 %v3382_v9, %s3726_s24  ;;  %v3494_v9 = vld [vmem:[%s5194_s7 + $0x80] sm:$0xff]  }
0x104a   :  { %v3208_v0 = vpop.f32.mrb[20].mxu1 }
0x104b   :  { %v2220_v34 = vpop.f32.mrb[21].mxu1 }
0x104c   :  { %v3209_v28 = vpop.f32.mrb[22].mxu1 }
0x104d   :  { %v3392_v46 = vpack.i.bf16 %v3209_v28, %v3208_v0  ;;  %v2223_v26 = vpop.f32.mrb[23].mxu1  ;;  %v3497_v0 = vld [vmem:[%s5194_s7 + $0xd0] sm:$0xff]   ;;  %v3499_v28 = vld [vmem:[%s5194_s7 + $0xd8] sm:$0xff]  }
0x104e   :  { %v3387_v51 = vpack.i.bf16 %v2223_v26, %v2220_v34  ;;  %v3498_v34 = vld [vmem:[%s5194_s7 + $0x90] sm:$0xff]   ;;  %v3501_v26 = vld [vmem:[%s5194_s7 + $0xe0] sm:$0xff]  }
0x104f   :  { %3393 = vrot.lane.b32.xlu0 %v3392_v46, %s3725_s23  ;;  %v3500_v46 = vld [vmem:[%s5194_s7 + $0x98] sm:$0xff]  }
0x1050   :  { %3388 = vrot.lane.b32.xlu1 %v3387_v51, %s3724_s18  ;;  %v3502_v51 = vld [vmem:[%s5194_s7 + $0xa0] sm:$0xff]  }
0x10b9   :  { %v3384_v18 = vpop.permute.xlu0 %3383 }
0x10ba   :  { %v3386_v37 = vunpack.i.h.bf16 %v3384_v18  ;;  %v3385_v4 = vunpack.i.l.bf16 %v3384_v18  ;;  %v3503_v18 = vld [vmem:[%s5194_s7 + $0xe8] sm:$0xff]  }
0x10bc   :  { %v2259_v20 = vsel %vm708_vm2, %v2204_v21, %v3385_v4  ;;  %v2260_v24 = vsel %vm708_vm2, %v2207_v38, %v3386_v37  ;;  %v3495_v38 = vld [vmem:[%s5194_s7 + $0xc8] sm:$0xff]   ;;  %v3505_v4 = vld [vmem:[%s5194_s7 + $0xf0] sm:$0xff]  }
0x10bd   :  { %v3504_v37 = vld [vmem:[%s5194_s7 + $0xa8] sm:$0xff]  }
0x10c1   :  { %v3394_v49 = vpop.permute.xlu0 %3393 }
0x10c2   :  { %v3389_v31 = vpop.permute.xlu1 %3388  ;;  %v3396_v48 = vunpack.i.h.bf16 %v3394_v49  ;;  %v3395_v39 = vunpack.i.l.bf16 %v3394_v49  ;;  %v3506_v49 = vld [vmem:[%s5194_s7 + $0xb0] sm:$0xff]  }
0x10c3   :  { %v3391_v30 = vunpack.i.h.bf16 %v3389_v31  ;;  %v3390_v42 = vunpack.i.l.bf16 %v3389_v31  ;;  %v3507_v31 = vld [vmem:[%s5194_s7 + $0xf8] sm:$0xff]  }
0x10c5   :  { %v2262_v43 = vsel %vm997_vm4, %v2260_v24, %v3391_v30  ;;  %v2261_v50 = vsel %vm997_vm4, %v2259_v20, %v3390_v42  ;;  %v3508_v30 = vld [vmem:[%s5194_s7 + $0xb8] sm:$0xff]  }
0x10c6   :  { %v2264_v32 = vsel %vm1000_vm5, %v2262_v43, %v3396_v48  ;;  %v2263_v53 = vsel %vm1000_vm5, %v2261_v50, %v3395_v39 }
0x10c7   :  { %v2274_v47 = vpack.c.bf16 %v2264_v32, %v2263_v53 }
0x10c9   :  { %3219 = vmatmul.mubr.msk.bf16.vlgmr.msra.gmra.mrb[24].mxu1 %vm92_vm0, %v2274_v47 }
0x10ca   :  { %2537 = vmatprep.mubr.bf16.mxu1 %v5256_v16 }
0x119c   :  { %v2336_v6 = vpop.f32.mrb[24].mxu1 }
0x119d   :  { %v5038_v8 = vadd.f32 %v2336_v6, %v4581_v13  ;;  %v3220_v55 = vpop.f32.mrb[25].mxu1  ;;  %v3471_v13 = vld [vmem:[%s5193_s6 + $0x84] ss:$16 sps:$4 sm:$0xff]  }
0x119e   :  { %v2339_v7 = vpop.f32.mrb[26].mxu1  ;;  %2462 = vmatprep.subr.bf16.mxu0 %v3471_v13 }
0x119f   :  { %v5041_v12 = vadd.f32 %v2339_v7, %v4584_v58  ;;  %v3221_v25 = vpop.f32.mrb[27].mxu1  ;;  %v2345_v23 = vmul.f32 %v5038_v8, %v5038_v8  ;;  %v3474_v58 = vld [vmem:[%s5193_s6 + $0x8c] ss:$16 sps:$4 sm:$0xff]   ;;  %2463 = vmatpush1.bf16.msra.mxu0 %v3469_v5 }
0x11a0   :  { %2505 = vmatprep.subr.bf16.mxu1 %v3474_v58  ;;  %2464 = vmatprep.subr.bf16.mxu0 %v3477_v63 }
0x11a1   :  { %v2347_v59 = vsel %vm92_vm0, %v2345_v23, 0.0  ;;  %v2346_v40 = vmul.f32 %v5041_v12, %v5041_v12  ;;  %2506 = vmatpush1.bf16.msra.mxu1 %v3472_v41 }
0x11a2   :  { %2348 = vadd.xlane.f32.xlu1 %v2347_v59  ;;  %2507 = vmatprep.subr.bf16.mxu1 %v3480_v1 }
0x11a3   :  { %v2350_v16 = vsel %vm92_vm0, %v2346_v40, 0.0  ;;  %2465 = vmatpush1.bf16.msra.mxu0 %v3475_v3 }
0x11a4   :  { %2351 = vadd.xlane.f32.xlu0 %v2350_v16  ;;  %2466 = vmatprep.subr.bf16.mxu0 %v3483_v29 }
0x11a5   :  { %2508 = vmatpush1.bf16.msra.mxu1 %v3478_v62 }
0x11a6   :  { %2509 = vmatprep.subr.bf16.mxu1 %v3486_v60 }
0x11a7   :  { %2467 = vmatpush1.bf16.msra.mxu0 %v3481_v19 }
0x11a8   :  { %2468 = vmatprep.subr.bf16.mxu0 %v3489_v44 }
0x11a9   :  { %2510 = vmatpush1.bf16.msra.mxu1 %v3484_v14 }
0x11aa   :  { %2511 = vmatprep.subr.bf16.mxu1 %v3492_v10 }
0x11ab   :  { %2469 = vmatpush1.bf16.msra.mxu0 %v3487_v61 }
0x11ac   :  { %3107 = vmatprep.subr.bf16.mxu0 %v3493_v15 }
0x11ad   :  { %2512 = vmatpush1.bf16.msra.mxu1 %v3490_v33 }
0x11ae   :  { %3222 = vmatprep.subr.bf16.mxu1 %v3731_v2 }
0x122f   :  { %v2349_v17 = vpop.xlane.xlu1 %2348 }
0x1230   :  { %v2353_v54 = vmul.f32 0.015625, %v2349_v17 }
0x1231   :  { %v2352_v22 = vpop.xlane.xlu0 %2351 }
0x1232   :  { %v2355_v52 = vadd.f32 1e-05, %v2353_v54  ;;  %v2354_v36 = vmul.f32 0.015625, %v2352_v22 }
0x1234   :  { %3605 = vrsqrt.f32 %v2355_v52  ;;  %v2356_v11 = vadd.f32 1e-05, %v2354_v36 }
0x1236   :  { %3607 = vrsqrt.f32 %v2356_v11 }
0x123e   :  { %v3606_v57 = vpop.eup %3605 }
0x123f   :  { %v2359_v56 = vmul.f32 %v3606_v57, %v5038_v8 }
0x1240   :  { %v3608_v35 = vpop.eup %3607 }
0x1241   :  { %v2360_v45 = vmul.f32 %v3608_v35, %v5041_v12 }
0x1243   :  { %v2378_v21 = vpack.c.bf16 %v2360_v45, %v2359_v56 }
0x1245   :  { %2988 = vmatmul.mubr.msk.bf16.vlgmr.msra.gmra.mrb[32].mxu0 %vm92_vm0, %v2378_v21  ;;  %2989 = vmatmul.mubr.msk.bf16.vlgmr.msra.gmra.mrb[28].mxu1 %vm92_vm0, %v2378_v21 }
0x1246   :  { %3230 = vmatprep.mubr.msk.bf16.mxu1 %vm3732_vm3, %v3731_v2  ;;  %3108 = vmatpush3.bf16.msra.mxu0 %v3494_v9 }
0x1247   :  { %3109 = vmatprep.subr.bf16.mxu0 %v3495_v38 }
0x124a   :  { %3110 = vmatpush3.bf16.msra.mxu0 %v3496_v27 }
0x124b   :  { %3111 = vmatprep.subr.bf16.mxu0 %v3497_v0 }
0x124e   :  { %3112 = vmatpush3.bf16.msra.mxu0 %v3498_v34  ;;  %v3509_v34 = vld [vmem:[%s5195_s8] sm:$0xff]  }
0x124f   :  { %3113 = vmatprep.subr.bf16.mxu0 %v3499_v28  ;;  %3223 = vmatpush3.bf16.msra.mxu1 %v3509_v34  ;;  %v3512_v28 = vld [vmem:[%s5195_s8 + $0x18] sm:$0xff]  }
0x1250   :  { %3224 = vmatprep.subr.bf16.mxu1 %v3731_v2 }
0x1252   :  { %3114 = vmatpush3.bf16.msra.mxu0 %v3500_v46 }
0x1253   :  { %3115 = vmatprep.subr.bf16.mxu0 %v3501_v26 }
0x1256   :  { %3116 = vmatpush3.bf16.msra.mxu0 %v3502_v51 }
0x1257   :  { %3117 = vmatprep.subr.bf16.mxu0 %v3503_v18 }
0x125a   :  { %3118 = vmatpush3.bf16.msra.mxu0 %v3504_v37 }
0x125b   :  { %3119 = vmatprep.subr.bf16.mxu0 %v3505_v4 }
0x125e   :  { %3120 = vmatpush3.bf16.msra.mxu0 %v3506_v49 }
0x125f   :  { %3121 = vmatprep.subr.bf16.mxu0 %v3507_v31 }
0x1262   :  { %3122 = vmatpush3.bf16.msra.mxu0 %v3508_v30 }
0x1318   :  { %v2496_v42 = vpop.f32.mrb[32].mxu0  ;;  %v2539_v20 = vpop.f32.mrb[28].mxu1 }
0x1319   :  { %v2548_v24 = vsub.f32 0.0, %v2496_v42  ;;  %v2498_v48 = vpop.f32.mrb[33].mxu0  ;;  %v2541_v39 = vpop.f32.mrb[29].mxu1 }
0x131a   :  { %v2549_v43 = vsub.f32 0.0, %v2498_v48  ;;  %v2500_v50 = vpop.f32.mrb[34].mxu0  ;;  %v2543_v32 = vpop.f32.mrb[30].mxu1 }
0x131b   :  { %v2552_v53 = vmul.f32 1.442695, %v2548_v24  ;;  %v2550_v47 = vsub.f32 0.0, %v2500_v50  ;;  %v2502_v6 = vpop.f32.mrb[35].mxu0  ;;  %v2545_v55 = vpop.f32.mrb[31].mxu1 }
0x131c   :  { %v2554_v7 = vmul.f32 1.442695, %v2549_v43  ;;  %v2551_v25 = vsub.f32 0.0, %v2502_v6 }
0x131d   :  { %3609 = vpow2.f32 %v2552_v53  ;;  %v2556_v23 = vmul.f32 1.442695, %v2550_v47 }
0x131e   :  { %3611 = vpow2.f32 %v2554_v7  ;;  %v2558_v59 = vmul.f32 1.442695, %v2551_v25 }
0x131f   :  { %3613 = vpow2.f32 %v2556_v23 }
0x1320   :  { %3615 = vpow2.f32 %v2558_v59 }
0x1327   :  { %v3610_v40 = vpop.eup %3609 }
0x1328   :  { %v3612_v16 = vpop.eup %3611  ;;  %v2560_v13 = vadd.f32 1.0, %v3610_v40 }
0x1329   :  { %v3614_v58 = vpop.eup %3613  ;;  %v2561_v5 = vadd.f32 1.0, %v3612_v16 }
0x132a   :  { %v3616_v41 = vpop.eup %3615  ;;  %3617 = vrcp.f32 %v2560_v13  ;;  %v2562_v63 = vadd.f32 1.0, %v3614_v58 }
0x132b   :  { %3619 = vrcp.f32 %v2561_v5  ;;  %v2563_v1 = vadd.f32 1.0, %v3616_v41 }
0x132c   :  { %3621 = vrcp.f32 %v2562_v63 }
0x132d   :  { %3623 = vrcp.f32 %v2563_v1 }
0x1334   :  { %v3618_v3 = vpop.eup %3617 }
0x1335   :  { %v3620_v62 = vpop.eup %3619  ;;  %v2568_v29 = vmul.f32 %v3618_v3, %v2496_v42 }
0x1336   :  { %v3622_v60 = vpop.eup %3621  ;;  %v2569_v19 = vmul.f32 %v3620_v62, %v2498_v48 }
0x1337   :  { %v3624_v14 = vpop.eup %3623  ;;  %v2572_v44 = vmul.f32 %v2568_v29, %v2539_v20  ;;  %v2570_v10 = vmul.f32 %v3622_v60, %v2500_v50 }
0x1338   :  { %v2573_v61 = vmul.f32 %v2569_v19, %v2541_v39  ;;  %v2571_v33 = vmul.f32 %v3624_v14, %v2502_v6 }
0x1339   :  { %v2574_v17 = vmul.f32 %v2570_v10, %v2543_v32 }
0x133a   :  { %v2575_v54 = vmul.f32 %v2571_v33, %v2545_v55 }
0x133b   :  { %v2609_v22 = vpack.c.bf16 %v2574_v17, %v2572_v44 }
0x133c   :  { %v2610_v52 = vpack.c.bf16 %v2575_v54, %v2573_v61 }
0x133e   :  { %2739 = vmatprep.mubr.bf16.mxu0 %v2610_v52 }
0x133f   :  { %2740 = vmatmul.mubr.bf16.vlgmr.msra.gmra.mrb[36].mxu0 %v2609_v22 }
0x1412   :  { %v3123_v36 = vpop.f32.mrb[36].mxu0 }
0x1413   :  { %v3124_v11 = vpop.f32.mrb[37].mxu0 }
0x1414   :  { %v3125_v57 = vadd.f32 %v3124_v11, %v3123_v36  ;;  %v3126_v35 = vpop.f32.mrb[38].mxu0 }
0x1415   :  { %v3127_v56 = vpop.f32.mrb[39].mxu0 }
0x1416   :  { %v2748_v45 = vadd.f32 %v3125_v57, %v5038_v8  ;;  %v3128_v21 = vadd.f32 %v3127_v56, %v3126_v35  ;;  %v3510_v8 = vld [vmem:[%s5195_s8 + $0x8] sm:$0xff]  }
0x1417   :  { %3225 = vmatpush3.bf16.msra.mxu1 %v3510_v8 }
0x1418   :  { %v2749_v15 = vadd.f32 %v3128_v21, %v5041_v12  ;;  %v2750_v9 = vmul.f32 %v2748_v45, %v2748_v45  ;;  %3226 = vmatprep.subr.bf16.mxu1 %v3731_v2  ;;  %v3511_v12 = vld [vmem:[%s5195_s8 + $0x10] sm:$0xff]   ;;  %s3693_s8 = scalar_lea.vmem %s2851_s30, 256 }
0x1419   :  { %p3694_p8 = scmp.ne.s32.totalorder %s2851_s30, %s3693_s8  ;;  %p3699_p10 = scmp.lt.s32.totalorder %s3693_s8, %s3693_s8 }
0x141a   :  { %v2752_v38 = vsel %vm92_vm0, %v2750_v9, 0.0  ;;  %v2751_v27 = vmul.f32 %v2749_v15, %v2749_v15 }
0x141b   :  { %2753 = vadd.xlane.f32.xlu0 %v2752_v38  ;;  %3227 = vmatpush3.bf16.msra.mxu1 %v3511_v12  ;;  %p3700_p11 = por %p3699_p10, %p3698_p9 }
0x141c   :  { %v2755_v0 = vsel %vm92_vm0, %v2751_v27, 0.0  ;;  %3228 = vmatprep.subr.bf16.mxu1 %v3731_v2 }
0x141d   :  { %2756 = vadd.xlane.f32.xlu1 %v2755_v0  ;;  %p3701_p12 = pnand %p3700_p11, %p3694_p8 }
0x141f   :  { %3229 = vmatpush3.bf16.msra.mxu1 %v3512_v28 }
0x14a8   :  { %v2754_v46 = vpop.xlane.xlu0 %2753 }
0x14a9   :  { %v2758_v26 = vmul.f32 0.015625, %v2754_v46 }
0x14aa   :  { %v2757_v51 = vpop.xlane.xlu1 %2756 }
0x14ab   :  { %v2760_v18 = vadd.f32 1e-05, %v2758_v26  ;;  %v2759_v37 = vmul.f32 0.015625, %v2757_v51 }
0x14ad   :  { %3625 = vrsqrt.f32 %v2760_v18  ;;  %v2761_v4 = vadd.f32 1e-05, %v2759_v37 }
0x14af   :  { %3627 = vrsqrt.f32 %v2761_v4 }
0x14b7   :  { %v3626_v49 = vpop.eup %3625 }
0x14b8   :  { %v2764_v30 = vmul.f32 %v3626_v49, %v2748_v45 }
0x14b9   :  { %v3628_v31 = vpop.eup %3627 }
0x14ba   :  { %v2765_v42 = vmul.f32 %v3628_v31, %v2749_v15 }
0x14bc   :  { %v2774_v20 = vpack.c.bf16 %v2765_v42, %v2764_v30 }
0x14be   :  { %3231 = vmatmul.mubr.msk.bf16.vlgmr.msra.gmra.mrb[32].mxu1 %vm92_vm0, %v2774_v20 }
0x1591   :  { %v2836_v2 = vpop.f32.mrb[32].mxu1 }
0x1592   :  { %2843 = vst [vmem:[#allocation5] sm:$0xff] %v2836_v2  ;;  %v3232_v24 = vpop.f32.mrb[33].mxu1 }
0x1593   :  { %v2839_v48 = vpop.f32.mrb[34].mxu1 }
0x1594   :  { %2844 = vst [vmem:[#allocation5 + $0x8] sm:$0xff] %v2839_v48  ;;  %v3233_v39 = vpop.f32.mrb[35].mxu1 }
0x1595   :  { %3704 = shalt.err (!%p3701_p12)
}
0x1596   :  { %s3705_s2 = scalar_lea.hbm %s5196_s9, 256 }
0x1597   :  { %p3706_p13 = scmp.ne.s32.totalorder %s5196_s9, %s3705_s2  ;;  %p3709_p0 = scmp.lt.u32.totalorder %s3705_s2, %s5196_s9 }
0x1599   :  { %p3711_p1 = pnand %p3709_p0, %p3706_p13 }
0x159b   :  { %3714 = shalt.err (!%p3711_p1)
}
0x159c   :  { %2856 = dma.vmem_to_hbm [thread:$0]  %s2851_s30, 256, %s5196_s9, [#allocation4], %s3720_s19, %s3720_s19, %s3721_s20  }
0x159d   :  { %3717 = dma.done.wait [#allocation4], 256  }
0x159e   :  { %3718 = vsyncadd [#allocation4], 4294967040 }
0x159f   :  { %2860 = vsyncpa [#allocation3], 1 }
0x15a0   :  { %2861 = vsyncpa [#allocation4], 1 }

</bundles_post_ra>
